<compile_context>
chip_gen: v7x
topology: tpu7x:2x2x1
jax: 0.10.0
libtpu: 0.0.40
codegen_flags: <defaults>
</compile_context>

<pallas_src>
import math

import numpy as np

import jax
import jax.numpy as jnp
from jax.experimental import pallas as pl
from jax.experimental.pallas import tpu as pltpu


# ----------------------------------------------------------------------------
# In-kernel building blocks (pure value-level ops: static slices, dots, max).
# ----------------------------------------------------------------------------
def _conv_bn_relu(a16, w_ref, b_ref):
    """'same' Conv1d + folded eval-BatchNorm + ReLU on a flat bf16 batch slab.

    a16:   (R, Cin) bf16 value; rows are the per-batch-element zero-padded
           sequences laid out back to back (stride Lp rows per element).
    w_ref: either (K, Cin, Cout) bf16 (tap-loop path) or (K*Cin, Cout) bf16
           (im2col path, used when Cin is a multiple of 128).  BN scale is
           already folded into the weights.
    b_ref: (1, Cout) f32 ref, conv bias with BN scale/shift folded in.

    Returns (M, Cout) f32 with M = R - K + 1; row b*Lp + l holds the conv
    output at sequence position l of batch element b (all other rows are
    garbage that the following selection matmul discards).
    """
    if len(w_ref.shape) == 2:
        # im2col: lane offsets 0/128/256 are lane-tile aligned, so this is an
        # aligned lane concat feeding one deep MXU contraction.
        cin = a16.shape[1]
        k_taps = w_ref.shape[0] // cin
        m = a16.shape[0] - k_taps + 1
        cols = jnp.concatenate([a16[k:k + m, :] for k in range(k_taps)], axis=1)
        acc = jnp.dot(cols, w_ref[...], preferred_element_type=jnp.float32)
    else:
        k_taps = w_ref.shape[0]
        m = a16.shape[0] - k_taps + 1
        # K-tap accumulation (K = 3 or 5, static); slab is already bf16 so
        # each tap is a plain slice straight into the MXU.
        acc = jnp.dot(a16[0:m, :], w_ref[0], preferred_element_type=jnp.float32)
        for k in range(1, k_taps):
            acc = acc + jnp.dot(a16[k:k + m, :], w_ref[k],
                                preferred_element_type=jnp.float32)
    return jnp.maximum(acc + b_ref[...], 0.0)


def _pool_and_repack(y, s_ref):
    """MaxPool1d(2) + repack rows into the next layer's zero-padded slab.

    z[r] = max(y[r], y[r+1]) holds every pooled value at row r = b*Lp + 2*l.
    The constant 0/1 selection matrix S (bf16, built on the host at init)
    gathers exactly those rows into the next layer's padded slab layout; its
    all-zero rows regenerate the conv halo.  Result is returned in bf16, ready
    for the next conv's MXU dots.
    """
    z16 = jnp.maximum(y[:-1, :], y[1:, :]).astype(jnp.bfloat16)
    out = jnp.dot(s_ref[...], z16, preferred_element_type=jnp.float32)
    return out.astype(jnp.bfloat16)


# ----------------------------------------------------------------------------
# The fused kernel: conv stack + MLP for one batch tile.
# ----------------------------------------------------------------------------
def fused_cnn_kernel(x_ref,
                     w1_ref, b1_ref, w2_ref, b2_ref,
                     w3_ref, b3_ref, w4_ref, b4_ref,
                     s1_ref, s2_ref, s3_ref, s4_ref,
                     fw1_ref, fb1_ref, fw2_ref, fb2_ref, fw3_ref, fb3_ref,
                     o_ref):
    # ---- conv tower (activations never leave VMEM/registers) ----------------
    a = x_ref[...].astype(jnp.bfloat16)          # single hoisted cast of slab
    a = _pool_and_repack(_conv_bn_relu(a, w1_ref, b1_ref), s1_ref)
    a = _pool_and_repack(_conv_bn_relu(a, w2_ref, b2_ref), s2_ref)
    a = _pool_and_repack(_conv_bn_relu(a, w3_ref, b3_ref), s3_ref)
    p = _pool_and_repack(_conv_bn_relu(a, w4_ref, b4_ref), s4_ref)
    # p: (L5*Bt, C4) bf16; row l*Bt + b = pooled[b, l, :].  This is the flatten
    # staging layout; fc1's weights were re-ordered at init to match it, which
    # reproduces PyTorch's channel-major x.flatten(1) on NCL tensors.

    bt = o_ref.shape[0]
    l5 = fw1_ref.shape[0]

    # ---- fc1 (flatten folded into the (L5, C4, 512) weight blocks) ----------
    h = jnp.dot(p[0:bt, :], fw1_ref[0], preferred_element_type=jnp.float32)
    for l in range(1, l5):
        h = h + jnp.dot(p[l * bt:(l + 1) * bt, :], fw1_ref[l],
                        preferred_element_type=jnp.float32)
    h = jnp.maximum(h + fb1_ref[...], 0.0)
    # TODO(synk): Dropout(0.5) is identity in eval mode; train-mode RNG masking
    # is not reproduced.
    h = jnp.dot(h.astype(jnp.bfloat16), fw2_ref[...],
                preferred_element_type=jnp.float32)
    h = jnp.maximum(h + fb2_ref[...], 0.0)
    out = jnp.dot(h.astype(jnp.bfloat16), fw3_ref[...],
                  preferred_element_type=jnp.float32) + fb3_ref[...]
    o_ref[...] = out.astype(o_ref.dtype)         # (Bt, 128) lane-dense store


# ----------------------------------------------------------------------------
# Parameter construction (deterministic, PyTorch-style uniform fan-in init),
# with BN folding, flatten-order folding into fc1, and selection matrices.
# ----------------------------------------------------------------------------
def _uniform(key, shape, bound):
    return jax.random.uniform(key, shape, jnp.float32, -bound, bound)


_CONV_DEFS = [  # (Cin, Cout, K, pad) — Cin of the first layer is n_channels
    (None, 32, 5, 2),
    (32, 64, 3, 1),
    (64, 128, 3, 1),
    (128, 256, 3, 1),
]


def init_params(key, input_shape, n_channels, n_classes, batch_tile):
    eps = 1e-5
    bn_scale = 1.0 / math.sqrt(1.0 + eps)   # eval-mode BN with fresh run-stats

    conv_defs = [(n_channels,) + _CONV_DEFS[0][1:]] + _CONV_DEFS[1:]
    convs, geoms = [], []
    L = input_shape
    for cin, cout, k, pad in conv_defs:
        key, kw, kb = jax.random.split(key, 3)
        bound = 1.0 / math.sqrt(cin * k)
        w_torch = _uniform(kw, (cout, cin, k), bound)     # PyTorch (Cout,Cin,K)
        b = _uniform(kb, (cout,), bound)
        # Fold eval-mode BN (gamma=1, beta=0, mean=0, var=1) into weight/bias.
        w = jnp.transpose(w_torch * bn_scale, (2, 1, 0))  # -> (K, Cin, Cout)
        if cin % 128 == 0:
            # im2col weight layout for the deep-contraction path (conv4).
            w = w.reshape(k * cin, cout)
        convs.append(dict(w=w.astype(jnp.bfloat16),
                          b=(b * bn_scale).reshape(1, cout)))
        geoms.append(dict(k=k, pad=pad, L=L, Lp=L + 2 * pad))
        L = L // 2
    L5 = L
    assert L5 >= 1, "input_shape too short for 4 pooling stages"
    c_last = conv_defs[-1][1]
    flat_features = c_last * L5

    # Constant 0/1 selection matrices: pool-gather + next-layer halo + batch
    # re-blocking, one per conv layer, built once on the host (bf16, exact).
    sels = []
    for i, g in enumerate(geoms):
        m = batch_tile * g["Lp"] - g["k"] + 1     # rows of the conv output
        l_next = g["L"] // 2
        if i + 1 < len(geoms):
            pad_n = geoms[i + 1]["pad"]
            lp_n = l_next + 2 * pad_n
            sel = np.zeros((batch_tile * lp_n, m - 1), np.float32)
            for bb in range(batch_tile):
                for l in range(l_next):
                    sel[bb * lp_n + pad_n + l, bb * g["Lp"] + 2 * l] = 1.0
        else:   # last conv: gather straight into the flatten staging layout
            sel = np.zeros((l_next * batch_tile, m - 1), np.float32)
            for bb in range(batch_tile):
                for l in range(l_next):
                    sel[l * batch_tile + bb, bb * g["Lp"] + 2 * l] = 1.0
        sels.append(jnp.asarray(sel, dtype=jnp.bfloat16))

    # FC stack.  fc1's weight is re-indexed so PyTorch's channel-major flatten
    # of the (B, C, L5) conv output is folded into the weight layout.
    key, kw, kb = jax.random.split(key, 3)
    bound = 1.0 / math.sqrt(flat_features)
    fc1_w = _uniform(kw, (512, flat_features), bound)     # PyTorch (out, in)
    fc1_b = _uniform(kb, (512,), bound)
    fw1 = jnp.transpose(fc1_w).reshape(c_last, L5, 512)
    fw1 = jnp.transpose(fw1, (1, 0, 2)).astype(jnp.bfloat16)  # (L5, C4, 512)

    key, kw, kb = jax.random.split(key, 3)
    bound = 1.0 / math.sqrt(512)
    fc2_w = _uniform(kw, (256, 512), bound)
    fc2_b = _uniform(kb, (256,), bound)
    fw2 = jnp.transpose(fc2_w).astype(jnp.bfloat16)           # (512, 256)

    key, kw, kb = jax.random.split(key, 3)
    bound = 1.0 / math.sqrt(256)
    fc3_w = _uniform(kw, (n_classes, 256), bound)
    fc3_b = _uniform(kb, (n_classes,), bound)
    n_pad = -(-n_classes // 128) * 128                        # lane-dense logits
    fw3 = jnp.zeros((256, n_pad), jnp.float32)
    fw3 = fw3.at[:, :n_classes].set(jnp.transpose(fc3_w)).astype(jnp.bfloat16)
    fb3 = jnp.zeros((1, n_pad), jnp.float32).at[0, :n_classes].set(fc3_b)

    return dict(
        convs=convs, sels=sels,
        fw1=fw1, fb1=fc1_b.reshape(1, 512),
        fw2=fw2, fb2=fc2_b.reshape(1, 256),
        fw3=fw3, fb3=fb3,
        pad1=conv_defs[0][3], input_len=input_shape,
        n_classes=n_classes, n_pad=n_pad, batch_tile=batch_tile,
    )


# ----------------------------------------------------------------------------
# Wrapper: one pallas_call for the whole forward pass.
# ----------------------------------------------------------------------------
def forward(params, x_ncl):
    # x_ncl: (B, C, L) like the PyTorch module; 2-D input gets a channel dim.
    if x_ncl.ndim == 2:
        x_ncl = x_ncl[:, None, :]
    B, C, L = x_ncl.shape
    assert L == params["input_len"], "flatten size was fixed at init time"
    bt = params["batch_tile"]
    assert B % bt == 0, "batch must be a multiple of the batch tile"
    nt = B // bt           # bt == B -> grid=(1,) on single-TC v5e/v6e;
    pad1 = params["pad1"]  # on v7x pick bt = B//2 so megacore splits the batch
    lp1 = L + 2 * pad1

    # Single tiny input prep (NCL->NLC + conv1 halo zeros + per-batch flatten),
    # fused by XLA into one op on the raw input.  All *intermediate*
    # activations stay inside the kernel, so this is the only HBM traffic
    # besides the raw input, the weights and the logits.
    x = jnp.transpose(x_ncl, (0, 2, 1))
    x = jnp.pad(x, ((0, 0), (pad1, pad1), (0, 0)))
    x = jnp.reshape(x, (B * lp1, C))

    convs, sels = params["convs"], params["sels"]
    inputs = [x]
    for cp in convs:
        inputs += [cp["w"], cp["b"]]
    inputs += list(sels)
    inputs += [params["fw1"], params["fb1"], params["fw2"], params["fb2"],
               params["fw3"], params["fb3"]]

    def _const_spec(a):
        # Whole array resident in VMEM, same block for every grid step.
        # (Scaling note: at large batch_tile / L on v7x's 64 MiB VMEM these
        #  constants should be single-buffered or DMA'd once into scratch.)
        return pl.BlockSpec(a.shape, lambda i, _n=a.ndim: (0,) * _n)

    in_specs = [pl.BlockSpec((bt * lp1, C), lambda i: (i, 0))]
    in_specs += [_const_spec(a) for a in inputs[1:]]

    n_pad = params["n_pad"]
    out = pl.pallas_call(
        fused_cnn_kernel,
        out_shape=jax.ShapeDtypeStruct((B, n_pad), jnp.float32),
        grid=(nt,),
        in_specs=in_specs,
        out_specs=pl.BlockSpec((bt, n_pad), lambda i: (i, 0)),
        compiler_params=pltpu.CompilerParams(
            dimension_semantics=("parallel",),        # megacore split on v7x
            vmem_limit_bytes=32 * 1024 * 1024),
    )(*inputs)
    return out[:, :params["n_classes"]]


if __name__ == "__main__":
    input_shape = 16    # sequence length (survives 4 halvings: 16->8->4->2->1)
    n_channels = 12
    n_classes = 5
    batch = 16
    batch_tile = batch  # bt = B: grid=(1,), M=16 on the FC matmuls (perf item)

    key = jax.random.PRNGKey(0)
    kp, kx = jax.random.split(key)
    params = init_params(kp, input_shape, n_channels, n_classes, batch_tile)
    x = jax.random.normal(kx, (batch, n_channels, input_shape), jnp.float32)

    out = forward(params, x)
    jax.block_until_ready(out)
    assert out.shape == (batch, n_classes), out.shape
    assert bool(jnp.all(jnp.isfinite(out)))
    print("KERNEL_OK")
</pallas_src>

<mosaic_0001>
module attributes {stable_mosaic.version = 11 : i64} {
  func.func @fused_cnn_kernel(%arg0: i32, %arg1: memref<320x12xf32, #tpu.memory_space<vmem>>, %arg2: memref<5x12x32xbf16, #tpu.memory_space<vmem>>, %arg3: memref<1x32xf32, #tpu.memory_space<vmem>>, %arg4: memref<3x32x64xbf16, #tpu.memory_space<vmem>>, %arg5: memref<1x64xf32, #tpu.memory_space<vmem>>, %arg6: memref<3x64x128xbf16, #tpu.memory_space<vmem>>, %arg7: memref<1x128xf32, #tpu.memory_space<vmem>>, %arg8: memref<384x256xbf16, #tpu.memory_space<vmem>>, %arg9: memref<1x256xf32, #tpu.memory_space<vmem>>, %arg10: memref<160x315xbf16, #tpu.memory_space<vmem>>, %arg11: memref<96x157xbf16, #tpu.memory_space<vmem>>, %arg12: memref<64x93xbf16, #tpu.memory_space<vmem>>, %arg13: memref<16x61xbf16, #tpu.memory_space<vmem>>, %arg14: memref<1x256x512xbf16, #tpu.memory_space<vmem>>, %arg15: memref<1x512xf32, #tpu.memory_space<vmem>>, %arg16: memref<512x256xbf16, #tpu.memory_space<vmem>>, %arg17: memref<1x256xf32, #tpu.memory_space<vmem>>, %arg18: memref<256x128xbf16, #tpu.memory_space<vmem>>, %arg19: memref<1x128xf32, #tpu.memory_space<vmem>>, %arg20: memref<16x128xf32, #tpu.memory_space<vmem>>) attributes {dimension_semantics = [#tpu.dimension_semantics<parallel>], iteration_bounds = array<i64: 1>, scalar_prefetch = 0 : i64, scratch_operands = 0 : i64, tpu.core_type = #tpu.core_type<tc>, window_params = [{transform_indices = @transform_0, window_bounds = array<i64: 320, 12>}, {pipeline_mode = #tpu.pipeline_mode<synchronous>, transform_indices = @transform_1, window_bounds = array<i64: 5, 12, 32>}, {pipeline_mode = #tpu.pipeline_mode<synchronous>, transform_indices = @transform_2, window_bounds = array<i64: 1, 32>}, {pipeline_mode = #tpu.pipeline_mode<synchronous>, transform_indices = @transform_3, window_bounds = array<i64: 3, 32, 64>}, {pipeline_mode = #tpu.pipeline_mode<synchronous>, transform_indices = @transform_4, window_bounds = array<i64: 1, 64>}, {pipeline_mode = #tpu.pipeline_mode<synchronous>, transform_indices = @transform_5, window_bounds = array<i64: 3, 64, 128>}, {pipeline_mode = #tpu.pipeline_mode<synchronous>, transform_indices = @transform_6, window_bounds = array<i64: 1, 128>}, {pipeline_mode = #tpu.pipeline_mode<synchronous>, transform_indices = @transform_7, window_bounds = array<i64: 384, 256>}, {pipeline_mode = #tpu.pipeline_mode<synchronous>, transform_indices = @transform_8, window_bounds = array<i64: 1, 256>}, {pipeline_mode = #tpu.pipeline_mode<synchronous>, transform_indices = @transform_9, window_bounds = array<i64: 160, 315>}, {pipeline_mode = #tpu.pipeline_mode<synchronous>, transform_indices = @transform_10, window_bounds = array<i64: 96, 157>}, {pipeline_mode = #tpu.pipeline_mode<synchronous>, transform_indices = @transform_11, window_bounds = array<i64: 64, 93>}, {pipeline_mode = #tpu.pipeline_mode<synchronous>, transform_indices = @transform_12, window_bounds = array<i64: 16, 61>}, {pipeline_mode = #tpu.pipeline_mode<synchronous>, transform_indices = @transform_13, window_bounds = array<i64: 1, 256, 512>}, {pipeline_mode = #tpu.pipeline_mode<synchronous>, transform_indices = @transform_14, window_bounds = array<i64: 1, 512>}, {pipeline_mode = #tpu.pipeline_mode<synchronous>, transform_indices = @transform_15, window_bounds = array<i64: 512, 256>}, {pipeline_mode = #tpu.pipeline_mode<synchronous>, transform_indices = @transform_16, window_bounds = array<i64: 1, 256>}, {pipeline_mode = #tpu.pipeline_mode<synchronous>, transform_indices = @transform_17, window_bounds = array<i64: 256, 128>}, {pipeline_mode = #tpu.pipeline_mode<synchronous>, transform_indices = @transform_18, window_bounds = array<i64: 1, 128>}, {transform_indices = @transform_19, window_bounds = array<i64: 16, 128>}]} {
    %c0 = arith.constant 0 : index
    %c0_0 = arith.constant 0 : index
    %0 = vector.load %arg1[%c0, %c0_0] : memref<320x12xf32, #tpu.memory_space<vmem>>, vector<320x12xf32>
    %1 = arith.truncf %0 : vector<320x12xf32> to vector<320x12xbf16>
    %2 = vector.extract_strided_slice %1 {offsets = [0, 0], sizes = [316, 12], strides = [1, 1]} : vector<320x12xbf16> to vector<316x12xbf16>
    %c0_1 = arith.constant 0 : index
    %c0_2 = arith.constant 0 : index
    %c0_3 = arith.constant 0 : index
    %3 = vector.load %arg2[%c0_1, %c0_2, %c0_3] : memref<5x12x32xbf16, #tpu.memory_space<vmem>>, vector<1x12x32xbf16>
    %4 = vector.shape_cast %3 : vector<1x12x32xbf16> to vector<12x32xbf16>
    %cst = arith.constant dense<0.000000e+00> : vector<316x32xf32>
    %5 = tpu.matmul %2, %4, %cst {dimension_numbers = #tpu.dot_dimension_numbers<[1], [0], [0], [1], [0, 0, 1, 1], [], []>} : vector<316x12xbf16>, vector<12x32xbf16>, vector<316x32xf32> -> vector<316x32xf32>
    %6 = vector.extract_strided_slice %1 {offsets = [1, 0], sizes = [316, 12], strides = [1, 1]} : vector<320x12xbf16> to vector<316x12xbf16>
    %c1 = arith.constant 1 : index
    %c0_4 = arith.constant 0 : index
    %c0_5 = arith.constant 0 : index
    %7 = vector.load %arg2[%c1, %c0_4, %c0_5] : memref<5x12x32xbf16, #tpu.memory_space<vmem>>, vector<1x12x32xbf16>
    %8 = vector.shape_cast %7 : vector<1x12x32xbf16> to vector<12x32xbf16>
    %cst_6 = arith.constant dense<0.000000e+00> : vector<316x32xf32>
    %9 = tpu.matmul %6, %8, %cst_6 {dimension_numbers = #tpu.dot_dimension_numbers<[1], [0], [0], [1], [0, 0, 1, 1], [], []>} : vector<316x12xbf16>, vector<12x32xbf16>, vector<316x32xf32> -> vector<316x32xf32>
    %10 = arith.addf %5, %9 : vector<316x32xf32>
    %11 = vector.extract_strided_slice %1 {offsets = [2, 0], sizes = [316, 12], strides = [1, 1]} : vector<320x12xbf16> to vector<316x12xbf16>
    %c2 = arith.constant 2 : index
    %c0_7 = arith.constant 0 : index
    %c0_8 = arith.constant 0 : index
    %12 = vector.load %arg2[%c2, %c0_7, %c0_8] : memref<5x12x32xbf16, #tpu.memory_space<vmem>>, vector<1x12x32xbf16>
    %13 = vector.shape_cast %12 : vector<1x12x32xbf16> to vector<12x32xbf16>
    %cst_9 = arith.constant dense<0.000000e+00> : vector<316x32xf32>
    %14 = tpu.matmul %11, %13, %cst_9 {dimension_numbers = #tpu.dot_dimension_numbers<[1], [0], [0], [1], [0, 0, 1, 1], [], []>} : vector<316x12xbf16>, vector<12x32xbf16>, vector<316x32xf32> -> vector<316x32xf32>
    %15 = arith.addf %10, %14 : vector<316x32xf32>
    %16 = vector.extract_strided_slice %1 {offsets = [3, 0], sizes = [316, 12], strides = [1, 1]} : vector<320x12xbf16> to vector<316x12xbf16>
    %c3 = arith.constant 3 : index
    %c0_10 = arith.constant 0 : index
    %c0_11 = arith.constant 0 : index
    %17 = vector.load %arg2[%c3, %c0_10, %c0_11] : memref<5x12x32xbf16, #tpu.memory_space<vmem>>, vector<1x12x32xbf16>
    %18 = vector.shape_cast %17 : vector<1x12x32xbf16> to vector<12x32xbf16>
    %cst_12 = arith.constant dense<0.000000e+00> : vector<316x32xf32>
    %19 = tpu.matmul %16, %18, %cst_12 {dimension_numbers = #tpu.dot_dimension_numbers<[1], [0], [0], [1], [0, 0, 1, 1], [], []>} : vector<316x12xbf16>, vector<12x32xbf16>, vector<316x32xf32> -> vector<316x32xf32>
    %20 = arith.addf %15, %19 : vector<316x32xf32>
    %21 = vector.extract_strided_slice %1 {offsets = [4, 0], sizes = [316, 12], strides = [1, 1]} : vector<320x12xbf16> to vector<316x12xbf16>
    %c4 = arith.constant 4 : index
    %c0_13 = arith.constant 0 : index
    %c0_14 = arith.constant 0 : index
    %22 = vector.load %arg2[%c4, %c0_13, %c0_14] : memref<5x12x32xbf16, #tpu.memory_space<vmem>>, vector<1x12x32xbf16>
    %23 = vector.shape_cast %22 : vector<1x12x32xbf16> to vector<12x32xbf16>
    %cst_15 = arith.constant dense<0.000000e+00> : vector<316x32xf32>
    %24 = tpu.matmul %21, %23, %cst_15 {dimension_numbers = #tpu.dot_dimension_numbers<[1], [0], [0], [1], [0, 0, 1, 1], [], []>} : vector<316x12xbf16>, vector<12x32xbf16>, vector<316x32xf32> -> vector<316x32xf32>
    %25 = arith.addf %20, %24 : vector<316x32xf32>
    %c0_16 = arith.constant 0 : index
    %c0_17 = arith.constant 0 : index
    %26 = vector.load %arg3[%c0_16, %c0_17] : memref<1x32xf32, #tpu.memory_space<vmem>>, vector<1x32xf32>
    %27 = vector.broadcast %26 : vector<1x32xf32> to vector<316x32xf32>
    %28 = arith.addf %25, %27 : vector<316x32xf32>
    %cst_18 = arith.constant 0.000000e+00 : f32
    %29 = vector.broadcast %cst_18 : f32 to vector<316x32xf32>
    %30 = arith.maximumf %28, %29 : vector<316x32xf32>
    %31 = vector.extract_strided_slice %30 {offsets = [0, 0], sizes = [315, 32], strides = [1, 1]} : vector<316x32xf32> to vector<315x32xf32>
    %32 = vector.extract_strided_slice %30 {offsets = [1, 0], sizes = [315, 32], strides = [1, 1]} : vector<316x32xf32> to vector<315x32xf32>
    %33 = arith.maximumf %31, %32 : vector<315x32xf32>
    %34 = arith.truncf %33 : vector<315x32xf32> to vector<315x32xbf16>
    %c0_19 = arith.constant 0 : index
    %c0_20 = arith.constant 0 : index
    %35 = vector.load %arg10[%c0_19, %c0_20] : memref<160x315xbf16, #tpu.memory_space<vmem>>, vector<160x315xbf16>
    %cst_21 = arith.constant dense<0.000000e+00> : vector<160x32xf32>
    %36 = tpu.matmul %35, %34, %cst_21 {dimension_numbers = #tpu.dot_dimension_numbers<[1], [0], [0], [1], [0, 0, 1, 1], [], []>} : vector<160x315xbf16>, vector<315x32xbf16>, vector<160x32xf32> -> vector<160x32xf32>
    %37 = arith.truncf %36 : vector<160x32xf32> to vector<160x32xbf16>
    %38 = vector.extract_strided_slice %37 {offsets = [0, 0], sizes = [158, 32], strides = [1, 1]} : vector<160x32xbf16> to vector<158x32xbf16>
    %c0_22 = arith.constant 0 : index
    %c0_23 = arith.constant 0 : index
    %c0_24 = arith.constant 0 : index
    %39 = vector.load %arg4[%c0_22, %c0_23, %c0_24] : memref<3x32x64xbf16, #tpu.memory_space<vmem>>, vector<1x32x64xbf16>
    %40 = vector.shape_cast %39 : vector<1x32x64xbf16> to vector<32x64xbf16>
    %cst_25 = arith.constant dense<0.000000e+00> : vector<158x64xf32>
    %41 = tpu.matmul %38, %40, %cst_25 {dimension_numbers = #tpu.dot_dimension_numbers<[1], [0], [0], [1], [0, 0, 1, 1], [], []>} : vector<158x32xbf16>, vector<32x64xbf16>, vector<158x64xf32> -> vector<158x64xf32>
    %42 = vector.extract_strided_slice %37 {offsets = [1, 0], sizes = [158, 32], strides = [1, 1]} : vector<160x32xbf16> to vector<158x32xbf16>
    %c1_26 = arith.constant 1 : index
    %c0_27 = arith.constant 0 : index
    %c0_28 = arith.constant 0 : index
    %43 = vector.load %arg4[%c1_26, %c0_27, %c0_28] : memref<3x32x64xbf16, #tpu.memory_space<vmem>>, vector<1x32x64xbf16>
    %44 = vector.shape_cast %43 : vector<1x32x64xbf16> to vector<32x64xbf16>
    %cst_29 = arith.constant dense<0.000000e+00> : vector<158x64xf32>
    %45 = tpu.matmul %42, %44, %cst_29 {dimension_numbers = #tpu.dot_dimension_numbers<[1], [0], [0], [1], [0, 0, 1, 1], [], []>} : vector<158x32xbf16>, vector<32x64xbf16>, vector<158x64xf32> -> vector<158x64xf32>
    %46 = arith.addf %41, %45 : vector<158x64xf32>
    %47 = vector.extract_strided_slice %37 {offsets = [2, 0], sizes = [158, 32], strides = [1, 1]} : vector<160x32xbf16> to vector<158x32xbf16>
    %c2_30 = arith.constant 2 : index
    %c0_31 = arith.constant 0 : index
    %c0_32 = arith.constant 0 : index
    %48 = vector.load %arg4[%c2_30, %c0_31, %c0_32] : memref<3x32x64xbf16, #tpu.memory_space<vmem>>, vector<1x32x64xbf16>
    %49 = vector.shape_cast %48 : vector<1x32x64xbf16> to vector<32x64xbf16>
    %cst_33 = arith.constant dense<0.000000e+00> : vector<158x64xf32>
    %50 = tpu.matmul %47, %49, %cst_33 {dimension_numbers = #tpu.dot_dimension_numbers<[1], [0], [0], [1], [0, 0, 1, 1], [], []>} : vector<158x32xbf16>, vector<32x64xbf16>, vector<158x64xf32> -> vector<158x64xf32>
    %51 = arith.addf %46, %50 : vector<158x64xf32>
    %c0_34 = arith.constant 0 : index
    %c0_35 = arith.constant 0 : index
    %52 = vector.load %arg5[%c0_34, %c0_35] : memref<1x64xf32, #tpu.memory_space<vmem>>, vector<1x64xf32>
    %53 = vector.broadcast %52 : vector<1x64xf32> to vector<158x64xf32>
    %54 = arith.addf %51, %53 : vector<158x64xf32>
    %cst_36 = arith.constant 0.000000e+00 : f32
    %55 = vector.broadcast %cst_36 : f32 to vector<158x64xf32>
    %56 = arith.maximumf %54, %55 : vector<158x64xf32>
    %57 = vector.extract_strided_slice %56 {offsets = [0, 0], sizes = [157, 64], strides = [1, 1]} : vector<158x64xf32> to vector<157x64xf32>
    %58 = vector.extract_strided_slice %56 {offsets = [1, 0], sizes = [157, 64], strides = [1, 1]} : vector<158x64xf32> to vector<157x64xf32>
    %59 = arith.maximumf %57, %58 : vector<157x64xf32>
    %60 = arith.truncf %59 : vector<157x64xf32> to vector<157x64xbf16>
    %c0_37 = arith.constant 0 : index
    %c0_38 = arith.constant 0 : index
    %61 = vector.load %arg11[%c0_37, %c0_38] : memref<96x157xbf16, #tpu.memory_space<vmem>>, vector<96x157xbf16>
    %cst_39 = arith.constant dense<0.000000e+00> : vector<96x64xf32>
    %62 = tpu.matmul %61, %60, %cst_39 {dimension_numbers = #tpu.dot_dimension_numbers<[1], [0], [0], [1], [0, 0, 1, 1], [], []>} : vector<96x157xbf16>, vector<157x64xbf16>, vector<96x64xf32> -> vector<96x64xf32>
    %63 = arith.truncf %62 : vector<96x64xf32> to vector<96x64xbf16>
    %64 = vector.extract_strided_slice %63 {offsets = [0, 0], sizes = [94, 64], strides = [1, 1]} : vector<96x64xbf16> to vector<94x64xbf16>
    %c0_40 = arith.constant 0 : index
    %c0_41 = arith.constant 0 : index
    %c0_42 = arith.constant 0 : index
    %65 = vector.load %arg6[%c0_40, %c0_41, %c0_42] : memref<3x64x128xbf16, #tpu.memory_space<vmem>>, vector<1x64x128xbf16>
    %66 = vector.shape_cast %65 : vector<1x64x128xbf16> to vector<64x128xbf16>
    %cst_43 = arith.constant dense<0.000000e+00> : vector<94x128xf32>
    %67 = tpu.matmul %64, %66, %cst_43 {dimension_numbers = #tpu.dot_dimension_numbers<[1], [0], [0], [1], [0, 0, 1, 1], [], []>} : vector<94x64xbf16>, vector<64x128xbf16>, vector<94x128xf32> -> vector<94x128xf32>
    %68 = vector.extract_strided_slice %63 {offsets = [1, 0], sizes = [94, 64], strides = [1, 1]} : vector<96x64xbf16> to vector<94x64xbf16>
    %c1_44 = arith.constant 1 : index
    %c0_45 = arith.constant 0 : index
    %c0_46 = arith.constant 0 : index
    %69 = vector.load %arg6[%c1_44, %c0_45, %c0_46] : memref<3x64x128xbf16, #tpu.memory_space<vmem>>, vector<1x64x128xbf16>
    %70 = vector.shape_cast %69 : vector<1x64x128xbf16> to vector<64x128xbf16>
    %cst_47 = arith.constant dense<0.000000e+00> : vector<94x128xf32>
    %71 = tpu.matmul %68, %70, %cst_47 {dimension_numbers = #tpu.dot_dimension_numbers<[1], [0], [0], [1], [0, 0, 1, 1], [], []>} : vector<94x64xbf16>, vector<64x128xbf16>, vector<94x128xf32> -> vector<94x128xf32>
    %72 = arith.addf %67, %71 : vector<94x128xf32>
    %73 = vector.extract_strided_slice %63 {offsets = [2, 0], sizes = [94, 64], strides = [1, 1]} : vector<96x64xbf16> to vector<94x64xbf16>
    %c2_48 = arith.constant 2 : index
    %c0_49 = arith.constant 0 : index
    %c0_50 = arith.constant 0 : index
    %74 = vector.load %arg6[%c2_48, %c0_49, %c0_50] : memref<3x64x128xbf16, #tpu.memory_space<vmem>>, vector<1x64x128xbf16>
    %75 = vector.shape_cast %74 : vector<1x64x128xbf16> to vector<64x128xbf16>
    %cst_51 = arith.constant dense<0.000000e+00> : vector<94x128xf32>
    %76 = tpu.matmul %73, %75, %cst_51 {dimension_numbers = #tpu.dot_dimension_numbers<[1], [0], [0], [1], [0, 0, 1, 1], [], []>} : vector<94x64xbf16>, vector<64x128xbf16>, vector<94x128xf32> -> vector<94x128xf32>
    %77 = arith.addf %72, %76 : vector<94x128xf32>
    %c0_52 = arith.constant 0 : index
    %c0_53 = arith.constant 0 : index
    %78 = vector.load %arg7[%c0_52, %c0_53] : memref<1x128xf32, #tpu.memory_space<vmem>>, vector<1x128xf32>
    %79 = vector.broadcast %78 : vector<1x128xf32> to vector<94x128xf32>
    %80 = arith.addf %77, %79 : vector<94x128xf32>
    %cst_54 = arith.constant 0.000000e+00 : f32
    %81 = vector.broadcast %cst_54 : f32 to vector<94x128xf32>
    %82 = arith.maximumf %80, %81 : vector<94x128xf32>
    %83 = vector.extract_strided_slice %82 {offsets = [0, 0], sizes = [93, 128], strides = [1, 1]} : vector<94x128xf32> to vector<93x128xf32>
    %84 = vector.extract_strided_slice %82 {offsets = [1, 0], sizes = [93, 128], strides = [1, 1]} : vector<94x128xf32> to vector<93x128xf32>
    %85 = arith.maximumf %83, %84 : vector<93x128xf32>
    %86 = arith.truncf %85 : vector<93x128xf32> to vector<93x128xbf16>
    %c0_55 = arith.constant 0 : index
    %c0_56 = arith.constant 0 : index
    %87 = vector.load %arg12[%c0_55, %c0_56] : memref<64x93xbf16, #tpu.memory_space<vmem>>, vector<64x93xbf16>
    %cst_57 = arith.constant dense<0.000000e+00> : vector<64x128xf32>
    %88 = tpu.matmul %87, %86, %cst_57 {dimension_numbers = #tpu.dot_dimension_numbers<[1], [0], [0], [1], [0, 0, 1, 1], [], []>} : vector<64x93xbf16>, vector<93x128xbf16>, vector<64x128xf32> -> vector<64x128xf32>
    %89 = arith.truncf %88 : vector<64x128xf32> to vector<64x128xbf16>
    %90 = vector.extract_strided_slice %89 {offsets = [0, 0], sizes = [62, 128], strides = [1, 1]} : vector<64x128xbf16> to vector<62x128xbf16>
    %91 = vector.extract_strided_slice %89 {offsets = [1, 0], sizes = [62, 128], strides = [1, 1]} : vector<64x128xbf16> to vector<62x128xbf16>
    %92 = vector.extract_strided_slice %89 {offsets = [2, 0], sizes = [62, 128], strides = [1, 1]} : vector<64x128xbf16> to vector<62x128xbf16>
    %93 = tpu.concatenate %90, %91, %92 in 1 : vector<62x128xbf16>, vector<62x128xbf16>, vector<62x128xbf16> -> vector<62x384xbf16>
    %c0_58 = arith.constant 0 : index
    %c0_59 = arith.constant 0 : index
    %94 = vector.load %arg8[%c0_58, %c0_59] : memref<384x256xbf16, #tpu.memory_space<vmem>>, vector<384x256xbf16>
    %cst_60 = arith.constant dense<0.000000e+00> : vector<62x256xf32>
    %95 = tpu.matmul %93, %94, %cst_60 {dimension_numbers = #tpu.dot_dimension_numbers<[1], [0], [0], [1], [0, 0, 1, 1], [], []>} : vector<62x384xbf16>, vector<384x256xbf16>, vector<62x256xf32> -> vector<62x256xf32>
    %c0_61 = arith.constant 0 : index
    %c0_62 = arith.constant 0 : index
    %96 = vector.load %arg9[%c0_61, %c0_62] : memref<1x256xf32, #tpu.memory_space<vmem>>, vector<1x256xf32>
    %97 = vector.broadcast %96 : vector<1x256xf32> to vector<62x256xf32>
    %98 = arith.addf %95, %97 : vector<62x256xf32>
    %cst_63 = arith.constant 0.000000e+00 : f32
    %99 = vector.broadcast %cst_63 : f32 to vector<62x256xf32>
    %100 = arith.maximumf %98, %99 : vector<62x256xf32>
    %101 = vector.extract_strided_slice %100 {offsets = [0, 0], sizes = [61, 256], strides = [1, 1]} : vector<62x256xf32> to vector<61x256xf32>
    %102 = vector.extract_strided_slice %100 {offsets = [1, 0], sizes = [61, 256], strides = [1, 1]} : vector<62x256xf32> to vector<61x256xf32>
    %103 = arith.maximumf %101, %102 : vector<61x256xf32>
    %104 = arith.truncf %103 : vector<61x256xf32> to vector<61x256xbf16>
    %c0_64 = arith.constant 0 : index
    %c0_65 = arith.constant 0 : index
    %105 = vector.load %arg13[%c0_64, %c0_65] : memref<16x61xbf16, #tpu.memory_space<vmem>>, vector<16x61xbf16>
    %cst_66 = arith.constant dense<0.000000e+00> : vector<16x256xf32>
    %106 = tpu.matmul %105, %104, %cst_66 {dimension_numbers = #tpu.dot_dimension_numbers<[1], [0], [0], [1], [0, 0, 1, 1], [], []>} : vector<16x61xbf16>, vector<61x256xbf16>, vector<16x256xf32> -> vector<16x256xf32>
    %107 = arith.truncf %106 : vector<16x256xf32> to vector<16x256xbf16>
    %c0_67 = arith.constant 0 : index
    %c0_68 = arith.constant 0 : index
    %c0_69 = arith.constant 0 : index
    %108 = vector.load %arg14[%c0_67, %c0_68, %c0_69] : memref<1x256x512xbf16, #tpu.memory_space<vmem>>, vector<1x256x512xbf16>
    %109 = vector.shape_cast %108 : vector<1x256x512xbf16> to vector<256x512xbf16>
    %cst_70 = arith.constant dense<0.000000e+00> : vector<16x512xf32>
    %110 = tpu.matmul %107, %109, %cst_70 {dimension_numbers = #tpu.dot_dimension_numbers<[1], [0], [0], [1], [0, 0, 1, 1], [], []>} : vector<16x256xbf16>, vector<256x512xbf16>, vector<16x512xf32> -> vector<16x512xf32>
    %c0_71 = arith.constant 0 : index
    %c0_72 = arith.constant 0 : index
    %111 = vector.load %arg15[%c0_71, %c0_72] : memref<1x512xf32, #tpu.memory_space<vmem>>, vector<1x512xf32>
    %112 = vector.broadcast %111 : vector<1x512xf32> to vector<16x512xf32>
    %113 = arith.addf %110, %112 : vector<16x512xf32>
    %cst_73 = arith.constant 0.000000e+00 : f32
    %114 = vector.broadcast %cst_73 : f32 to vector<16x512xf32>
    %115 = arith.maximumf %113, %114 : vector<16x512xf32>
    %116 = arith.truncf %115 : vector<16x512xf32> to vector<16x512xbf16>
    %c0_74 = arith.constant 0 : index
    %c0_75 = arith.constant 0 : index
    %117 = vector.load %arg16[%c0_74, %c0_75] : memref<512x256xbf16, #tpu.memory_space<vmem>>, vector<512x256xbf16>
    %cst_76 = arith.constant dense<0.000000e+00> : vector<16x256xf32>
    %118 = tpu.matmul %116, %117, %cst_76 {dimension_numbers = #tpu.dot_dimension_numbers<[1], [0], [0], [1], [0, 0, 1, 1], [], []>} : vector<16x512xbf16>, vector<512x256xbf16>, vector<16x256xf32> -> vector<16x256xf32>
    %c0_77 = arith.constant 0 : index
    %c0_78 = arith.constant 0 : index
    %119 = vector.load %arg17[%c0_77, %c0_78] : memref<1x256xf32, #tpu.memory_space<vmem>>, vector<1x256xf32>
    %120 = vector.broadcast %119 : vector<1x256xf32> to vector<16x256xf32>
    %121 = arith.addf %118, %120 : vector<16x256xf32>
    %cst_79 = arith.constant 0.000000e+00 : f32
    %122 = vector.broadcast %cst_79 : f32 to vector<16x256xf32>
    %123 = arith.maximumf %121, %122 : vector<16x256xf32>
    %124 = arith.truncf %123 : vector<16x256xf32> to vector<16x256xbf16>
    %c0_80 = arith.constant 0 : index
    %c0_81 = arith.constant 0 : index
    %125 = vector.load %arg18[%c0_80, %c0_81] : memref<256x128xbf16, #tpu.memory_space<vmem>>, vector<256x128xbf16>
    %cst_82 = arith.constant dense<0.000000e+00> : vector<16x128xf32>
    %126 = tpu.matmul %124, %125, %cst_82 {dimension_numbers = #tpu.dot_dimension_numbers<[1], [0], [0], [1], [0, 0, 1, 1], [], []>} : vector<16x256xbf16>, vector<256x128xbf16>, vector<16x128xf32> -> vector<16x128xf32>
    %c0_83 = arith.constant 0 : index
    %c0_84 = arith.constant 0 : index
    %127 = vector.load %arg19[%c0_83, %c0_84] : memref<1x128xf32, #tpu.memory_space<vmem>>, vector<1x128xf32>
    %128 = vector.broadcast %127 : vector<1x128xf32> to vector<16x128xf32>
    %129 = arith.addf %126, %128 : vector<16x128xf32>
    %c0_85 = arith.constant 0 : index
    %c0_86 = arith.constant 0 : index
    %130 = vector.load %arg20[%c0_85, %c0_86] : memref<16x128xf32, #tpu.memory_space<vmem>>, vector<16x128xf32>
    tpu.vector_store %arg20[%c0_85, %c0_86], %129 {strides = array<i32>} : memref<16x128xf32, #tpu.memory_space<vmem>>, vector<16x128xf32>,
    return
  }
  func.func @transform_0(%arg0: i32) -> (i32, i32) {
    %c0_i32 = arith.constant 0 : i32
    %c0_i32_0 = arith.constant 0 : i32
    return %arg0, %c0_i32 : i32, i32
  }
  func.func @transform_1(%arg0: i32) -> (i32, i32, i32) {
    %c0_i32 = arith.constant 0 : i32
    %c0_i32_0 = arith.constant 0 : i32
    %c0_i32_1 = arith.constant 0 : i32
    %c0_i32_2 = arith.constant 0 : i32
    return %c0_i32, %c0_i32_0, %c0_i32_1 : i32, i32, i32
  }
  func.func @transform_2(%arg0: i32) -> (i32, i32) {
    %c0_i32 = arith.constant 0 : i32
    %c0_i32_0 = arith.constant 0 : i32
    %c0_i32_1 = arith.constant 0 : i32
    return %c0_i32, %c0_i32_0 : i32, i32
  }
  func.func @transform_3(%arg0: i32) -> (i32, i32, i32) {
    %c0_i32 = arith.constant 0 : i32
    %c0_i32_0 = arith.constant 0 : i32
    %c0_i32_1 = arith.constant 0 : i32
    %c0_i32_2 = arith.constant 0 : i32
    return %c0_i32, %c0_i32_0, %c0_i32_1 : i32, i32, i32
  }
  func.func @transform_4(%arg0: i32) -> (i32, i32) {
    %c0_i32 = arith.constant 0 : i32
    %c0_i32_0 = arith.constant 0 : i32
    %c0_i32_1 = arith.constant 0 : i32
    return %c0_i32, %c0_i32_0 : i32, i32
  }
  func.func @transform_5(%arg0: i32) -> (i32, i32, i32) {
    %c0_i32 = arith.constant 0 : i32
    %c0_i32_0 = arith.constant 0 : i32
    %c0_i32_1 = arith.constant 0 : i32
    %c0_i32_2 = arith.constant 0 : i32
    return %c0_i32, %c0_i32_0, %c0_i32_1 : i32, i32, i32
  }
  func.func @transform_6(%arg0: i32) -> (i32, i32) {
    %c0_i32 = arith.constant 0 : i32
    %c0_i32_0 = arith.constant 0 : i32
    %c0_i32_1 = arith.constant 0 : i32
    return %c0_i32, %c0_i32_0 : i32, i32
  }
  func.func @transform_7(%arg0: i32) -> (i32, i32) {
    %c0_i32 = arith.constant 0 : i32
    %c0_i32_0 = arith.constant 0 : i32
    %c0_i32_1 = arith.constant 0 : i32
    return %c0_i32, %c0_i32_0 : i32, i32
  }
  func.func @transform_8(%arg0: i32) -> (i32, i32) {
    %c0_i32 = arith.constant 0 : i32
    %c0_i32_0 = arith.constant 0 : i32
    %c0_i32_1 = arith.constant 0 : i32
    return %c0_i32, %c0_i32_0 : i32, i32
  }
  func.func @transform_9(%arg0: i32) -> (i32, i32) {
    %c0_i32 = arith.constant 0 : i32
    %c0_i32_0 = arith.constant 0 : i32
    %c0_i32_1 = arith.constant 0 : i32
    return %c0_i32, %c0_i32_0 : i32, i32
  }
  func.func @transform_10(%arg0: i32) -> (i32, i32) {
    %c0_i32 = arith.constant 0 : i32
    %c0_i32_0 = arith.constant 0 : i32
    %c0_i32_1 = arith.constant 0 : i32
    return %c0_i32, %c0_i32_0 : i32, i32
  }
  func.func @transform_11(%arg0: i32) -> (i32, i32) {
    %c0_i32 = arith.constant 0 : i32
    %c0_i32_0 = arith.constant 0 : i32
    %c0_i32_1 = arith.constant 0 : i32
    return %c0_i32, %c0_i32_0 : i32, i32
  }
  func.func @transform_12(%arg0: i32) -> (i32, i32) {
    %c0_i32 = arith.constant 0 : i32
    %c0_i32_0 = arith.constant 0 : i32
    %c0_i32_1 = arith.constant 0 : i32
    return %c0_i32, %c0_i32_0 : i32, i32
  }
  func.func @transform_13(%arg0: i32) -> (i32, i32, i32) {
    %c0_i32 = arith.constant 0 : i32
    %c0_i32_0 = arith.constant 0 : i32
    %c0_i32_1 = arith.constant 0 : i32
    %c0_i32_2 = arith.constant 0 : i32
    return %c0_i32, %c0_i32_0, %c0_i32_1 : i32, i32, i32
  }
  func.func @transform_14(%arg0: i32) -> (i32, i32) {
    %c0_i32 = arith.constant 0 : i32
    %c0_i32_0 = arith.constant 0 : i32
    %c0_i32_1 = arith.constant 0 : i32
    return %c0_i32, %c0_i32_0 : i32, i32
  }
  func.func @transform_15(%arg0: i32) -> (i32, i32) {
    %c0_i32 = arith.constant 0 : i32
    %c0_i32_0 = arith.constant 0 : i32
    %c0_i32_1 = arith.constant 0 : i32
    return %c0_i32, %c0_i32_0 : i32, i32
  }
  func.func @transform_16(%arg0: i32) -> (i32, i32) {
    %c0_i32 = arith.constant 0 : i32
    %c0_i32_0 = arith.constant 0 : i32
    %c0_i32_1 = arith.constant 0 : i32
    return %c0_i32, %c0_i32_0 : i32, i32
  }
  func.func @transform_17(%arg0: i32) -> (i32, i32) {
    %c0_i32 = arith.constant 0 : i32
    %c0_i32_0 = arith.constant 0 : i32
    %c0_i32_1 = arith.constant 0 : i32
    return %c0_i32, %c0_i32_0 : i32, i32
  }
  func.func @transform_18(%arg0: i32) -> (i32, i32) {
    %c0_i32 = arith.constant 0 : i32
    %c0_i32_0 = arith.constant 0 : i32
    %c0_i32_1 = arith.constant 0 : i32
    return %c0_i32, %c0_i32_0 : i32, i32
  }
  func.func @transform_19(%arg0: i32) -> (i32, i32) {
    %c0_i32 = arith.constant 0 : i32
    %c0_i32_0 = arith.constant 0 : i32
    return %arg0, %c0_i32 : i32, i32
  }
}

</mosaic_0001>

<bundles_post_ra>
// kernel: tpu_custom_call.1
= control target key start
LH: loop header
LB: loop body
LE: loop exit
PB: predicated region body
PF: predicated region fallthrough
CT: control target
= control target key end

     0   :  { %s9968_s0 = inlined_call_operand.vmem [shape: f32[320,12], index: 0, kind: input, shape index: {}]   ;;  %s9969_s1 = inlined_call_operand.hbm [shape: bf16[5,12,32], index: 1, kind: input, shape index: {}]   ;;  %s9970_s2 = inlined_call_operand.vmem [shape: f32[1,32], index: 2, kind: input, shape index: {}]   ;;  %s9971_s3 = inlined_call_operand.vmem [shape: bf16[3,32,64], index: 3, kind: input, shape index: {}]   ;;  %s9972_s4 = inlined_call_operand.hbm [shape: f32[1,64], index: 4, kind: input, shape index: {}]   ;;  %s9973_s5 = inlined_call_operand.hbm [shape: bf16[3,64,128], index: 5, kind: input, shape index: {}]   ;;  %s9974_s6 = inlined_call_operand.hbm [shape: f32[1,128], index: 6, kind: input, shape index: {}]   ;;  %s9975_s7 = inlined_call_operand.hbm [shape: bf16[384,256], index: 7, kind: input, shape index: {}]   ;;  %s9976_s8 = inlined_call_operand.hbm [shape: f32[1,256], index: 8, kind: input, shape index: {}]   ;;  %s9977_s9 = inlined_call_operand.hbm [shape: bf16[160,315], index: 9, kind: input, shape index: {}]   ;;  %s9978_s10 = inlined_call_operand.vmem [shape: bf16[96,157], index: 10, kind: input, shape index: {}]   ;;  %s9979_s11 = inlined_call_operand.vmem [shape: bf16[64,93], index: 11, kind: input, shape index: {}]   ;;  %s9980_s12 = inlined_call_operand.hbm [shape: bf16[16,61], index: 12, kind: input, shape index: {}]   ;;  %s9981_s13 = inlined_call_operand.vmem [shape: bf16[1,256,512], index: 13, kind: input, shape index: {}]   ;;  %s9982_s14 = inlined_call_operand.vmem [shape: f32[1,512], index: 14, kind: input, shape index: {}]   ;;  %s9983_s15 = inlined_call_operand.hbm [shape: bf16[512,256], index: 15, kind: input, shape index: {}]   ;;  %s9984_s16 = inlined_call_operand.vmem [shape: f32[1,256], index: 16, kind: input, shape index: {}]   ;;  %s9985_s17 = inlined_call_operand.hbm [shape: bf16[256,128], index: 17, kind: input, shape index: {}]   ;;  %s9986_s18 = inlined_call_operand.vmem [shape: f32[1,128], index: 18, kind: input, shape index: {}]   ;;  %s9987_s19 = inlined_call_operand.hbm [shape: f32[16,128], index: 19, kind: output, shape index: {}]  }
   0x1   :  { %9996 = sst [smem:[#allocation27_spill]] %s9968_s0 }
   0x2   :  { %9997 = sst [smem:[#allocation28_spill]] %s9969_s1 }
   0x3   :  { %9998 = sst [smem:[#allocation29_spill]] %s9970_s2 }
   0x4   :  { %9999 = sst [smem:[#allocation30_spill]] %s9971_s3 }
   0x5   :  { %24 = vsyncpa [#allocation3], 0 }
   0x6   :  { %25 = vsyncpa [#allocation6], 0 }
   0x7   :  { %26 = vsyncpa [#allocation9], 0 }
   0x8   :  { %27 = vsyncpa [#allocation12], 0 }
   0x9   :  { %28 = vsyncpa [#allocation15], 0 }
   0xa   :  { %29 = vsyncpa [#allocation18], 0 }
   0xb   :  { %30 = vsyncpa [#allocation4], 0  ;;  %s8279_s0 = smov [#allocation5]   ;;  %s8280_s20 = smov [#allocation8]  }
   0xc   :  { %s55_s30 = sshll.u32 %s8279_s0, 4  ;;  %s77_s21 = sshll.u32 %s8280_s20, 4  ;;  %s56_s30 = int_to_ptr.vmem [resolvable:$true] %s55_s30  ;;  %s78_s21 = int_to_ptr.vmem [resolvable:$true] %s77_s21 }
   0xd   :  { %s8023_s2 = scalar_lea.hbm %s9972_s4, 16 }
   0xe   :  { %p8024_p0 = scmp.ne.s32.totalorder %s9972_s4, %s8023_s2  ;;  %p8027_p1 = scmp.lt.u32.totalorder %s8023_s2, %s9972_s4 }
  0x10   :  { %p8029_p2 = pnand %p8027_p1, %p8024_p0 }
  0x12   :  { %8032 = shalt.err (!%p8029_p2)
}
  0x13   :  { %s8033_s26 = scalar_lea.vmem %s56_s30, 16  ;;  %s8037_s27 = scalar_lea.vmem %s56_s30, 32 }
  0x14   :  { %p8034_p3 = scmp.ne.s32.totalorder %s56_s30, %s8033_s26  ;;  %p8038_p4 = scmp.lt.s32.totalorder %s56_s30, %s56_s30 }
  0x15   :  { %p8039_p5 = scmp.lt.s32.totalorder %s8037_s27, %s8033_s26 }
  0x17   :  { %p8040_p6 = por %p8039_p5, %p8038_p4 }
  0x19   :  { %p8041_p7 = pnand %p8040_p6, %p8034_p3 }
  0x1b   :  { %8044 = shalt.err (!%p8041_p7)
}
  0x1c   :  { %58 = dma.hbm_to_vmem [thread:$0]  %s9972_s4, 16, %s56_s30, [#allocation6]  }
  0x1d   :  { %s8045_s1 = scalar_lea.hbm %s9974_s6, 16 }
  0x1e   :  { %p8046_p8 = scmp.ne.s32.totalorder %s9974_s6, %s8045_s1  ;;  %p8049_p9 = scmp.lt.u32.totalorder %s8045_s1, %s9974_s6 }
  0x20   :  { %p8051_p10 = pnand %p8049_p9, %p8046_p8 }
  0x22   :  { %8054 = shalt.err (!%p8051_p10)
}
  0x23   :  { %s8055_s25 = scalar_lea.vmem %s78_s21, 16  ;;  %s8059_s3 = scalar_lea.vmem %s78_s21, 32 }
  0x24   :  { %p8056_p11 = scmp.ne.s32.totalorder %s78_s21, %s8055_s25  ;;  %p8060_p12 = scmp.lt.s32.totalorder %s78_s21, %s78_s21 }
  0x25   :  { %p8061_p13 = scmp.lt.s32.totalorder %s8059_s3, %s8055_s25 }
  0x27   :  { %p8062_p0 = por %p8061_p13, %p8060_p12 }
  0x29   :  { %p8063_p1 = pnand %p8062_p0, %p8056_p11 }
  0x2b   :  { %8066 = shalt.err (!%p8063_p1)
}
  0x2c   :  { %80 = dma.hbm_to_vmem [thread:$0]  %s9974_s6, 16, %s78_s21, [#allocation9]  }
  0x2d   :  { %s8281_s26 = smov [#allocation11]   ;;  %s8067_s0 = scalar_lea.hbm %s9976_s8, 32 }
  0x2e   :  { %s99_s27 = sshll.u32 %s8281_s26, 4  ;;  %p8068_p2 = scmp.ne.s32.totalorder %s9976_s8, %s8067_s0  ;;  %s100_s27 = int_to_ptr.vmem [resolvable:$true] %s99_s27 }
  0x2f   :  { %p8071_p3 = scmp.lt.u32.totalorder %s8067_s0, %s9976_s8 }
  0x31   :  { %p8073_p4 = pnand %p8071_p3, %p8068_p2 }
  0x33   :  { %8076 = shalt.err (!%p8073_p4)
}
  0x34   :  { %s8077_s23 = scalar_lea.vmem %s100_s27, 32  ;;  %p8082_p6 = scmp.lt.s32.totalorder %s100_s27, %s100_s27 }
  0x35   :  { %p8078_p5 = scmp.ne.s32.totalorder %s100_s27, %s8077_s23  ;;  %p8083_p7 = scmp.lt.s32.totalorder %s8077_s23, %s8077_s23 }
  0x37   :  { %p8084_p8 = por %p8083_p7, %p8082_p6 }
  0x39   :  { %p8085_p9 = pnand %p8084_p8, %p8078_p5 }
  0x3b   :  { %8088 = shalt.err (!%p8085_p9)
}
  0x3c   :  { %102 = dma.hbm_to_vmem [thread:$0]  %s9976_s8, 32, %s100_s27, [#allocation12]  }
  0x3d   :  { %s8282_s24 = smov [#allocation14]   ;;  %s8283_s3 = smov [#allocation2]  }
  0x3e   :  { %s124_s25 = sshll.u32 %s8282_s24, 4  ;;  %s38_s4 = sshll.u32 %s8283_s3, 4  ;;  %s125_s25 = int_to_ptr.vmem [resolvable:$true] %s124_s25  ;;  %s39_s4 = int_to_ptr.vmem [resolvable:$true] %s38_s4 }
  0x3f   :  { %s8089_s28 = scalar_lea.hbm %s9980_s12, 128 }
  0x40   :  { %p8090_p10 = scmp.ne.s32.totalorder %s9980_s12, %s8089_s28  ;;  %p8093_p11 = scmp.lt.u32.totalorder %s8089_s28, %s9980_s12 }
  0x42   :  { %p8095_p12 = pnand %p8093_p11, %p8090_p10 }
  0x44   :  { %8098 = shalt.err (!%p8095_p12)
}
  0x45   :  { %s8099_s8 = scalar_lea.vmem %s125_s25, 128  ;;  %p8104_p0 = scmp.lt.s32.totalorder %s125_s25, %s125_s25 }
  0x46   :  { %p8100_p13 = scmp.ne.s32.totalorder %s125_s25, %s8099_s8  ;;  %p8105_p1 = scmp.lt.s32.totalorder %s8099_s8, %s8099_s8 }
  0x48   :  { %p8106_p2 = por %p8105_p1, %p8104_p0 }
  0x4a   :  { %p8107_p3 = pnand %p8106_p2, %p8100_p13 }
  0x4c   :  { %8110 = shalt.err (!%p8107_p3)
}
  0x4d   :  { %s8284_s27 = smov 64   ;;  %s8285_s22 = smov 4  }
  0x4e   :  { %130 = dma.hbm_to_vmem [thread:$0]  %s9980_s12, 128, %s125_s25, [#allocation15], %s8284_s27, %s8284_s27, %s8285_s22  }
  0x4f   :  { %s10000_s24 = sld [smem:[#allocation28_spill]] }
  0x55   :  { %s8111_s3 = scalar_lea.hbm %s10000_s24, 640 }
  0x56   :  { %p8112_p4 = scmp.ne.s32.totalorder %s10000_s24, %s8111_s3  ;;  %p8115_p5 = scmp.lt.u32.totalorder %s8111_s3, %s10000_s24 }
  0x58   :  { %p8117_p6 = pnand %p8115_p5, %p8112_p4 }
  0x5a   :  { %8120 = shalt.err (!%p8117_p6)
}
  0x5b   :  { %s8121_s0 = scalar_lea.vmem %s39_s4, 640  ;;  %p8126_p8 = scmp.lt.s32.totalorder %s39_s4, %s39_s4 }
  0x5c   :  { %p8122_p7 = scmp.ne.s32.totalorder %s39_s4, %s8121_s0  ;;  %p8127_p9 = scmp.lt.s32.totalorder %s8121_s0, %s8121_s0 }
  0x5e   :  { %p8128_p10 = por %p8127_p9, %p8126_p8 }
  0x60   :  { %p8129_p11 = pnand %p8128_p10, %p8122_p7 }
  0x62   :  { %8132 = shalt.err (!%p8129_p11)
}
  0x63   :  { %44 = dma.hbm_to_vmem [thread:$0]  %s10000_s24, 640, %s39_s4, [#allocation3], %s8284_s27, %s8284_s27, %s8285_s22  }
  0x64   :  { %s8286_s20 = smov [#allocation7]   ;;  %s8287_s8 = smov [#allocation10]  }
  0x65   :  { %s64_s1 = sshll.u32 %s8286_s20, 4  ;;  %s86_s2 = sshll.u32 %s8287_s8, 4  ;;  %s65_s1 = int_to_ptr.vmem [resolvable:$true] %s64_s1  ;;  %s87_s2 = int_to_ptr.vmem [resolvable:$true] %s86_s2 }
  0x66   :  { %s8133_s21 = scalar_lea.hbm %s9973_s5, 1536 }
  0x67   :  { %p8134_p12 = scmp.ne.s32.totalorder %s9973_s5, %s8133_s21  ;;  %p8137_p13 = scmp.lt.u32.totalorder %s8133_s21, %s9973_s5 }
  0x69   :  { %p8139_p0 = pnand %p8137_p13, %p8134_p12 }
  0x6b   :  { %8142 = shalt.err (!%p8139_p0)
}
  0x6c   :  { %s8143_s4 = scalar_lea.vmem %s65_s1, 1536  ;;  %p8148_p2 = scmp.lt.s32.totalorder %s65_s1, %s65_s1 }
  0x6d   :  { %p8144_p1 = scmp.ne.s32.totalorder %s65_s1, %s8143_s4  ;;  %p8149_p3 = scmp.lt.s32.totalorder %s8143_s4, %s8143_s4 }
  0x6f   :  { %p8150_p4 = por %p8149_p3, %p8148_p2 }
  0x71   :  { %p8151_p5 = pnand %p8150_p4, %p8144_p1 }
  0x73   :  { %8154 = shalt.err (!%p8151_p5)
}
  0x74   :  { %70 = dma.hbm_to_vmem [thread:$0]  %s9973_s5, 1536, %s65_s1, [#allocation6], %s8284_s27, %s8284_s27, %s8285_s22  }
  0x75   :  { %s8155_s25 = scalar_lea.hbm %s9975_s7, 6144 }
  0x76   :  { %p8156_p6 = scmp.ne.s32.totalorder %s9975_s7, %s8155_s25  ;;  %p8159_p7 = scmp.lt.u32.totalorder %s8155_s25, %s9975_s7 }
  0x78   :  { %p8161_p8 = pnand %p8159_p7, %p8156_p6 }
  0x7a   :  { %8164 = shalt.err (!%p8161_p8)
}
  0x7b   :  { %s8165_s21 = scalar_lea.vmem %s87_s2, 6144  ;;  %p8170_p10 = scmp.lt.s32.totalorder %s87_s2, %s87_s2 }
  0x7c   :  { %p8166_p9 = scmp.ne.s32.totalorder %s87_s2, %s8165_s21  ;;  %p8171_p11 = scmp.lt.s32.totalorder %s8165_s21, %s8165_s21 }
  0x7e   :  { %p8172_p12 = por %p8171_p11, %p8170_p10 }
  0x80   :  { %p8173_p13 = pnand %p8172_p12, %p8166_p9 }
  0x82   :  { %8176 = shalt.err (!%p8173_p13)
}
  0x83   :  { %s8288_s5 = smov 128   ;;  %s8289_s1 = smov 8  }
  0x84   :  { %92 = dma.hbm_to_vmem [thread:$0]  %s9975_s7, 6144, %s87_s2, [#allocation9], %s8288_s5, %s8288_s5, %s8289_s1  }
  0x85   :  { %s8290_s26 = smov [#allocation13]   ;;  %s8177_s29 = scalar_lea.hbm %s9977_s9, 3840 }
  0x86   :  { %s108_s28 = sshll.u32 %s8290_s26, 4  ;;  %p8178_p0 = scmp.ne.s32.totalorder %s9977_s9, %s8177_s29  ;;  %s109_s28 = int_to_ptr.vmem [resolvable:$true] %s108_s28 }
  0x87   :  { %p8181_p1 = scmp.lt.u32.totalorder %s8177_s29, %s9977_s9 }
  0x89   :  { %p8183_p2 = pnand %p8181_p1, %p8178_p0 }
  0x8b   :  { %8186 = shalt.err (!%p8183_p2)
}
  0x8c   :  { %s8187_s8 = scalar_lea.vmem %s109_s28, 3840  ;;  %p8192_p4 = scmp.lt.s32.totalorder %s109_s28, %s109_s28 }
  0x8d   :  { %p8188_p3 = scmp.ne.s32.totalorder %s109_s28, %s8187_s8  ;;  %p8193_p5 = scmp.lt.s32.totalorder %s8187_s8, %s8187_s8 }
  0x8f   :  { %p8194_p6 = por %p8193_p5, %p8192_p4 }
  0x91   :  { %p8195_p7 = pnand %p8194_p6, %p8188_p3 }
  0x93   :  { %8198 = shalt.err (!%p8195_p7)
}
  0x94   :  { %s8291_s7 = smov 192   ;;  %s8292_s2 = smov 12  }
  0x95   :  { %114 = dma.hbm_to_vmem [thread:$0]  %s9977_s9, 3840, %s109_s28, [#allocation12], %s8291_s7, %s8291_s7, %s8292_s2  }
  0x96   :  { %s8293_s21 = smov [#allocation16]   ;;  %s8294_s30 = smov [#allocation17]  }
  0x97   :  { %s140_s3 = sshll.u32 %s8293_s21, 4  ;;  %s154_s26 = sshll.u32 %s8294_s30, 4  ;;  %s141_s3 = int_to_ptr.vmem [resolvable:$true] %s140_s3  ;;  %s8506_s26 = int_to_ptr.vmem [resolvable:$true] %s154_s26 }
  0x98   :  { %s8199_s29 = scalar_lea.hbm %s9983_s15, 8192 }
  0x99   :  { %p8200_p8 = scmp.ne.s32.totalorder %s9983_s15, %s8199_s29  ;;  %p8203_p9 = scmp.lt.u32.totalorder %s8199_s29, %s9983_s15 }
  0x9b   :  { %p8205_p10 = pnand %p8203_p9, %p8200_p8 }
  0x9d   :  { %8208 = shalt.err (!%p8205_p10)
}
  0x9e   :  { %s8209_s9 = scalar_lea.vmem %s141_s3, 8192  ;;  %p8214_p12 = scmp.lt.s32.totalorder %s141_s3, %s141_s3 }
  0x9f   :  { %p8210_p11 = scmp.ne.s32.totalorder %s141_s3, %s8209_s9  ;;  %p8215_p13 = scmp.lt.s32.totalorder %s8209_s9, %s8209_s9 }
  0xa1   :  { %p8216_p0 = por %p8215_p13, %p8214_p12 }
  0xa3   :  { %p8217_p1 = pnand %p8216_p0, %p8210_p11 }
  0xa5   :  { %8220 = shalt.err (!%p8217_p1)
}
  0xa6   :  { %146 = dma.hbm_to_vmem [thread:$0]  %s9983_s15, 8192, %s141_s3, [#allocation15], %s8288_s5, %s8288_s5, %s8289_s1  }
  0xa7   :  { %s8221_s23 = scalar_lea.hbm %s9985_s17, 2048 }
  0xa8   :  { %p8222_p2 = scmp.ne.s32.totalorder %s9985_s17, %s8221_s23  ;;  %p8225_p3 = scmp.lt.u32.totalorder %s8221_s23, %s9985_s17 }
  0xaa   :  { %p8227_p4 = pnand %p8225_p3, %p8222_p2 }
  0xac   :  { %8230 = shalt.err (!%p8227_p4)
}
  0xad   :  { %s8231_s24 = scalar_lea.vmem %s8506_s26, 2048  ;;  %p8236_p6 = scmp.lt.s32.totalorder %s8506_s26, %s8506_s26 }
  0xae   :  { %p8232_p5 = scmp.ne.s32.totalorder %s8506_s26, %s8231_s24  ;;  %p8237_p7 = scmp.lt.s32.totalorder %s8231_s24, %s8231_s24 }
  0xb0   :  { %p8238_p8 = por %p8237_p7, %p8236_p6 }
  0xb2   :  { %p8239_p9 = pnand %p8238_p8, %p8232_p5 }
  0xb4   :  { %8242 = shalt.err (!%p8239_p9)
}
  0xb5   :  { %160 = dma.hbm_to_vmem [thread:$0]  %s9985_s17, 2048, %s8506_s26, [#allocation18], %s8284_s27, %s8284_s27, %s8285_s22  }
  0xb6   :  { %8265 = dma.done.wait [#allocation3], 640  }
  0xb7   :  { %8266 = vsyncadd [#allocation3], 4294966656 }
  0xb8   :  { %8267 = dma.done.wait [#allocation6], 1552  }
  0xb9   :  { %8268 = vsyncadd [#allocation6], 4294965744 }
  0xba   :  { %8269 = dma.done.wait [#allocation9], 6160  }
  0xbb   :  { %8270 = vsyncadd [#allocation9], 4294961136 }
  0xbc   :  { %8271 = dma.done.wait [#allocation12], 3872  }
  0xbd   :  { %8272 = vsyncadd [#allocation12], 4294963424 }
  0xbe   :  { %8273 = dma.done.wait [#allocation15], 8320  }
  0xbf   :  { %8274 = vsyncadd [#allocation15], 4294958976 }
  0xc0   :  { %8275 = dma.done.wait [#allocation18], 2048  }
  0xc1   :  { %8276 = vsyncadd [#allocation18], 4294965248  ;;  %vm485_vm0 = vcmask 1045504   ;;  %v7657_v0 = vld [vmem:[#allocation2 + $0x8] sm:$0x3f]   ;;  %s10001_s12 = sld [smem:[#allocation27_spill]] }
  0xc2   :  { %7633 = vmatprep.subr.msk.bf16.mxu0 %vm485_vm0, %v7657_v0  ;;  %v487_v4 = vsel %vm485_vm0, %v7657_v0, 0  ;;  %v7658_v25 = vld [vmem:[#allocation2] sm:$0x3f]   ;;  %vm259_vm1 = vsmask.f32 7424  ;;  %vm424_vm2 = vcmask 97280  }
  0xc3   :  { %6980 = vmatpush3.bf16.msra.mxu0 %v487_v4  ;;  %v728_v39 = vsel %vm485_vm0, %v7658_v25, 0  ;;  %v8665_v62 = vld [vmem:[#allocation2 + $0x10] sm:$0x3f]   ;;  %vm1290_vm3 = vsmask.f32 6400  ;;  %vm946_vm4 = vcmask 1046528  }
  0xc4   :  { %7634 = vmatprep.subr.msk.bf16.mxu0 %vm485_vm0, %v7658_v25  ;;  %s10007_s24 = sld [smem:[#allocation29_spill]]  ;;  %vm2543_vm5 = vcmask 1044480   ;;  %vm2512_vm6 = vcmask 482304   ;;  %s10008_s29 = sld [smem:[#allocation30_spill]]  ;;  %vm2885_vm7 = vcmask 261120   ;;  %vm3605_vm8 = vcmask 236544  }
  0xc5   :  { %vm3804_vm9 = vcmask 523264   ;;  %vm4306_vm10 = vcmask 760832   ;;  %vm4996_vm11 = vcmask 498688   ;;  %s8297_s9 = smov [#allocation19]  }
  0xc6   :  { %s6226_s28 = sshll.u32 %s8297_s9, 4  ;;  %s6227_s28 = int_to_ptr.vmem [resolvable:$true] %s6226_s28 }
  0xc7   :  { %v194_v1 = vld [vmem:[%s10001_s12] sm:$0xff]  ;;  %v195_v2 = vld [vmem:[%s10001_s12 + $0x8] sm:$0xff]  ;;  %v196_v3 = vld [vmem:[%s10001_s12 + $0x10] sm:$0xff]  ;;  %s8243_s8 = scalar_lea.vmem %s6227_s28, 256  ;;  %p8248_p11 = scmp.lt.s32.totalorder %s6227_s28, %s6227_s28 }
  0xc8   :  { %v197_v5 = vld [vmem:[%s10001_s12 + $0x18] sm:$0xff]  ;;  %v8557_v6 = vpack.c.bf16 %v195_v2, %v194_v1  ;;  %v198_v7 = vld [vmem:[%s10001_s12 + $0x20] sm:$0xff]  ;;  %v199_v8 = vld [vmem:[%s10001_s12 + $0x28] sm:$0xff]  ;;  %p8244_p10 = scmp.ne.s32.totalorder %s6227_s28, %s8243_s8  ;;  %p8249_p12 = scmp.lt.s32.totalorder %s8243_s8, %s8243_s8 }
  0xc9   :  { %v8565_v9 = vpack.c.bf16 %v197_v5, %v196_v3  ;;  %v8567_v10 = vpack.c.bf16 %v199_v8, %v198_v7  ;;  %v200_v11 = vld [vmem:[%s10001_s12 + $0x30] sm:$0xff]  ;;  %v201_v12 = vld [vmem:[%s10001_s12 + $0x38] sm:$0xff]  ;;  %v202_v13 = vld [vmem:[%s10001_s12 + $0x40] sm:$0xff] }
  0xca   :  { %v261_v14 = vshrl.u32 %v8557_v6, 16  ;;  %v263_v15 = vshll.u32 %v8557_v6, 16  ;;  %v8580_v16 = vpack.c.bf16 %v201_v12, %v200_v11  ;;  %v203_v17 = vld [vmem:[%s10001_s12 + $0x48] sm:$0xff]  ;;  %v204_v28 = vld [vmem:[%s10001_s12 + $0x50] sm:$0xff]  ;;  %v205_v29 = vld [vmem:[%s10001_s12 + $0x58] sm:$0xff]  ;;  %p8250_p13 = por %p8249_p12, %p8248_p11 }
  0xcb   :  { %v268_v18 = vshll.u32 %v8565_v9, 16  ;;  %v272_v19 = vshrl.u32 %v8565_v9, 16  ;;  %v276_v20 = vshll.u32 %v8567_v10, 16  ;;  %v280_v21 = vshrl.u32 %v8567_v10, 16  ;;  %v206_v36 = vld [vmem:[%s10001_s12 + $0x60] sm:$0xff]  ;;  %v207_v37 = vld [vmem:[%s10001_s12 + $0x68] sm:$0xff] }
  0xcc   :  { %v265_v22 = vrot.slane %v263_v15, 1  ;;  %v284_v23 = vshll.u32 %v8580_v16, 16  ;;  %v8592_v24 = vpack.c.bf16 %v203_v17, %v202_v13  ;;  %v288_v34 = vshrl.u32 %v8580_v16, 16  ;;  %v208_v42 = vld [vmem:[%s10001_s12 + $0x70] sm:$0xff]  ;;  %v209_v43 = vld [vmem:[%s10001_s12 + $0x78] sm:$0xff]  ;;  %v210_v54 = vld [vmem:[%s10001_s12 + $0x80] sm:$0xff]  ;;  %p8251_p0 = pnand %p8250_p13, %p8244_p10 }
  0xcd   :  { %v270_v26 = vrot.slane %v268_v18, 1  ;;  %v278_v27 = vrot.slane %v276_v20, 1  ;;  %v8623_v40 = vpack.c.bf16 %v205_v29, %v204_v28  ;;  %v8639_v48 = vpack.c.bf16 %v207_v37, %v206_v36  ;;  %v211_v55 = vld [vmem:[%s10001_s12 + $0x88] sm:$0xff]  ;;  %v212_v60 = vld [vmem:[%s10001_s12 + $0x90] sm:$0xff]  ;;  %v213_v63 = vld [vmem:[%s10001_s12 + $0x98] sm:$0xff] }
  0xce   :  { %v266_v30 = vor.u32 %v265_v22, %v261_v14  ;;  %v286_v31 = vrot.slane %v284_v23, 1  ;;  %v292_v35 = vshll.u32 %v8592_v24, 16  ;;  %v296_v41 = vshrl.u32 %v8592_v24, 16  ;;  %v214_v7 = vld [vmem:[%s10001_s12 + $0xa0] sm:$0xff]  ;;  %v215_v8 = vld [vmem:[%s10001_s12 + $0xa8] sm:$0xff]  ;;  %v216_v11 = vld [vmem:[%s10001_s12 + $0xb0] sm:$0xff] }
  0xcf   :  { %v274_v32 = vor.u32 %v272_v19, %v270_v26  ;;  %v282_v33 = vor.u32 %v280_v21, %v278_v27  ;;  %v300_v47 = vshll.u32 %v8623_v40, 16  ;;  %v8644_v50 = vpack.c.bf16 %v209_v43, %v208_v42  ;;  %v217_v12 = vld [vmem:[%s10001_s12 + $0xb8] sm:$0xff]  ;;  %v220_v36 = vld [vmem:[%s10001_s12 + $0xd0] sm:$0xff] }
  0xd0   :  { %v271_v38 = vsel %vm259_vm1, %v266_v30, %v270_v26  ;;  %v294_v46 = vrot.slane %v292_v35, 1  ;;  %v290_v49 = vor.u32 %v288_v34, %v286_v31  ;;  %v308_v53 = vshll.u32 %v8639_v48, 16 }
  0xd1   :  { %6981 = vmatprep.mubr.msk.bf16.mxu0 %vm424_vm2, %v271_v38  ;;  %v279_v44 = vsel %vm259_vm1, %v274_v32, %v278_v27  ;;  %v287_v45 = vsel %vm259_vm1, %v282_v33, %v286_v31  ;;  %v302_v52 = vrot.slane %v300_v47, 1  ;;  %v304_v57 = vshrl.u32 %v8623_v40, 16  ;;  %v218_v31 = vld [vmem:[%s10001_s12 + $0xc0] sm:$0xff]  ;;  %v219_v32 = vld [vmem:[%s10001_s12 + $0xc8] sm:$0xff] }
  0xd2   :  { %6982 = vmatmul.mubr.msk.bf16.vlgmr.msra.gmra.mrb[0].mxu0 %vm424_vm2, %v279_v44  ;;  %v298_v51 = vor.u32 %v296_v41, %v294_v46  ;;  %v295_v56 = vsel %vm259_vm1, %v290_v49, %v294_v46  ;;  %v312_v58 = vshrl.u32 %v8639_v48, 16  ;;  %v316_v59 = vshll.u32 %v8644_v50, 16 }
  0xd3   :  { %6985 = vmatprep.mubr.msk.bf16.mxu0 %vm424_vm2, %v287_v45  ;;  %7022 = vmatpush3.bf16.msra.mxu0 %v728_v39  ;;  %v310_v0 = vrot.slane %v308_v53, 1  ;;  %v8673_v1 = vpack.c.bf16 %v211_v55, %v210_v54  ;;  %v306_v2 = vor.u32 %v304_v57, %v302_v52  ;;  %v8684_v5 = vpack.c.bf16 %v213_v63, %v212_v60  ;;  %v221_v39 = vld [vmem:[%s10001_s12 + $0xd8] sm:$0xff]  ;;  %v222_v54 = vld [vmem:[%s10001_s12 + $0xe0] sm:$0xff]  ;;  %v223_v55 = vld [vmem:[%s10001_s12 + $0xe8] sm:$0xff] }
  0xd4   :  { %v303_v61 = vsel %vm259_vm1, %v298_v51, %v302_v52  ;;  %7635 = vmatprep.subr.msk.bf16.mxu0 %vm485_vm0, %v8665_v62  ;;  %v318_v4 = vrot.slane %v316_v59, 1  ;;  %v320_v22 = vshrl.u32 %v8644_v50, 16  ;;  %v8707_v29 = vpack.c.bf16 %v215_v8, %v214_v7  ;;  %v225_v63 = vld [vmem:[%s10001_s12 + $0xf8] sm:$0xff] }
  0xd5   :  { %v314_v3 = vor.u32 %v312_v58, %v310_v0  ;;  %v324_v13 = vshll.u32 %v8673_v1, 16  ;;  %v311_v17 = vsel %vm259_vm1, %v306_v2, %v310_v0  ;;  %v328_v26 = vshrl.u32 %v8673_v1, 16 }
  0xd6   :  { %v332_v27 = vshll.u32 %v8684_v5, 16  ;;  %v8709_v30 = vpack.c.bf16 %v217_v12, %v216_v11  ;;  %v322_v33 = vor.u32 %v320_v22, %v318_v4  ;;  %v336_v42 = vshrl.u32 %v8684_v5, 16 }
  0xd7   :  { %v319_v25 = vsel %vm259_vm1, %v314_v3, %v318_v4  ;;  %v326_v28 = vrot.slane %v324_v13, 1  ;;  %v340_v43 = vshll.u32 %v8707_v29, 16  ;;  %v8734_v46 = vpack.c.bf16 %v219_v32, %v218_v31 }
  0xd8   :  { %v334_v38 = vrot.slane %v332_v27, 1  ;;  %v348_v44 = vshll.u32 %v8709_v30, 16  ;;  %v8736_v49 = vpack.c.bf16 %v221_v39, %v220_v36  ;;  %v344_v52 = vshrl.u32 %v8707_v29, 16 }
  0xd9   :  { %v330_v37 = vor.u32 %v328_v26, %v326_v28  ;;  %v327_v45 = vsel %vm259_vm1, %v322_v33, %v326_v28  ;;  %v356_v2 = vshll.u32 %v8734_v46, 16  ;;  %v8764_v7 = vpack.c.bf16 %v223_v55, %v222_v54  ;;  %v228_v55 = vld [vmem:[%s10001_s12 + $0x110] sm:$0xff] }
  0xda   :  { %6986 = vmatmul.mubr.msk.bf16.gmra.mrb[4].mxu0 %vm424_vm2, %v295_v56  ;;  %v342_v56 = vrot.slane %v340_v43, 1  ;;  %v350_v60 = vrot.slane %v348_v44, 1  ;;  %v338_v0 = vor.u32 %v336_v42, %v334_v38  ;;  %v9994_v3 = vshll.u32 %v8736_v49, 16 }
  0xdb   :  { %6989 = vmatprep.mubr.msk.bf16.mxu0 %vm424_vm2, %v303_v61  ;;  %v335_v51 = vsel %vm259_vm1, %v330_v37, %v334_v38  ;;  %v224_v61 = vld [vmem:[%s10001_s12 + $0xf0] sm:$0xff]  ;;  %v352_v11 = vshrl.u32 %v8709_v30, 16  ;;  %v368_v28 = vshrl.u32 %v8736_v49, 16  ;;  %v358_v31 = vrot.slane %v356_v2, 1 }
  0xdc   :  { %v346_v4 = vor.u32 %v344_v52, %v342_v56  ;;  %v343_v8 = vsel %vm259_vm1, %v338_v0, %v342_v56  ;;  %v8768_v12 = vpack.c.bf16 %v225_v63, %v224_v61  ;;  %v366_v32 = vrot.slane %v9994_v3, 1  ;;  %v229_v56 = vld [vmem:[%s10001_s12 + $0x118] sm:$0xff] }
  0xdd   :  { %v9992_v33 = vshll.u32 %v8764_v7, 16  ;;  %v9993_v36 = vshrl.u32 %v8764_v7, 16  ;;  %v354_v37 = vor.u32 %v352_v11, %v350_v60 }
  0xde   :  { %v9991_v38 = vshll.u32 %v8768_v12, 16  ;;  %v370_v0 = vor.u32 %v368_v28, %v366_v32 }
  0xdf   :  { %v359_v54 = vsel %vm259_vm1, %v354_v37, %v358_v31  ;;  %v374_v61 = vrot.slane %v9992_v33, 1  ;;  %v231_v37 = vld [vmem:[%s10001_s12 + $0x128] sm:$0xff] }
  0xe2   :  { %6990 = vmatmul.mubr.msk.bf16.gmra.mrb[8].mxu0 %vm424_vm2, %v311_v17  ;;  %v351_v17 = vsel %vm259_vm1, %v346_v4, %v350_v60  ;;  %v378_v4 = vor.u32 %v9993_v36, %v374_v61 }
  0xe3   :  { %6993 = vmatprep.mubr.msk.bf16.mxu0 %vm424_vm2, %v319_v25  ;;  %v360_v25 = vshrl.u32 %v8734_v46, 16 }
  0xe5   :  { %v362_v39 = vor.u32 %v360_v25, %v358_v31  ;;  %v230_v31 = vld [vmem:[%s10001_s12 + $0x120] sm:$0xff] }
  0xe7   :  { %v367_v60 = vsel %vm259_vm1, %v362_v39, %v366_v32  ;;  %v375_v32 = vsel %vm259_vm1, %v370_v0, %v374_v61  ;;  %v8835_v0 = vpack.c.bf16 %v231_v37, %v230_v31 }
  0xea   :  { %6994 = vmatmul.mubr.msk.bf16.gmra.mrb[12].mxu0 %vm424_vm2, %v327_v45  ;;  %v226_v45 = vld [vmem:[%s10001_s12 + $0x100] sm:$0xff] }
  0xeb   :  { %6997 = vmatprep.mubr.msk.bf16.mxu0 %vm424_vm2, %v335_v51  ;;  %v227_v51 = vld [vmem:[%s10001_s12 + $0x108] sm:$0xff] }
  0xec   :  { %v8803_v63 = vpack.c.bf16 %v227_v51, %v226_v45  ;;  %v384_v45 = vshrl.u32 %v8768_v12, 16  ;;  %v232_v51 = vld [vmem:[%s10001_s12 + $0x130] sm:$0xff] }
  0xee   :  { %v9995_v39 = vshll.u32 %v8803_v63, 16 }
  0xf0   :  { %v390_v61 = vrot.slane %v9995_v39, 1 }
  0xf2   :  { %6998 = vmatmul.mubr.msk.bf16.gmra.mrb[16].mxu0 %vm424_vm2, %v343_v8  ;;  %v382_v8 = vrot.slane %v9991_v38, 1 }
  0xf3   :  { %7001 = vmatprep.mubr.msk.bf16.mxu0 %vm424_vm2, %v351_v17  ;;  %v8812_v17 = vpack.c.bf16 %v229_v56, %v228_v55  ;;  %v392_v56 = vshrl.u32 %v8803_v63, 16 }
  0xf4   :  { %v383_v55 = vsel %vm259_vm1, %v378_v4, %v382_v8  ;;  %v386_v38 = vor.u32 %v384_v45, %v382_v8 }
  0xf5   :  { %v394_v33 = vor.u32 %v392_v56, %v390_v61  ;;  %v400_v31 = vshrl.u32 %v8812_v17, 16 }
  0xf6   :  { %v391_v3 = vsel %vm259_vm1, %v386_v38, %v390_v61 }
  0xfa   :  { %7002 = vmatmul.mubr.msk.bf16.gmra.mrb[20].mxu0 %vm424_vm2, %v359_v54  ;;  %v233_v54 = vld [vmem:[%s10001_s12 + $0x138] sm:$0xff] }
  0xfb   :  { %7005 = vmatprep.mubr.msk.bf16.mxu0 %vm424_vm2, %v367_v60  ;;  %v396_v60 = vshll.u32 %v8812_v17, 16  ;;  %v8844_v36 = vpack.c.bf16 %v233_v54, %v232_v51 }
  0xfd   :  { %v398_v4 = vrot.slane %v396_v60, 1  ;;  %v412_v8 = vshll.u32 %v8844_v36, 16 }
  0xff   :  { %v399_v37 = vsel %vm259_vm1, %v394_v33, %v398_v4  ;;  %v402_v51 = vor.u32 %v400_v31, %v398_v4  ;;  %v414_v33 = vrot.slane %v412_v8, 1  ;;  %v7660_v4 = vld [vmem:[#allocation2 + $0x18] sm:$0x3f]  }
 0x102   :  { %7006 = vmatmul.mubr.msk.bf16.gmra.mrb[24].mxu0 %vm424_vm2, %v375_v32  ;;  %v404_v32 = vshll.u32 %v8835_v0, 16 }
 0x103   :  { %7009 = vmatprep.mubr.msk.bf16.mxu0 %vm424_vm2, %v383_v55  ;;  %v408_v55 = vshrl.u32 %v8835_v0, 16 }
 0x104   :  { %v406_v39 = vrot.slane %v404_v32, 1 }
 0x106   :  { %v410_v38 = vor.u32 %v408_v55, %v406_v39  ;;  %v407_v54 = vsel %vm259_vm1, %v402_v51, %v406_v39  ;;  %v1052_v39 = vsel %vm485_vm0, %v8665_v62, 0  ;;  %v1299_v62 = vrot.slane %v276_v20, 2 }
 0x107   :  { %v1298_v51 = vrot.slane %v280_v21, 1 }
 0x108   :  { %v415_v61 = vsel %vm259_vm1, %v410_v38, %v414_v33  ;;  %v1291_v38 = vrot.slane %v261_v14, 1 }
 0x109   :  { %v8903_v20 = vor.u32 %v1299_v62, %v1298_v51  ;;  %v950_v62 = vrot.slane %v8567_v10, 1  ;;  %v952_v51 = vrot.slane %v8580_v16, 1 }
 0x10a   :  { %7010 = vmatmul.mubr.msk.bf16.gmra.mrb[28].mxu0 %vm424_vm2, %v391_v3  ;;  %v416_v3 = vshrl.u32 %v8844_v36, 16 }
 0x10b   :  { %7013 = vmatprep.mubr.msk.bf16.mxu0 %vm424_vm2, %v399_v37 }
 0x10c   :  { %v418_v37 = vor.u32 %v416_v3, %v414_v33  ;;  %v1295_v33 = vrot.slane %v268_v18, 2 }
 0x112   :  { %7014 = vmatmul.mubr.msk.bf16.gmra.mrb[32].mxu0 %vm424_vm2, %v407_v54  ;;  %v1292_v54 = vrot.slane %v263_v15, 2  ;;  %v947_v15 = vrot.slane %v8557_v6, 1 }
 0x113   :  { %7017 = vmatprep.mubr.msk.bf16.mxu0 %vm424_vm2, %v415_v61  ;;  %v1294_v61 = vrot.slane %v272_v19, 1  ;;  %v948_v19 = vrot.slane %v8565_v9, 1 }
 0x114   :  { %v1293_v21 = vor.u32 %v1292_v54, %v1291_v38  ;;  %v1436_v54 = vsel %vm485_vm0, %v7660_v4, 0 }
 0x115   :  { %v1296_v14 = vor.u32 %v1295_v33, %v1294_v61  ;;  %v951_v38 = vsel %vm946_vm4, %v948_v19, %v950_v62  ;;  %v953_v33 = vsel %vm946_vm4, %v950_v62, %v952_v51  ;;  %v7661_v61 = vld [vmem:[#allocation2 + $0x20] sm:$0x3f]  }
 0x117   :  { %v8910_v18 = vsel %vm1290_vm3, %v1296_v14, %v8903_v20 }
 0x11a   :  { %7018 = vmatmul.mubr.msk.bf16.gmra.mrb[36].mxu0 %vm424_vm2, %v418_v37  ;;  %v8906_v37 = vsel %vm1290_vm3, %v1293_v21, %v1296_v14  ;;  %v954_v21 = vrot.slane %v8592_v24, 1  ;;  %v956_v14 = vrot.slane %v8623_v40, 1 }
 0x11b   :  { %7023 = vmatprep.mubr.msk.bf16.mxu0 %vm424_vm2, %v8557_v6 }
 0x122   :  { %7024 = vmatmul.mubr.msk.bf16.vlgmr.msra.gmra.mrb[0].mxu0 %vm424_vm2, %v8565_v9 }
 0x123   :  { %7027 = vmatprep.mubr.msk.bf16.mxu0 %vm424_vm2, %v8567_v10  ;;  %7064 = vmatpush3.bf16.msra.mxu0 %v1052_v39  ;;  %v949_v39 = vsel %vm946_vm4, %v947_v15, %v948_v19  ;;  %v955_v15 = vsel %vm946_vm4, %v952_v51, %v954_v21  ;;  %v957_v19 = vsel %vm946_vm4, %v954_v21, %v956_v14  ;;  %v962_v51 = vrot.slane %v8673_v1, 1 }
 0x124   :  { %7636 = vmatprep.subr.msk.bf16.mxu0 %vm485_vm0, %v7660_v4  ;;  %v958_v4 = vrot.slane %v8639_v48, 1 }
 0x126   :  { %v959_v62 = vsel %vm946_vm4, %v956_v14, %v958_v4  ;;  %v966_v14 = vrot.slane %v8707_v29, 1 }
 0x12a   :  { %7028 = vmatmul.mubr.msk.bf16.gmra.mrb[4].mxu0 %vm424_vm2, %v8580_v16 }
 0x12b   :  { %7031 = vmatprep.mubr.msk.bf16.mxu0 %vm424_vm2, %v8592_v24 }
 0x132   :  { %7032 = vmatmul.mubr.msk.bf16.gmra.mrb[8].mxu0 %vm424_vm2, %v8623_v40 }
 0x133   :  { %7035 = vmatprep.mubr.msk.bf16.mxu0 %vm424_vm2, %v8639_v48 }
 0x13a   :  { %7036 = vmatmul.mubr.msk.bf16.gmra.mrb[12].mxu0 %vm424_vm2, %v8644_v50 }
 0x13b   :  { %7039 = vmatprep.mubr.msk.bf16.mxu0 %vm424_vm2, %v8673_v1 }
 0x142   :  { %7040 = vmatmul.mubr.msk.bf16.gmra.mrb[16].mxu0 %vm424_vm2, %v8684_v5 }
 0x143   :  { %7043 = vmatprep.mubr.msk.bf16.mxu0 %vm424_vm2, %v8707_v29 }
 0x14a   :  { %7044 = vmatmul.mubr.msk.bf16.gmra.mrb[20].mxu0 %vm424_vm2, %v8709_v30 }
 0x14b   :  { %7047 = vmatprep.mubr.msk.bf16.mxu0 %vm424_vm2, %v8734_v46 }
 0x152   :  { %7048 = vmatmul.mubr.msk.bf16.gmra.mrb[24].mxu0 %vm424_vm2, %v8736_v49 }
 0x153   :  { %7051 = vmatprep.mubr.msk.bf16.mxu0 %vm424_vm2, %v8764_v7 }
 0x15a   :  { %7052 = vmatmul.mubr.msk.bf16.gmra.mrb[28].mxu0 %vm424_vm2, %v8768_v12 }
 0x15b   :  { %7055 = vmatprep.mubr.msk.bf16.mxu0 %vm424_vm2, %v8803_v63 }
 0x162   :  { %7056 = vmatmul.mubr.msk.bf16.gmra.mrb[32].mxu0 %vm424_vm2, %v8812_v17 }
 0x163   :  { %7059 = vmatprep.mubr.msk.bf16.mxu0 %vm424_vm2, %v8835_v0 }
 0x16a   :  { %7060 = vmatmul.mubr.msk.bf16.gmra.mrb[36].mxu0 %vm424_vm2, %v8844_v36 }
 0x16b   :  { %7065 = vmatprep.mubr.msk.bf16.mxu0 %vm424_vm2, %v949_v39  ;;  %v960_v39 = vrot.slane %v8644_v50, 1 }
 0x172   :  { %7066 = vmatmul.mubr.msk.bf16.vlgmr.msra.gmra.mrb[0].mxu0 %vm424_vm2, %v951_v38  ;;  %v961_v38 = vsel %vm946_vm4, %v958_v4, %v960_v39 }
 0x173   :  { %7069 = vmatprep.mubr.msk.bf16.mxu0 %vm424_vm2, %v953_v33  ;;  %7106 = vmatpush3.bf16.msra.mxu0 %v1436_v54  ;;  %v964_v33 = vrot.slane %v8684_v5, 1  ;;  %v963_v54 = vsel %vm946_vm4, %v960_v39, %v962_v51  ;;  %v970_v39 = vrot.slane %v8734_v46, 1 }
 0x174   :  { %7637 = vmatprep.subr.msk.bf16.mxu0 %vm485_vm0, %v7661_v61 }
 0x175   :  { %v965_v21 = vsel %vm946_vm4, %v962_v51, %v964_v33 }
 0x17a   :  { %7070 = vmatmul.mubr.msk.bf16.gmra.mrb[4].mxu0 %vm424_vm2, %v955_v15  ;;  %v968_v15 = vrot.slane %v8709_v30, 1 }
 0x17b   :  { %7073 = vmatprep.mubr.msk.bf16.mxu0 %vm424_vm2, %v957_v19  ;;  %v967_v19 = vsel %vm946_vm4, %v964_v33, %v966_v14  ;;  %v974_v33 = vrot.slane %v8764_v7, 1 }
 0x17c   :  { %v969_v4 = vsel %vm946_vm4, %v966_v14, %v968_v15 }
 0x182   :  { %7074 = vmatmul.mubr.msk.bf16.gmra.mrb[8].mxu0 %vm424_vm2, %v959_v62  ;;  %v972_v62 = vrot.slane %v8736_v49, 1 }
 0x183   :  { %7077 = vmatprep.mubr.msk.bf16.mxu0 %vm424_vm2, %v961_v38  ;;  %v971_v38 = vsel %vm946_vm4, %v968_v15, %v970_v39  ;;  %v978_v15 = vrot.slane %v8803_v63, 1 }
 0x184   :  { %v973_v51 = vsel %vm946_vm4, %v970_v39, %v972_v62 }
 0x18a   :  { %7078 = vmatmul.mubr.msk.bf16.gmra.mrb[12].mxu0 %vm424_vm2, %v963_v54  ;;  %v976_v54 = vrot.slane %v8768_v12, 1 }
 0x18b   :  { %7081 = vmatprep.mubr.msk.bf16.mxu0 %vm424_vm2, %v965_v21  ;;  %v975_v21 = vsel %vm946_vm4, %v972_v62, %v974_v33  ;;  %v982_v62 = vrot.slane %v8835_v0, 1 }
 0x18c   :  { %v977_v14 = vsel %vm946_vm4, %v974_v33, %v976_v54 }
 0x192   :  { %7082 = vmatmul.mubr.msk.bf16.gmra.mrb[16].mxu0 %vm424_vm2, %v967_v19  ;;  %v980_v19 = vrot.slane %v8812_v17, 1 }
 0x193   :  { %7085 = vmatprep.mubr.msk.bf16.mxu0 %vm424_vm2, %v969_v4  ;;  %v979_v4 = vsel %vm946_vm4, %v976_v54, %v978_v15  ;;  %v1302_v54 = vrot.slane %v288_v34, 1  ;;  %v1780_v34 = vsel %vm485_vm0, %v7661_v61, 0  ;;  %v1315_v61 = vrot.slane %v308_v53, 2 }
 0x194   :  { %v981_v39 = vsel %vm946_vm4, %v978_v15, %v980_v19  ;;  %v1306_v15 = vrot.slane %v296_v41, 1  ;;  %v1323_v53 = vrot.slane %v324_v13, 2  ;;  %v1331_v13 = vrot.slane %v340_v43, 2 }
 0x195   :  { %v1339_v43 = vrot.slane %v356_v2, 2  ;;  %v10004_v2 = vshll.u32 %v8764_v7, 16 }
 0x19a   :  { %7086 = vmatmul.mubr.msk.bf16.gmra.mrb[20].mxu0 %vm424_vm2, %v971_v38  ;;  %v984_v38 = vrot.slane %v8844_v36, 1 }
 0x19b   :  { %7089 = vmatprep.mubr.msk.bf16.mxu0 %vm424_vm2, %v973_v51  ;;  %v983_v51 = vsel %vm946_vm4, %v980_v19, %v982_v62  ;;  %v1307_v19 = vrot.slane %v292_v35, 2 }
 0x19c   :  { %v985_v33 = vsel %vm946_vm4, %v982_v62, %v984_v38 }
 0x19d   :  { %v1308_v41 = vor.u32 %v1307_v19, %v1306_v15 }
 0x1a2   :  { %7090 = vmatmul.mubr.msk.bf16.gmra.mrb[24].mxu0 %vm424_vm2, %v975_v21  ;;  %v1303_v21 = vrot.slane %v284_v23, 2  ;;  %v1310_v23 = vrot.slane %v304_v57, 1 }
 0x1a3   :  { %7093 = vmatprep.mubr.msk.bf16.mxu0 %vm424_vm2, %v977_v14 }
 0x1a4   :  { %v1304_v14 = vor.u32 %v1303_v21, %v1302_v54 }
 0x1a6   :  { %v1309_v35 = vsel %vm1290_vm3, %v1304_v14, %v1308_v41 }
 0x1aa   :  { %7094 = vmatmul.mubr.msk.bf16.gmra.mrb[28].mxu0 %vm424_vm2, %v979_v4  ;;  %v1305_v4 = vsel %vm1290_vm3, %v8903_v20, %v1304_v14  ;;  %v1314_v20 = vrot.slane %v312_v58, 1  ;;  %v1322_v58 = vrot.slane %v328_v26, 1  ;;  %v1330_v26 = vrot.slane %v344_v52, 1 }
 0x1ab   :  { %7097 = vmatprep.mubr.msk.bf16.mxu0 %vm424_vm2, %v981_v39  ;;  %v1311_v39 = vrot.slane %v300_v47, 2  ;;  %v1318_v47 = vrot.slane %v320_v22, 1  ;;  %v1326_v22 = vrot.slane %v336_v42, 1  ;;  %v1334_v42 = vrot.slane %v352_v11, 1 }
 0x1ac   :  { %v1316_v62 = vor.u32 %v1315_v61, %v1314_v20  ;;  %v1324_v54 = vor.u32 %v1323_v53, %v1322_v58  ;;  %v1332_v19 = vor.u32 %v1331_v13, %v1330_v26  ;;  %v1338_v52 = vrot.slane %v360_v25, 1 }
 0x1ad   :  { %v1342_v11 = vrot.slane %v368_v28, 1  ;;  %v10003_v25 = vshrl.u32 %v8764_v7, 16  ;;  %v1347_v61 = vrot.slane %v10004_v2, 2  ;;  %v1350_v28 = vrot.slane %v384_v45, 1 }
 0x1ae   :  { %v1354_v58 = vrot.slane %v392_v56, 1  ;;  %v10006_v53 = vshll.u32 %v8803_v63, 16  ;;  %v1358_v45 = vrot.slane %v400_v31, 1  ;;  %v1362_v56 = vrot.slane %v408_v55, 1 }
 0x1af   :  { %v1346_v20 = vrot.slane %v10003_v25, 1  ;;  %v1363_v26 = vrot.slane %v404_v32, 2  ;;  %v1366_v31 = vrot.slane %v416_v3, 1  ;;  %v1675_v32 = vrot.slane %v8557_v6, 2 }
 0x1b0   :  { %v1676_v3 = vrot.slane %v8565_v9, 2  ;;  %v1682_v6 = vrot.slane %v8592_v24, 2  ;;  %v1684_v9 = vrot.slane %v8623_v40, 2  ;;  %v1690_v24 = vrot.slane %v8673_v1, 2 }
 0x1b1   :  { %v1692_v40 = vrot.slane %v8684_v5, 2  ;;  %v1698_v1 = vrot.slane %v8734_v46, 2  ;;  %v1700_v5 = vrot.slane %v8736_v49, 2  ;;  %v1706_v46 = vrot.slane %v8803_v63, 2  ;;  %v7664_v63 = vld [vmem:[#allocation13 + $0x4] ss:$12 sps:$4 sm:$0xff]  }
 0x1b2   :  { %7098 = vmatmul.mubr.msk.bf16.gmra.mrb[32].mxu0 %vm424_vm2, %v983_v51  ;;  %2581 = vmatprep.mubr.bf16.mxu1 %v7664_v63 }
 0x1b3   :  { %7101 = vmatprep.mubr.msk.bf16.mxu0 %vm424_vm2, %v985_v33 }
 0x1ba   :  { %7102 = vmatmul.mubr.msk.bf16.gmra.mrb[36].mxu0 %vm424_vm2, %v984_v38 }
 0x1bb   :  { %7107 = vmatprep.mubr.msk.bf16.mxu0 %vm424_vm2, %v8906_v37  ;;  %v1312_v37 = vor.u32 %v1311_v39, %v1310_v23 }
 0x1bd   :  { %v1313_v57 = vsel %vm1290_vm3, %v1308_v41, %v1312_v37  ;;  %v1317_v51 = vsel %vm1290_vm3, %v1312_v37, %v1316_v62  ;;  %v1340_v41 = vor.u32 %v1339_v43, %v1338_v52 }
 0x1c2   :  { %7108 = vmatmul.mubr.msk.bf16.vlgmr.msra.gmra.mrb[0].mxu0 %vm424_vm2, %v8910_v18  ;;  %v1319_v18 = vrot.slane %v316_v59, 2  ;;  %v1327_v59 = vrot.slane %v332_v27, 2  ;;  %v1335_v27 = vrot.slane %v348_v44, 2  ;;  %v10002_v44 = vshll.u32 %v8736_v49, 16 }
 0x1c3   :  { %7111 = vmatprep.mubr.msk.bf16.mxu0 %vm424_vm2, %v1305_v4  ;;  %7148 = vmatpush3.bf16.msra.mxu0 %v1780_v34  ;;  %v1708_v49 = vrot.slane %v8812_v17, 2  ;;  %v9166_v17 = vld [vmem:[%s10007_s24] ss:$0 sm:$0xff] }
 0x1c4   :  { %v1320_v38 = vor.u32 %v1319_v18, %v1318_v47  ;;  %v1328_v21 = vor.u32 %v1327_v59, %v1326_v22  ;;  %v1336_v4 = vor.u32 %v1335_v27, %v1334_v42  ;;  %v1343_v39 = vrot.slane %v10002_v44, 2 }
 0x1c5   :  { %v10005_v47 = vshll.u32 %v8768_v12, 16  ;;  %v1359_v59 = vrot.slane %v396_v60, 2  ;;  %v1367_v60 = vrot.slane %v412_v8, 2  ;;  %v1677_v8 = vsel %vm485_vm0, %v1675_v32, %v1676_v3 }
 0x1c6   :  { %v1321_v33 = vsel %vm1290_vm3, %v1316_v62, %v1320_v38  ;;  %v1325_v14 = vsel %vm1290_vm3, %v1320_v38, %v1324_v54  ;;  %v1329_v15 = vsel %vm1290_vm3, %v1324_v54, %v1328_v21  ;;  %v1333_v34 = vsel %vm1290_vm3, %v1328_v21, %v1332_v19 }
 0x1c7   :  { %v1337_v23 = vsel %vm1290_vm3, %v1332_v19, %v1336_v4  ;;  %v1344_v37 = vor.u32 %v1343_v39, %v1342_v11  ;;  %v1351_v18 = vrot.slane %v10005_v47, 2  ;;  %v1348_v62 = vor.u32 %v1347_v61, %v1346_v20 }
 0x1c8   :  { %v1360_v21 = vor.u32 %v1359_v59, %v1358_v45  ;;  %v1368_v42 = vor.u32 %v1367_v60, %v1366_v31  ;;  %v1678_v19 = vrot.slane %v8567_v10, 2  ;;  %v1686_v10 = vrot.slane %v8639_v48, 2 }
 0x1c9   :  { %v1352_v38 = vor.u32 %v1351_v18, %v1350_v28  ;;  %v1694_v48 = vrot.slane %v8707_v29, 2  ;;  %v1701_v20 = vsel %vm485_vm0, %v1698_v1, %v1700_v5  ;;  %v1702_v29 = vrot.slane %v8764_v7, 2 }
 0x1ca   :  { %7112 = vmatmul.mubr.msk.bf16.gmra.mrb[4].mxu0 %vm424_vm2, %v1309_v35  ;;  %v1341_v35 = vsel %vm1290_vm3, %v1336_v4, %v1340_v41  ;;  %v1680_v4 = vrot.slane %v8580_v16, 2  ;;  %v1688_v16 = vrot.slane %v8644_v50, 2  ;;  %v1687_v11 = vsel %vm485_vm0, %v1684_v9, %v1686_v10 }
 0x1cb   :  { %7115 = vmatprep.mubr.msk.bf16.mxu0 %vm424_vm2, %v1313_v57  ;;  %v1345_v57 = vsel %vm1290_vm3, %v1340_v41, %v1344_v37  ;;  %v1353_v22 = vsel %vm1290_vm3, %v1348_v62, %v1352_v38  ;;  %v1693_v41 = vsel %vm485_vm0, %v1690_v24, %v1692_v40  ;;  %v1696_v50 = vrot.slane %v8709_v30, 2 }
 0x1cc   :  { %v1681_v52 = vsel %vm485_vm0, %v1678_v19, %v1680_v4  ;;  %v1683_v43 = vsel %vm485_vm0, %v1680_v4, %v1682_v6  ;;  %v1689_v44 = vsel %vm485_vm0, %v1686_v10, %v1688_v16  ;;  %v1691_v39 = vsel %vm485_vm0, %v1688_v16, %v1690_v24 }
 0x1cd   :  { %v1699_v25 = vsel %vm485_vm0, %v1696_v50, %v1698_v1  ;;  %v1704_v30 = vrot.slane %v8768_v12, 2  ;;  %v1703_v2 = vsel %vm485_vm0, %v1700_v5, %v1702_v29  ;;  %v1709_v28 = vsel %vm485_vm0, %v1706_v46, %v1708_v49 }
 0x1ce   :  { %v1710_v7 = vrot.slane %v8835_v0, 2  ;;  %v1712_v12 = vrot.slane %v8844_v36, 2 }
 0x1cf   :  { %v1705_v61 = vsel %vm485_vm0, %v1702_v29, %v1704_v30 }
 0x1d0   :  { %v1711_v47 = vsel %vm485_vm0, %v1708_v49, %v1710_v7  ;;  %v1713_v18 = vsel %vm485_vm0, %v1710_v7, %v1712_v12 }
 0x1d2   :  { %7116 = vmatmul.mubr.msk.bf16.gmra.mrb[8].mxu0 %vm424_vm2, %v1317_v51  ;;  %v1349_v51 = vsel %vm1290_vm3, %v1344_v37, %v1348_v62  ;;  %v1695_v37 = vsel %vm485_vm0, %v1692_v40, %v1694_v48 }
 0x1d3   :  { %7119 = vmatprep.mubr.msk.bf16.mxu0 %vm424_vm2, %v1321_v33  ;;  %v1355_v33 = vrot.slane %v10006_v53, 2 }
 0x1d5   :  { %v1356_v54 = vor.u32 %v1355_v33, %v1354_v58 }
 0x1d7   :  { %v1361_v13 = vsel %vm1290_vm3, %v1356_v54, %v1360_v21 }
 0x1da   :  { %7120 = vmatmul.mubr.msk.bf16.gmra.mrb[12].mxu0 %vm424_vm2, %v1325_v14  ;;  %v1357_v14 = vsel %vm1290_vm3, %v1352_v38, %v1356_v54 }
 0x1db   :  { %7123 = vmatprep.mubr.msk.bf16.mxu0 %vm424_vm2, %v1329_v15  ;;  %v1364_v15 = vor.u32 %v1363_v26, %v1362_v56 }
 0x1dd   :  { %v1365_v27 = vsel %vm1290_vm3, %v1360_v21, %v1364_v15  ;;  %v1369_v55 = vsel %vm1290_vm3, %v1364_v15, %v1368_v42 }
 0x1e2   :  { %7124 = vmatmul.mubr.msk.bf16.gmra.mrb[16].mxu0 %vm424_vm2, %v1333_v34  ;;  %v1679_v34 = vsel %vm485_vm0, %v1676_v3, %v1678_v19 }
 0x1e3   :  { %7127 = vmatprep.mubr.msk.bf16.mxu0 %vm424_vm2, %v1337_v23  ;;  %v1685_v23 = vsel %vm485_vm0, %v1682_v6, %v1684_v9 }
 0x1ea   :  { %7128 = vmatmul.mubr.msk.bf16.gmra.mrb[20].mxu0 %vm424_vm2, %v1341_v35  ;;  %v1697_v35 = vsel %vm485_vm0, %v1694_v48, %v1696_v50 }
 0x1eb   :  { %7131 = vmatprep.mubr.msk.bf16.mxu0 %vm424_vm2, %v1345_v57  ;;  %v1707_v57 = vsel %vm485_vm0, %v1704_v30, %v1706_v46 }
 0x1f2   :  { %7132 = vmatmul.mubr.msk.bf16.gmra.mrb[24].mxu0 %vm424_vm2, %v1349_v51 }
 0x1f3   :  { %7135 = vmatprep.mubr.msk.bf16.mxu0 %vm424_vm2, %v1353_v22 }
 0x1fa   :  { %7136 = vmatmul.mubr.msk.bf16.gmra.mrb[28].mxu0 %vm424_vm2, %v1357_v14 }
 0x1fb   :  { %7139 = vmatprep.mubr.msk.bf16.mxu0 %vm424_vm2, %v1361_v13 }
 0x202   :  { %7140 = vmatmul.mubr.msk.bf16.gmra.mrb[32].mxu0 %vm424_vm2, %v1365_v27 }
 0x203   :  { %7143 = vmatprep.mubr.msk.bf16.mxu0 %vm424_vm2, %v1369_v55 }
 0x20a   :  { %7144 = vmatmul.mubr.msk.bf16.gmra.mrb[36].mxu0 %vm424_vm2, %v1368_v42 }
 0x20b   :  { %7149 = vmatprep.mubr.msk.bf16.mxu0 %vm424_vm2, %v1677_v8 }
 0x212   :  { %7150 = vmatmul.mubr.msk.bf16.vlgmr.msra.gmra.mrb[0].mxu0 %vm424_vm2, %v1679_v34 }
 0x213   :  { %7153 = vmatprep.mubr.msk.bf16.mxu0 %vm424_vm2, %v1681_v52 }
 0x21a   :  { %7154 = vmatmul.mubr.msk.bf16.gmra.mrb[4].mxu0 %vm424_vm2, %v1683_v43 }
 0x21b   :  { %7157 = vmatprep.mubr.msk.bf16.mxu0 %vm424_vm2, %v1685_v23 }
 0x222   :  { %7158 = vmatmul.mubr.msk.bf16.gmra.mrb[8].mxu0 %vm424_vm2, %v1687_v11 }
 0x223   :  { %7161 = vmatprep.mubr.msk.bf16.mxu0 %vm424_vm2, %v1689_v44 }
 0x22a   :  { %7162 = vmatmul.mubr.msk.bf16.gmra.mrb[12].mxu0 %vm424_vm2, %v1691_v39 }
 0x22b   :  { %7165 = vmatprep.mubr.msk.bf16.mxu0 %vm424_vm2, %v1693_v41 }
 0x232   :  { %7166 = vmatmul.mubr.msk.bf16.gmra.mrb[16].mxu0 %vm424_vm2, %v1695_v37 }
 0x233   :  { %7169 = vmatprep.mubr.msk.bf16.mxu0 %vm424_vm2, %v1697_v35 }
 0x23a   :  { %7170 = vmatmul.mubr.msk.bf16.gmra.mrb[20].mxu0 %vm424_vm2, %v1699_v25 }
 0x23b   :  { %7173 = vmatprep.mubr.msk.bf16.mxu0 %vm424_vm2, %v1701_v20 }
 0x242   :  { %7174 = vmatmul.mubr.msk.bf16.gmra.mrb[24].mxu0 %vm424_vm2, %v1703_v2 }
 0x243   :  { %7177 = vmatprep.mubr.msk.bf16.mxu0 %vm424_vm2, %v1705_v61 }
 0x24a   :  { %7178 = vmatmul.mubr.msk.bf16.gmra.mrb[28].mxu0 %vm424_vm2, %v1707_v57 }
 0x24b   :  { %7181 = vmatprep.mubr.msk.bf16.mxu0 %vm424_vm2, %v1709_v28 }
 0x252   :  { %7182 = vmatmul.mubr.msk.bf16.gmra.mrb[32].mxu0 %vm424_vm2, %v1711_v47 }
 0x253   :  { %7185 = vmatprep.mubr.msk.bf16.mxu0 %vm424_vm2, %v1713_v18 }
 0x25a   :  { %7186 = vmatmul.mubr.msk.bf16.gmra.mrb[36].mxu0 %vm424_vm2, %v1712_v12 }
 0x2e5   :  { %v7151_v0 = vpop.f32.mrb[0].mxu0 }
 0x2e6   :  { %v2024_v36 = vadd.f32 %v7151_v0, %v9166_v17  ;;  %v1816_v62 = vpop.f32.mrb[1].mxu0 }
 0x2e7   :  { %v2022_v38 = vadd.f32 %v9166_v17, %v1816_v62  ;;  %v7152_v51 = vpop.f32.mrb[2].mxu0 }
 0x2e8   :  { %v2064_v58 = vmax.f32 %v2024_v36, 0.0  ;;  %v2025_v53 = vadd.f32 %v7152_v51, %v9166_v17  ;;  %v1819_v33 = vpop.f32.mrb[3].mxu0 }
 0x2e9   :  { %v2062_v22 = vmax.f32 %v2022_v38, 0.0  ;;  %v2023_v45 = vadd.f32 %v9166_v17, %v1819_v33 }
 0x2ea   :  { %v2065_v59 = vmax.f32 %v2025_v53, 0.0  ;;  %v2146_v21 = vrot.slane %v2064_v58, 1 }
 0x2eb   :  { %v2063_v54 = vmax.f32 %v2023_v45, 0.0  ;;  %v2143_v56 = vrot.slane %v2062_v22, 1 }
 0x2ec   :  { %v2148_v14 = vrot.slane %v2065_v59, 1 }
 0x2ed   :  { %v2144_v26 = vrot.slane %v2063_v54, 1  ;;  %v7155_v13 = vpop.f32.mrb[4].mxu0 }
 0x2ee   :  { %v2028_v31 = vadd.f32 %v7155_v13, %v9166_v17  ;;  %v1832_v60 = vpop.f32.mrb[5].mxu0  ;;  %v2149_v15 = vsel %vm946_vm4, %v2146_v21, %v2148_v14 }
 0x2ef   :  { %v2147_v42 = vsel %vm946_vm4, %v2144_v26, %v2146_v21  ;;  %v2026_v27 = vadd.f32 %v9166_v17, %v1832_v60  ;;  %v7156_v55 = vpop.f32.mrb[6].mxu0  ;;  %v2145_v32 = vsel %vm946_vm4, %v2143_v56, %v2144_v26  ;;  %v9177_v3 = vmax.f32 %v2064_v58, %v2149_v15 }
 0x2f0   :  { %v9179_v8 = vmax.f32 %v2063_v54, %v2147_v42  ;;  %v2068_v19 = vmax.f32 %v2028_v31, 0.0  ;;  %v2029_v4 = vadd.f32 %v7156_v55, %v9166_v17  ;;  %v1835_v34 = vpop.f32.mrb[7].mxu0  ;;  %v9182_v52 = vmax.f32 %v2062_v22, %v2145_v32 }
 0x2f1   :  { %v2066_v6 = vmax.f32 %v2026_v27, 0.0  ;;  %v2027_v9 = vadd.f32 %v9166_v17, %v1835_v34 }
 0x2f2   :  { %v2069_v43 = vmax.f32 %v2029_v4, 0.0  ;;  %v2302_v23 = vpack.c.bf16 %v9179_v8, %v9182_v52  ;;  %v2154_v11 = vrot.slane %v2068_v19, 1 }
 0x2f3   :  { %v2150_v10 = vrot.slane %v2066_v6, 1  ;;  %v2067_v16 = vmax.f32 %v2027_v9, 0.0 }
 0x2f4   :  { %v2156_v44 = vrot.slane %v2069_v43, 1 }
 0x2f5   :  { %v2152_v24 = vrot.slane %v2067_v16, 1  ;;  %v7159_v40 = vpop.f32.mrb[8].mxu0  ;;  %v2151_v39 = vsel %vm946_vm4, %v2148_v14, %v2150_v10 }
 0x2f6   :  { %v2032_v41 = vadd.f32 %v7159_v40, %v9166_v17  ;;  %v1848_v48 = vpop.f32.mrb[9].mxu0  ;;  %v9189_v50 = vmax.f32 %v2065_v59, %v2151_v39  ;;  %v2157_v37 = vsel %vm946_vm4, %v2154_v11, %v2156_v44 }
 0x2f7   :  { %v2155_v35 = vsel %vm946_vm4, %v2152_v24, %v2154_v11  ;;  %v2030_v1 = vadd.f32 %v9166_v17, %v1848_v48  ;;  %v7160_v5 = vpop.f32.mrb[10].mxu0  ;;  %v2153_v25 = vsel %vm946_vm4, %v2150_v10, %v2152_v24  ;;  %v9195_v20 = vmax.f32 %v2068_v19, %v2157_v37 }
 0x2f8   :  { %v9197_v29 = vmax.f32 %v2067_v16, %v2155_v35  ;;  %v2072_v30 = vmax.f32 %v2032_v41, 0.0  ;;  %v2033_v2 = vadd.f32 %v7160_v5, %v9166_v17  ;;  %v1851_v61 = vpop.f32.mrb[11].mxu0  ;;  %v2303_v46 = vpack.c.bf16 %v9189_v50, %v9177_v3 }
 0x2f9   :  { %v2070_v49 = vmax.f32 %v2030_v1, 0.0  ;;  %v2031_v57 = vadd.f32 %v9166_v17, %v1851_v61  ;;  %v9203_v28 = vmax.f32 %v2066_v6, %v2153_v25 }
 0x2fa   :  { %v2073_v7 = vmax.f32 %v2033_v2, 0.0  ;;  %v2162_v63 = vrot.slane %v2072_v30, 1 }
 0x2fb   :  { %v2158_v12 = vrot.slane %v2070_v49, 1  ;;  %v2071_v47 = vmax.f32 %v2031_v57, 0.0  ;;  %v2304_v18 = vpack.c.bf16 %v9197_v29, %v9203_v28 }
 0x2fc   :  { %v2164_v0 = vrot.slane %v2073_v7, 1 }
 0x2fd   :  { %v2160_v36 = vrot.slane %v2071_v47, 1  ;;  %v7163_v62 = vpop.f32.mrb[12].mxu0  ;;  %v2159_v38 = vsel %vm946_vm4, %v2156_v44, %v2158_v12 }
 0x2fe   :  { %v2036_v51 = vadd.f32 %v7163_v62, %v9166_v17  ;;  %v1864_v58 = vpop.f32.mrb[13].mxu0  ;;  %v9209_v53 = vmax.f32 %v2069_v43, %v2159_v38  ;;  %v2165_v33 = vsel %vm946_vm4, %v2162_v63, %v2164_v0 }
 0x2ff   :  { %v2163_v22 = vsel %vm946_vm4, %v2160_v36, %v2162_v63  ;;  %v2034_v45 = vadd.f32 %v9166_v17, %v1864_v58  ;;  %v7164_v59 = vpop.f32.mrb[14].mxu0  ;;  %v2161_v54 = vsel %vm946_vm4, %v2158_v12, %v2160_v36  ;;  %v9215_v21 = vmax.f32 %v2072_v30, %v2165_v33 }
 0x300   :  { %v9217_v14 = vmax.f32 %v2071_v47, %v2163_v22  ;;  %v2076_v56 = vmax.f32 %v2036_v51, 0.0  ;;  %v2037_v26 = vadd.f32 %v7164_v59, %v9166_v17  ;;  %v1867_v13 = vpop.f32.mrb[15].mxu0  ;;  %v2305_v31 = vpack.c.bf16 %v9209_v53, %v9195_v20 }
 0x301   :  { %v2074_v60 = vmax.f32 %v2034_v45, 0.0  ;;  %v2035_v15 = vadd.f32 %v9166_v17, %v1867_v13  ;;  %v9223_v42 = vmax.f32 %v2070_v49, %v2161_v54 }
 0x302   :  { %v2077_v27 = vmax.f32 %v2037_v26, 0.0  ;;  %v2170_v4 = vrot.slane %v2076_v56, 1 }
 0x303   :  { %v2166_v55 = vrot.slane %v2074_v60, 1  ;;  %v2075_v32 = vmax.f32 %v2035_v15, 0.0  ;;  %v2306_v19 = vpack.c.bf16 %v9217_v14, %v9223_v42 }
 0x304   :  { %v2172_v34 = vrot.slane %v2077_v27, 1 }
 0x305   :  { %v2168_v6 = vrot.slane %v2075_v32, 1  ;;  %v7167_v9 = vpop.f32.mrb[16].mxu0  ;;  %v2167_v43 = vsel %vm946_vm4, %v2164_v0, %v2166_v55 }
 0x306   :  { %v2040_v10 = vadd.f32 %v7167_v9, %v9166_v17  ;;  %v1880_v16 = vpop.f32.mrb[17].mxu0  ;;  %v9229_v11 = vmax.f32 %v2073_v7, %v2167_v43  ;;  %v2173_v44 = vsel %vm946_vm4, %v2170_v4, %v2172_v34 }
 0x307   :  { %v2171_v24 = vsel %vm946_vm4, %v2168_v6, %v2170_v4  ;;  %v2038_v40 = vadd.f32 %v9166_v17, %v1880_v16  ;;  %v7168_v39 = vpop.f32.mrb[18].mxu0  ;;  %v2169_v41 = vsel %vm946_vm4, %v2166_v55, %v2168_v6  ;;  %v9235_v48 = vmax.f32 %v2076_v56, %v2173_v44 }
 0x308   :  { %v9237_v37 = vmax.f32 %v2075_v32, %v2171_v24  ;;  %v2080_v35 = vmax.f32 %v2040_v10, 0.0  ;;  %v2041_v1 = vadd.f32 %v7168_v39, %v9166_v17  ;;  %v1883_v5 = vpop.f32.mrb[19].mxu0  ;;  %v2307_v25 = vpack.c.bf16 %v9229_v11, %v9215_v21 }
 0x309   :  { %v2078_v30 = vmax.f32 %v2038_v40, 0.0  ;;  %v2039_v2 = vadd.f32 %v9166_v17, %v1883_v5  ;;  %v9243_v61 = vmax.f32 %v2074_v60, %v2169_v41 }
 0x30a   :  { %v2081_v49 = vmax.f32 %v2041_v1, 0.0  ;;  %v2178_v47 = vrot.slane %v2080_v35, 1 }
 0x30b   :  { %v2174_v57 = vrot.slane %v2078_v30, 1  ;;  %v2079_v7 = vmax.f32 %v2039_v2, 0.0  ;;  %v2308_v12 = vpack.c.bf16 %v9237_v37, %v9243_v61  ;;  %v7665_v61 = vld [vmem:[#allocation13 + $0x1c] ss:$12 sps:$4 sm:$0xff]  }
 0x30c   :  { %v2180_v63 = vrot.slane %v2081_v49, 1 }
 0x30d   :  { %v2176_v0 = vrot.slane %v2079_v7, 1  ;;  %v7171_v36 = vpop.f32.mrb[20].mxu0  ;;  %v2175_v62 = vsel %vm946_vm4, %v2172_v34, %v2174_v57 }
 0x30e   :  { %v2044_v38 = vadd.f32 %v7171_v36, %v9166_v17  ;;  %v1896_v51 = vpop.f32.mrb[21].mxu0  ;;  %v2181_v58 = vsel %vm946_vm4, %v2178_v47, %v2180_v63  ;;  %v9250_v33 = vmax.f32 %v2077_v27, %v2175_v62 }
 0x30f   :  { %v2042_v22 = vadd.f32 %v9166_v17, %v1896_v51  ;;  %v7172_v45 = vpop.f32.mrb[22].mxu0  ;;  %v2177_v59 = vsel %vm946_vm4, %v2174_v57, %v2176_v0  ;;  %v2179_v54 = vsel %vm946_vm4, %v2176_v0, %v2178_v47  ;;  %v2280_v56 = vmax.f32 %v2080_v35, %v2181_v58 }
 0x310   :  { %v2084_v26 = vmax.f32 %v2044_v38, 0.0  ;;  %v2045_v13 = vadd.f32 %v7172_v45, %v9166_v17  ;;  %v1899_v60 = vpop.f32.mrb[23].mxu0  ;;  %v2278_v15 = vmax.f32 %v2078_v30, %v2177_v59  ;;  %v2279_v55 = vmax.f32 %v2079_v7, %v2179_v54 }
 0x311   :  { %v2082_v32 = vmax.f32 %v2042_v22, 0.0  ;;  %v2043_v4 = vadd.f32 %v9166_v17, %v1899_v60  ;;  %v2309_v27 = vpack.c.bf16 %v9250_v33, %v9235_v48 }
 0x312   :  { %v2085_v34 = vmax.f32 %v2045_v13, 0.0  ;;  %v2310_v6 = vpack.c.bf16 %v2279_v55, %v2278_v15  ;;  %v2186_v10 = vrot.slane %v2084_v26, 1 }
 0x313   :  { %v2182_v9 = vrot.slane %v2082_v32, 1  ;;  %v2083_v43 = vmax.f32 %v2043_v4, 0.0 }
 0x314   :  { %v2188_v16 = vrot.slane %v2085_v34, 1  ;;  %6791 = vmatprep.subr.bf16.mxu1 %v2310_v6 }
 0x315   :  { %v2184_v44 = vrot.slane %v2083_v43, 1  ;;  %v7175_v24 = vpop.f32.mrb[24].mxu0  ;;  %6792 = vmatpush3.bf16.msra.mxu1 %v2302_v23  ;;  %v2183_v40 = vsel %vm946_vm4, %v2180_v63, %v2182_v9 }
 0x316   :  { %v2048_v39 = vadd.f32 %v7175_v24, %v9166_v17  ;;  %v1912_v41 = vpop.f32.mrb[25].mxu0  ;;  %v2281_v35 = vmax.f32 %v2081_v49, %v2183_v40  ;;  %v2189_v1 = vsel %vm946_vm4, %v2186_v10, %v2188_v16 }
 0x317   :  { %v2187_v5 = vsel %vm946_vm4, %v2184_v44, %v2186_v10  ;;  %v2046_v30 = vadd.f32 %v9166_v17, %v1912_v41  ;;  %v7176_v2 = vpop.f32.mrb[26].mxu0  ;;  %v2185_v57 = vsel %vm946_vm4, %v2182_v9, %v2184_v44  ;;  %v2284_v7 = vmax.f32 %v2084_v26, %v2189_v1 }
 0x318   :  { %v2283_v47 = vmax.f32 %v2083_v43, %v2187_v5  ;;  %v2088_v0 = vmax.f32 %v2048_v39, 0.0  ;;  %v2049_v8 = vadd.f32 %v7176_v2, %v9166_v17  ;;  %v1915_v52 = vpop.f32.mrb[27].mxu0  ;;  %v2311_v23 = vpack.c.bf16 %v2281_v35, %v2280_v56 }
 0x319   :  { %v2086_v63 = vmax.f32 %v2046_v30, 0.0  ;;  %v2047_v36 = vadd.f32 %v9166_v17, %v1915_v52  ;;  %v2282_v49 = vmax.f32 %v2082_v32, %v2185_v57 }
 0x31a   :  { %v2089_v62 = vmax.f32 %v2049_v8, 0.0  ;;  %6793 = vmatprep.subr.bf16.mxu1 %v2311_v23  ;;  %v2194_v22 = vrot.slane %v2088_v0, 1 }
 0x31b   :  { %v2190_v38 = vrot.slane %v2086_v63, 1  ;;  %v2087_v51 = vmax.f32 %v2047_v36, 0.0  ;;  %6794 = vmatpush3.bf16.msra.mxu1 %v2303_v46  ;;  %v2312_v58 = vpack.c.bf16 %v2283_v47, %v2282_v49 }
 0x31c   :  { %v2196_v45 = vrot.slane %v2089_v62, 1 }
 0x31d   :  { %v2192_v59 = vrot.slane %v2087_v51, 1  ;;  %6795 = vmatprep.subr.bf16.mxu1 %v2312_v58  ;;  %v7179_v54 = vpop.f32.mrb[28].mxu0  ;;  %v2191_v56 = vsel %vm946_vm4, %v2188_v16, %v2190_v38 }
 0x31e   :  { %v2052_v26 = vadd.f32 %v7179_v54, %v9166_v17  ;;  %v1928_v13 = vpop.f32.mrb[29].mxu0  ;;  %v2285_v60 = vmax.f32 %v2085_v34, %v2191_v56  ;;  %v2197_v15 = vsel %vm946_vm4, %v2194_v22, %v2196_v45 }
 0x31f   :  { %v2195_v55 = vsel %vm946_vm4, %v2192_v59, %v2194_v22  ;;  %v2050_v32 = vadd.f32 %v9166_v17, %v1928_v13  ;;  %v7180_v3 = vpop.f32.mrb[30].mxu0  ;;  %6796 = vmatpush3.bf16.msra.mxu1 %v2304_v18  ;;  %v2193_v50 = vsel %vm946_vm4, %v2190_v38, %v2192_v59  ;;  %v2288_v46 = vmax.f32 %v2088_v0, %v2197_v15 }
 0x320   :  { %v2287_v4 = vmax.f32 %v2087_v51, %v2195_v55  ;;  %v2092_v6 = vmax.f32 %v2052_v26, 0.0  ;;  %v2053_v9 = vadd.f32 %v7180_v3, %v9166_v17  ;;  %v1931_v43 = vpop.f32.mrb[31].mxu0  ;;  %v2313_v34 = vpack.c.bf16 %v2285_v60, %v2284_v7 }
 0x321   :  { %v2090_v10 = vmax.f32 %v2050_v32, 0.0  ;;  %v2051_v16 = vadd.f32 %v9166_v17, %v1931_v43  ;;  %v2286_v44 = vmax.f32 %v2086_v63, %v2193_v50 }
 0x322   :  { %v2093_v24 = vmax.f32 %v2053_v9, 0.0  ;;  %6797 = vmatprep.subr.bf16.mxu1 %v2313_v34  ;;  %v2202_v28 = vrot.slane %v2092_v6, 1  ;;  %v7662_v34 = vld [vmem:[#allocation13] ss:$12 sps:$4 sm:$0xff]  }
 0x323   :  { %v2198_v40 = vrot.slane %v2090_v10, 1  ;;  %v2091_v39 = vmax.f32 %v2051_v16, 0.0  ;;  %6798 = vmatpush3.bf16.msra.mxu1 %v2305_v31  ;;  %v2314_v29 = vpack.c.bf16 %v2287_v4, %v2286_v44 }
 0x324   :  { %v2204_v18 = vrot.slane %v2093_v24, 1 }
 0x325   :  { %v2200_v41 = vrot.slane %v2091_v39, 1  ;;  %6799 = vmatprep.subr.bf16.mxu1 %v2314_v29  ;;  %v7183_v35 = vpop.f32.mrb[32].mxu0  ;;  %v2199_v1 = vsel %vm946_vm4, %v2196_v45, %v2198_v40 }
 0x326   :  { %v2056_v5 = vadd.f32 %v7183_v35, %v9166_v17  ;;  %v1944_v30 = vpop.f32.mrb[33].mxu0  ;;  %v2289_v2 = vmax.f32 %v2089_v62, %v2199_v1  ;;  %v2205_v57 = vsel %vm946_vm4, %v2202_v28, %v2204_v18  ;;  %v8295_v35 = vmov 65535  }
 0x327   :  { %v2203_v7 = vsel %vm946_vm4, %v2200_v41, %v2202_v28  ;;  %v2054_v47 = vadd.f32 %v9166_v17, %v1944_v30  ;;  %v7184_v20 = vpop.f32.mrb[34].mxu0  ;;  %6800 = vmatpush3.bf16.msra.mxu1 %v2306_v19  ;;  %v2201_v53 = vsel %vm946_vm4, %v2198_v40, %v2200_v41  ;;  %v2292_v31 = vmax.f32 %v2092_v6, %v2205_v57 }
 0x328   :  { %v2291_v0 = vmax.f32 %v2091_v39, %v2203_v7  ;;  %v2096_v8 = vmax.f32 %v2056_v5, 0.0  ;;  %v2057_v52 = vadd.f32 %v7184_v20, %v9166_v17  ;;  %v1947_v23 = vpop.f32.mrb[35].mxu0  ;;  %v2315_v63 = vpack.c.bf16 %v2289_v2, %v2288_v46  ;;  %v7667_v2 = vld [vmem:[#allocation13 + $0x18] ss:$12 sps:$4 sm:$0xff]   ;;  %v7668_v7 = vld [vmem:[#allocation13 + $0x34] ss:$12 sps:$4 sm:$0xff]  }
 0x329   :  { %v2094_v36 = vmax.f32 %v2054_v47, 0.0  ;;  %v2055_v49 = vadd.f32 %v9166_v17, %v1947_v23  ;;  %v2290_v62 = vmax.f32 %v2090_v10, %v2201_v53  ;;  %v2544_v1 = vsel %vm2543_vm5, 4294967295, %v8295_v35  ;;  %v7670_v20 = vld [vmem:[#allocation13 + $0x30] ss:$12 sps:$4 sm:$0xff]   ;;  %v7671_v53 = vld [vmem:[#allocation13 + $0x4c] ss:$12 sps:$4 sm:$0xff]  }
 0x32a   :  { %v2097_v38 = vmax.f32 %v2057_v52, 0.0  ;;  %6801 = vmatprep.subr.bf16.mxu1 %v2315_v63  ;;  %v2210_v42 = vrot.slane %v2096_v8, 1  ;;  %v2545_v57 = vsel %vm485_vm0, %v2544_v1, 0  ;;  %v7677_v52 = vld [vmem:[#allocation13 + $0x7c] ss:$12 sps:$4 sm:$0xff]  }
 0x32b   :  { %v2206_v51 = vrot.slane %v2094_v36, 1  ;;  %v2095_v58 = vmax.f32 %v2055_v49, 0.0  ;;  %6802 = vmatpush3.bf16.msra.mxu1 %v2307_v25  ;;  %v2316_v14 = vpack.c.bf16 %v2291_v0, %v2290_v62  ;;  %v7674_v0 = vld [vmem:[#allocation13 + $0x64] ss:$12 sps:$4 sm:$0xff]   ;;  %v7680_v63 = vld [vmem:[#allocation13 + $0x94] ss:$12 sps:$4 sm:$0xff]  }
 0x32c   :  { %v2212_v19 = vrot.slane %v2097_v38, 1  ;;  %v7679_v23 = vld [vmem:[#allocation13 + $0x78] ss:$12 sps:$4 sm:$0xff]   ;;  %v7685_v62 = vld [vmem:[#allocation13 + $0xa8] ss:$12 sps:$4 sm:$0xff]  }
 0x32d   :  { %v2208_v22 = vrot.slane %v2095_v58, 1  ;;  %6803 = vmatprep.subr.bf16.mxu1 %v2316_v14  ;;  %v7187_v45 = vpop.f32.mrb[36].mxu0  ;;  %v2207_v59 = vsel %vm946_vm4, %v2204_v18, %v2206_v51  ;;  %v7683_v49 = vld [vmem:[#allocation13 + $0xac] ss:$12 sps:$4 sm:$0xff]  }
 0x32e   :  { %v2060_v54 = vadd.f32 %v7187_v45, %v9166_v17  ;;  %v1960_v56 = vpop.f32.mrb[37].mxu0  ;;  %v2293_v26 = vmax.f32 %v2093_v24, %v2207_v59  ;;  %v2213_v13 = vsel %vm946_vm4, %v2210_v42, %v2212_v19  ;;  %v7691_v14 = vld [vmem:[#allocation13 + $0xd8] ss:$12 sps:$4 sm:$0xff]   ;;  %v7695_v45 = vld [vmem:[#allocation13 + $0x50] ss:$12 sps:$4 sm:$0xff]  }
 0x32f   :  { %v2211_v60 = vsel %vm946_vm4, %v2208_v22, %v2210_v42  ;;  %v2058_v15 = vadd.f32 %v9166_v17, %v1960_v56  ;;  %v7188_v21 = vpop.f32.mrb[38].mxu0  ;;  %6804 = vmatpush3.bf16.msra.mxu1 %v2308_v12  ;;  %v2209_v11 = vsel %vm946_vm4, %v2206_v51, %v2208_v22  ;;  %v2296_v25 = vmax.f32 %v2096_v8, %v2213_v13  ;;  %v7676_v8 = vld [vmem:[#allocation13 + $0x60] ss:$12 sps:$4 sm:$0xff]   ;;  %v7692_v42 = vld [vmem:[#allocation13 + $0x8] ss:$12 sps:$4 sm:$0xff]  }
 0x330   :  { %v2295_v55 = vmax.f32 %v2095_v58, %v2211_v60  ;;  %v2100_v32 = vmax.f32 %v2060_v54, 0.0  ;;  %v2061_v3 = vadd.f32 %v7188_v21, %v9166_v17  ;;  %v1963_v50 = vpop.f32.mrb[39].mxu0  ;;  %v2317_v46 = vpack.c.bf16 %v2293_v26, %v2292_v31  ;;  %v7673_v31 = vld [vmem:[#allocation13 + $0x48] ss:$12 sps:$4 sm:$0xff]   ;;  %v7688_v51 = vld [vmem:[#allocation13 + $0xc0] ss:$12 sps:$4 sm:$0xff]  }
 0x331   :  { %v2098_v4 = vmax.f32 %v2058_v15, 0.0  ;;  %v2059_v6 = vadd.f32 %v9166_v17, %v1963_v50  ;;  %v2294_v9 = vmax.f32 %v2094_v36, %v2209_v11  ;;  %v7682_v36 = vld [vmem:[#allocation13 + $0x90] ss:$12 sps:$4 sm:$0xff]   ;;  %v7694_v22 = vld [vmem:[#allocation13 + $0x38] ss:$12 sps:$4 sm:$0xff]  }
 0x332   :  { %v2101_v43 = vmax.f32 %v2061_v3, 0.0  ;;  %6805 = vmatprep.subr.bf16.mxu1 %v2317_v46  ;;  %v2218_v12 = vrot.slane %v2100_v32, 1  ;;  %v7689_v58 = vld [vmem:[#allocation13 + $0xdc] ss:$12 sps:$4 sm:$0xff]   ;;  %v7697_v54 = vld [vmem:[#allocation13 + $0x80] ss:$12 sps:$4 sm:$0xff]  }
 0x333   :  { %v2214_v10 = vrot.slane %v2098_v4, 1  ;;  %v2099_v16 = vmax.f32 %v2059_v6, 0.0  ;;  %6806 = vmatpush3.bf16.msra.mxu1 %v2309_v27  ;;  %v2318_v37 = vpack.c.bf16 %v2295_v55, %v2294_v9  ;;  %v7696_v59 = vld [vmem:[#allocation13 + $0x68] ss:$12 sps:$4 sm:$0xff]   ;;  %v7698_v56 = vld [vmem:[#allocation13 + $0x98] ss:$12 sps:$4 sm:$0xff]  }
 0x334   :  { %v2220_v44 = vrot.slane %v2101_v43, 1  ;;  %v7699_v26 = vld [vmem:[#allocation13 + $0xb0] ss:$12 sps:$4 sm:$0xff]   ;;  %v7700_v13 = vld [vmem:[#allocation13 + $0xc8] ss:$12 sps:$4 sm:$0xff]  }
 0x335   :  { %v2216_v24 = vrot.slane %v2099_v16, 1  ;;  %7189 = vmatprep.subr.bf16.mxu1 %v2318_v37  ;;  %v2215_v40 = vsel %vm946_vm4, %v2212_v19, %v2214_v10  ;;  %v7693_v19 = vld [vmem:[#allocation13 + $0x20] ss:$12 sps:$4 sm:$0xff]   ;;  %v9340_v11 = vld [vmem:[%s10008_s29] sm:$0xff]  }
 0x336   :  { %v2221_v17 = vsel %vm946_vm4, %v2218_v12, %v2220_v44  ;;  %v2301_v39 = vmax.f32 %v2101_v43, %v2220_v44  ;;  %2582 = vmatmul.mubr.bf16.vlgmr.msra.gmra.mrb[0].mxu1 %v7662_v34  ;;  %v2297_v29 = vmax.f32 %v2097_v38, %v2215_v40  ;;  %v7686_v38 = vld [vmem:[#allocation13 + $0xc4] ss:$12 sps:$4 sm:$0xff]   ;;  %v7701_v60 = vld [vmem:[#allocation13 + $0xe0] ss:$12 sps:$4 sm:$0xff]  }
 0x337   :  { %v2300_v28 = vmax.f32 %v2100_v32, %v2221_v17  ;;  %v2219_v18 = vsel %vm946_vm4, %v2216_v24, %v2218_v12  ;;  %7190 = vmatpush3.bf16.msra.mxu1 %v2318_v37  ;;  %v2217_v48 = vsel %vm946_vm4, %v2214_v10, %v2216_v24  ;;  %2589 = vmatprep.mubr.bf16.mxu1 %v7665_v61  ;;  %v7702_v15 = vld [vmem:[%s10008_s29 + $0x10] sm:$0xff]   ;;  %v7703_v21 = vld [vmem:[%s10008_s29 + $0x18] sm:$0xff]  }
 0x338   :  { %v2299_v33 = vmax.f32 %v2099_v16, %v2219_v18  ;;  %v2319_v27 = vpack.c.bf16 %v2297_v29, %v2296_v25  ;;  %v2298_v41 = vmax.f32 %v2098_v4, %v2217_v48 }
 0x339   :  { %v2321_v5 = vpack.c.bf16 %v2301_v39, %v2300_v28 }
 0x33a   :  { %7191 = vmatprep.subr.bf16.mxu1 %v2319_v27  ;;  %v2320_v30 = vpack.c.bf16 %v2299_v33, %v2298_v41 }
 0x33b   :  { %7192 = vmatpush3.bf16.msra.mxu1 %v2319_v27  ;;  %v2547_v47 = vand.u32 %v2545_v57, %v2321_v5 }
 0x33c   :  { %7193 = vmatprep.subr.bf16.mxu1 %v2320_v30 }
 0x33e   :  { %2590 = vmatmul.mubr.bf16.gmra.mrb[4].mxu1 %v7667_v2 }
 0x33f   :  { %7194 = vmatpush3.bf16.msra.mxu1 %v2320_v30  ;;  %2597 = vmatprep.mubr.bf16.mxu1 %v7668_v7 }
 0x340   :  { %7195 = vmatprep.subr.bf16.mxu1 %v2547_v47 }
 0x343   :  { %7196 = vmatpush3.bf16.msra.mxu1 %v2547_v47 }
 0x344   :  { %7217 = vmatprep.subr.bf16.mxu1 %v7702_v15 }
 0x346   :  { %2598 = vmatmul.mubr.bf16.gmra.mrb[8].mxu1 %v7670_v20 }
 0x347   :  { %2605 = vmatprep.mubr.bf16.mxu1 %v7671_v53 }
 0x34e   :  { %2606 = vmatmul.mubr.bf16.gmra.mrb[12].mxu1 %v7673_v31 }
 0x34f   :  { %2613 = vmatprep.mubr.bf16.mxu1 %v7674_v0 }
 0x356   :  { %2614 = vmatmul.mubr.bf16.gmra.mrb[16].mxu1 %v7676_v8 }
 0x357   :  { %2621 = vmatprep.mubr.bf16.mxu1 %v7677_v52 }
 0x35e   :  { %2622 = vmatmul.mubr.bf16.gmra.mrb[20].mxu1 %v7679_v23 }
 0x35f   :  { %2629 = vmatprep.mubr.bf16.mxu1 %v7680_v63 }
 0x366   :  { %2630 = vmatmul.mubr.bf16.gmra.mrb[24].mxu1 %v7682_v36 }
 0x367   :  { %2637 = vmatprep.mubr.bf16.mxu1 %v7683_v49 }
 0x36e   :  { %2638 = vmatmul.mubr.bf16.gmra.mrb[28].mxu1 %v7685_v62 }
 0x36f   :  { %2645 = vmatprep.mubr.bf16.mxu1 %v7686_v38 }
 0x376   :  { %2646 = vmatmul.mubr.bf16.gmra.mrb[32].mxu1 %v7688_v51 }
 0x377   :  { %2653 = vmatprep.mubr.bf16.mxu1 %v7689_v58 }
 0x37e   :  { %2654 = vmatmul.mubr.bf16.gmra.mrb[36].mxu1 %v7691_v14 }
 0x37f   :  { %7197 = vmatprep.mubr.msk.bf16.mxu1 %vm2512_vm6, %v7692_v42 }
 0x386   :  { %7198 = vmatmul.mubr.msk.bf16.vlgmr.msra.gmra.mrb[40].mxu1 %vm2512_vm6, %v7693_v19 }
 0x387   :  { %7201 = vmatprep.mubr.msk.bf16.mxu1 %vm2512_vm6, %v7694_v22  ;;  %7218 = vmatpush3.bf16.msra.mxu1 %v7702_v15 }
 0x388   :  { %7219 = vmatprep.subr.bf16.mxu1 %v7703_v21 }
 0x38b   :  { %7220 = vmatpush3.bf16.msra.mxu1 %v7703_v21 }
 0x38c   :  { %7241 = vmatprep.subr.bf16.mxu1 %v9340_v11 }
 0x38e   :  { %7202 = vmatmul.mubr.msk.bf16.gmra.mrb[44].mxu1 %vm2512_vm6, %v7695_v45 }
 0x38f   :  { %7205 = vmatprep.mubr.msk.bf16.mxu1 %vm2512_vm6, %v7696_v59 }
 0x396   :  { %7206 = vmatmul.mubr.msk.bf16.gmra.mrb[48].mxu1 %vm2512_vm6, %v7697_v54 }
 0x397   :  { %7209 = vmatprep.mubr.msk.bf16.mxu1 %vm2512_vm6, %v7698_v56 }
 0x39e   :  { %7210 = vmatmul.mubr.msk.bf16.gmra.mrb[52].mxu1 %vm2512_vm6, %v7699_v26 }
 0x39f   :  { %7213 = vmatprep.mubr.msk.bf16.mxu1 %vm2512_vm6, %v7700_v13 }
 0x3a6   :  { %7214 = vmatmul.mubr.msk.bf16.gmra.mrb[56].mxu1 %vm2512_vm6, %v7701_v60 }
 0x409   :  { %v6807_v25 = vpop.f32.mrb[0].mxu1 }
 0x40a   :  { %v6808_v55 = vpop.f32.mrb[1].mxu1 }
 0x40b   :  { %v6809_v32 = vadd.f32 %v6808_v55, %v6807_v25  ;;  %v6810_v3 = vpop.f32.mrb[2].mxu1 }
 0x40c   :  { %v6811_v50 = vpop.f32.mrb[3].mxu1 }
 0x40d   :  { %v6812_v46 = vadd.f32 %v6811_v50, %v6810_v3 }
 0x411   :  { %v6813_v4 = vpop.f32.mrb[4].mxu1 }
 0x412   :  { %v6814_v6 = vpop.f32.mrb[5].mxu1 }
 0x413   :  { %v6815_v9 = vadd.f32 %v6814_v6, %v6813_v4  ;;  %v6816_v43 = vpop.f32.mrb[6].mxu1 }
 0x414   :  { %v6817_v34 = vpop.f32.mrb[7].mxu1 }
 0x415   :  { %v6818_v10 = vadd.f32 %v6817_v34, %v6816_v43 }
 0x419   :  { %v6819_v16 = vpop.f32.mrb[8].mxu1 }
 0x41a   :  { %v6820_v37 = vpop.f32.mrb[9].mxu1 }
 0x41b   :  { %v9343_v61 = vadd.f32 %v6820_v37, %v6819_v16  ;;  %v6822_v12 = vpop.f32.mrb[10].mxu1 }
 0x41c   :  { %v6823_v44 = vpop.f32.mrb[11].mxu1 }
 0x41d   :  { %v9345_v24 = vadd.f32 %v6823_v44, %v6822_v12 }
 0x421   :  { %v6825_v40 = vpop.f32.mrb[12].mxu1 }
 0x422   :  { %v6826_v17 = vpop.f32.mrb[13].mxu1 }
 0x423   :  { %v6827_v39 = vadd.f32 %v6826_v17, %v6825_v40  ;;  %v6828_v29 = vpop.f32.mrb[14].mxu1 }
 0x424   :  { %v6829_v28 = vpop.f32.mrb[15].mxu1 }
 0x425   :  { %v6830_v18 = vadd.f32 %v6829_v28, %v6828_v29 }
 0x429   :  { %v6831_v48 = vpop.f32.mrb[16].mxu1 }
 0x42a   :  { %v6832_v33 = vpop.f32.mrb[17].mxu1 }
 0x42b   :  { %v9347_v27 = vadd.f32 %v6832_v33, %v6831_v48  ;;  %v6834_v41 = vpop.f32.mrb[18].mxu1 }
 0x42c   :  { %v6835_v1 = vpop.f32.mrb[19].mxu1 }
 0x42d   :  { %v9349_v5 = vadd.f32 %v6835_v1, %v6834_v41 }
 0x431   :  { %v6837_v30 = vpop.f32.mrb[20].mxu1 }
 0x432   :  { %v6838_v2 = vpop.f32.mrb[21].mxu1 }
 0x433   :  { %v9351_v57 = vadd.f32 %v6838_v2, %v6837_v30  ;;  %v6840_v7 = vpop.f32.mrb[22].mxu1 }
 0x434   :  { %v6841_v47 = vpop.f32.mrb[23].mxu1 }
 0x435   :  { %v9353_v20 = vadd.f32 %v6841_v47, %v6840_v7 }
 0x439   :  { %v6843_v53 = vpop.f32.mrb[24].mxu1 }
 0x43a   :  { %v6844_v31 = vpop.f32.mrb[25].mxu1 }
 0x43b   :  { %v9355_v0 = vadd.f32 %v6844_v31, %v6843_v53  ;;  %v6846_v8 = vpop.f32.mrb[26].mxu1 }
 0x43c   :  { %v6847_v52 = vpop.f32.mrb[27].mxu1 }
 0x43d   :  { %v9357_v23 = vadd.f32 %v6847_v52, %v6846_v8 }
 0x441   :  { %v6849_v63 = vpop.f32.mrb[28].mxu1 }
 0x442   :  { %v6850_v36 = vpop.f32.mrb[29].mxu1 }
 0x443   :  { %v9359_v49 = vadd.f32 %v6850_v36, %v6849_v63  ;;  %v6852_v62 = vpop.f32.mrb[30].mxu1 }
 0x444   :  { %v6853_v38 = vpop.f32.mrb[31].mxu1 }
 0x445   :  { %v9361_v51 = vadd.f32 %v6853_v38, %v6852_v62 }
 0x449   :  { %v6855_v58 = vpop.f32.mrb[32].mxu1 }
 0x44a   :  { %v6856_v14 = vpop.f32.mrb[33].mxu1 }
 0x44b   :  { %v9363_v42 = vadd.f32 %v6856_v14, %v6855_v58  ;;  %v6858_v19 = vpop.f32.mrb[34].mxu1 }
 0x44c   :  { %v6859_v22 = vpop.f32.mrb[35].mxu1 }
 0x44d   :  { %v9365_v45 = vadd.f32 %v6859_v22, %v6858_v19 }
 0x451   :  { %v6861_v59 = vpop.f32.mrb[36].mxu1 }
 0x452   :  { %v6862_v54 = vpop.f32.mrb[37].mxu1 }
 0x453   :  { %v9367_v56 = vadd.f32 %v6862_v54, %v6861_v59  ;;  %v6864_v26 = vpop.f32.mrb[38].mxu1 }
 0x454   :  { %v6865_v13 = vpop.f32.mrb[39].mxu1 }
 0x455   :  { %v9369_v60 = vadd.f32 %v6865_v13, %v6864_v26 }
 0x459   :  { %v7199_v15 = vpop.f32.mrb[40].mxu1 }
 0x45a   :  { %v2705_v21 = vadd.f32 %v7199_v15, %v6815_v9  ;;  %v2696_v25 = vpop.f32.mrb[41].mxu1 }
 0x45b   :  { %v2697_v55 = vadd.f32 %v6809_v32, %v2696_v25  ;;  %v7200_v3 = vpop.f32.mrb[42].mxu1 }
 0x45c   :  { %v2708_v50 = vadd.f32 %v7200_v3, %v6818_v10  ;;  %v2699_v4 = vpop.f32.mrb[43].mxu1 }
 0x45d   :  { %v2700_v6 = vadd.f32 %v6812_v46, %v2699_v4 }
 0x45e   :  { %v9371_v43 = vpack.c.bf16 %v2708_v50, %v2705_v21 }
 0x45f   :  { %v9373_v34 = vpack.c.bf16 %v2700_v6, %v2697_v55 }
 0x460   :  { %v3190_v16 = vrot.slane %v9371_v43, 1  ;;  %v2802_v44 = vshll.u32 %v9371_v43, 16  ;;  %v2806_v7 = vshrl.u32 %v9371_v43, 16 }
 0x461   :  { %v7203_v37 = vpop.f32.mrb[44].mxu1  ;;  %v2797_v12 = vshll.u32 %v9373_v34, 16  ;;  %v3189_v40 = vrot.slane %v9373_v34, 1  ;;  %v2795_v46 = vshrl.u32 %v9373_v34, 16 }
 0x462   :  { %v2721_v9 = vadd.f32 %v7203_v37, %v6827_v39  ;;  %v2712_v17 = vpop.f32.mrb[45].mxu1  ;;  %v2804_v30 = vrot.slane %v2802_v44, 1 }
 0x463   :  { %v2713_v32 = vadd.f32 %v9343_v61, %v2712_v17  ;;  %v7204_v10 = vpop.f32.mrb[46].mxu1  ;;  %v2799_v29 = vrot.slane %v2797_v12, 1  ;;  %v9382_v28 = vsel %vm946_vm4, %v3189_v40, %v3190_v16 }
 0x464   :  { %v2724_v48 = vadd.f32 %v7204_v10, %v6830_v18  ;;  %v2715_v33 = vpop.f32.mrb[47].mxu1  ;;  %v2808_v8 = vor.u32 %v2806_v7, %v2804_v30 }
 0x465   :  { %v2716_v41 = vadd.f32 %v9345_v24, %v2715_v33  ;;  %v2800_v1 = vor.u32 %v2799_v29, %v2795_v46 }
 0x466   :  { %v9385_v2 = vpack.c.bf16 %v2724_v48, %v2721_v9 }
 0x467   :  { %v9387_v39 = vpack.c.bf16 %v2716_v41, %v2713_v32  ;;  %v2805_v61 = vsel %vm259_vm1, %v2800_v1, %v2804_v30 }
 0x468   :  { %7221 = vmatprep.mubr.msk.bf16.mxu1 %vm2885_vm7, %v2805_v61  ;;  %v3194_v47 = vrot.slane %v9385_v2, 1  ;;  %v2818_v31 = vshll.u32 %v9385_v2, 16 }
 0x469   :  { %v2810_v18 = vshll.u32 %v9387_v39, 16  ;;  %v3192_v53 = vrot.slane %v9387_v39, 1  ;;  %v7207_v24 = vpop.f32.mrb[48].mxu1  ;;  %v2814_v36 = vshrl.u32 %v9387_v39, 16 }
 0x46a   :  { %v2737_v52 = vadd.f32 %v7207_v24, %v9351_v57  ;;  %v2728_v63 = vpop.f32.mrb[49].mxu1  ;;  %v7705_v57 = vld [vmem:[%s10008_s29 + $0x8] sm:$0xff]  }
 0x46b   :  { %v2812_v62 = vrot.slane %v2810_v18, 1  ;;  %v2729_v38 = vadd.f32 %v9347_v27, %v2728_v63  ;;  %v7208_v58 = vpop.f32.mrb[50].mxu1  ;;  %v9400_v14 = vsel %vm946_vm4, %v3190_v16, %v3192_v53  ;;  %v9403_v19 = vsel %vm946_vm4, %v3192_v53, %v3194_v47 }
 0x46c   :  { %v2740_v22 = vadd.f32 %v7208_v58, %v9353_v20  ;;  %v2731_v59 = vpop.f32.mrb[51].mxu1  ;;  %v2820_v27 = vrot.slane %v2818_v31, 1  ;;  %v2822_v20 = vshrl.u32 %v9385_v2, 16 }
 0x46d   :  { %v2732_v54 = vadd.f32 %v9349_v5, %v2731_v59  ;;  %v2813_v26 = vsel %vm259_vm1, %v2808_v8, %v2812_v62  ;;  %v2816_v13 = vor.u32 %v2814_v36, %v2812_v62  ;;  %v9423_v5 = vld [vmem:[%s10008_s29 + $0x20] sm:$0xff]  }
 0x46e   :  { %v9411_v15 = vpack.c.bf16 %v2740_v22, %v2737_v52  ;;  %7222 = vmatmul.mubr.msk.bf16.vlgmr.msra.gmra.mrb[60].mxu1 %vm2885_vm7, %v2813_v26  ;;  %v2824_v37 = vor.u32 %v2822_v20, %v2820_v27 }
 0x46f   :  { %v9414_v21 = vpack.c.bf16 %v2732_v54, %v2729_v38  ;;  %v2821_v25 = vsel %vm259_vm1, %v2816_v13, %v2820_v27  ;;  %7242 = vmatpush3.bf16.msra.mxu1 %v9340_v11 }
 0x470   :  { %7225 = vmatprep.mubr.msk.bf16.mxu1 %vm2885_vm7, %v2821_v25  ;;  %7243 = vmatprep.subr.bf16.mxu1 %v7705_v57  ;;  %v3198_v55 = vrot.slane %v9411_v15, 1  ;;  %v2834_v4 = vshll.u32 %v9411_v15, 16  ;;  %v2838_v30 = vshrl.u32 %v9411_v15, 16 }
 0x471   :  { %v7211_v3 = vpop.f32.mrb[52].mxu1  ;;  %v2826_v50 = vshll.u32 %v9414_v21, 16  ;;  %v3196_v6 = vrot.slane %v9414_v21, 1  ;;  %v2830_v12 = vshrl.u32 %v9414_v21, 16 }
 0x472   :  { %v2753_v11 = vadd.f32 %v7211_v3, %v9359_v49  ;;  %v2744_v16 = vpop.f32.mrb[53].mxu1 }
 0x473   :  { %v2745_v44 = vadd.f32 %v9355_v0, %v2744_v16  ;;  %v7212_v40 = vpop.f32.mrb[54].mxu1  ;;  %v2828_v9 = vrot.slane %v2826_v50, 1  ;;  %7244 = vmatpush3.bf16.msra.mxu1 %v7705_v57  ;;  %v9433_v17 = vsel %vm946_vm4, %v3194_v47, %v3196_v6  ;;  %v9436_v32 = vsel %vm946_vm4, %v3196_v6, %v3198_v55 }
 0x474   :  { %v2756_v10 = vadd.f32 %v7212_v40, %v9361_v51  ;;  %v2747_v46 = vpop.f32.mrb[55].mxu1  ;;  %7265 = vmatprep.subr.bf16.mxu1 %v9423_v5  ;;  %v2836_v0 = vrot.slane %v2834_v4, 1  ;;  %v7707_v40 = vld [vmem:[%s10008_s29 + $0x28] sm:$0xff]  }
 0x475   :  { %v2748_v49 = vadd.f32 %v9357_v23, %v2747_v46  ;;  %v2829_v29 = vsel %vm259_vm1, %v2824_v37, %v2828_v9  ;;  %v2832_v48 = vor.u32 %v2830_v12, %v2828_v9 }
 0x476   :  { %v2782_v33 = vpack.c.bf16 %v2756_v10, %v2753_v11  ;;  %7226 = vmatmul.mubr.msk.bf16.gmra.mrb[64].mxu1 %vm2885_vm7, %v2829_v29  ;;  %v2840_v24 = vor.u32 %v2838_v30, %v2836_v0 }
 0x477   :  { %v2781_v41 = vpack.c.bf16 %v2748_v49, %v2745_v44  ;;  %v2837_v1 = vsel %vm259_vm1, %v2832_v48, %v2836_v0 }
 0x478   :  { %7229 = vmatprep.mubr.msk.bf16.mxu1 %vm2885_vm7, %v2837_v1  ;;  %v3202_v51 = vrot.slane %v2782_v33, 1  ;;  %v2850_v47 = vshll.u32 %v2782_v33, 16  ;;  %v2854_v13 = vshrl.u32 %v2782_v33, 16 }
 0x479   :  { %v7215_v61 = vpop.f32.mrb[56].mxu1  ;;  %v2842_v7 = vshll.u32 %v2781_v41, 16  ;;  %v3200_v18 = vrot.slane %v2781_v41, 1  ;;  %v2846_v31 = vshrl.u32 %v2781_v41, 16 }
 0x47a   :  { %v2769_v23 = vadd.f32 %v7215_v61, %v9367_v56  ;;  %v2760_v53 = vpop.f32.mrb[57].mxu1  ;;  %v2852_v56 = vrot.slane %v2850_v47, 1 }
 0x47b   :  { %v2761_v8 = vadd.f32 %v9363_v42, %v2760_v53  ;;  %v7216_v52 = vpop.f32.mrb[58].mxu1  ;;  %v2844_v63 = vrot.slane %v2842_v7, 1  ;;  %v3201_v36 = vsel %vm946_vm4, %v3198_v55, %v3200_v18  ;;  %v3203_v62 = vsel %vm946_vm4, %v3200_v18, %v3202_v51 }
 0x47c   :  { %v2772_v38 = vadd.f32 %v7216_v52, %v9369_v60  ;;  %v2763_v58 = vpop.f32.mrb[59].mxu1  ;;  %v2856_v55 = vor.u32 %v2854_v13, %v2852_v56 }
 0x47d   :  { %v2764_v22 = vadd.f32 %v9365_v45, %v2763_v58  ;;  %v2845_v59 = vsel %vm259_vm1, %v2840_v24, %v2844_v63  ;;  %v2848_v57 = vor.u32 %v2846_v31, %v2844_v63 }
 0x47e   :  { %v2784_v54 = vpack.c.bf16 %v2772_v38, %v2769_v23  ;;  %7230 = vmatmul.mubr.msk.bf16.gmra.mrb[68].mxu1 %vm2885_vm7, %v2845_v59 }
 0x47f   :  { %v2783_v26 = vpack.c.bf16 %v2764_v22, %v2761_v8  ;;  %v2853_v42 = vsel %vm259_vm1, %v2848_v57, %v2852_v56 }
 0x480   :  { %7233 = vmatprep.mubr.msk.bf16.mxu1 %vm2885_vm7, %v2853_v42  ;;  %v3206_v27 = vrot.slane %v2784_v54, 1  ;;  %v2866_v20 = vshll.u32 %v2784_v54, 16  ;;  %v2870_v12 = vshrl.u32 %v2784_v54, 16 }
 0x481   :  { %v2858_v25 = vshll.u32 %v2783_v26, 16  ;;  %v3204_v60 = vrot.slane %v2783_v26, 1  ;;  %v2862_v45 = vshrl.u32 %v2783_v26, 16 }
 0x482   :  { %v2868_v16 = vrot.slane %v2866_v20, 1 }
 0x483   :  { %v2860_v3 = vrot.slane %v2858_v25, 1  ;;  %v3205_v50 = vsel %vm946_vm4, %v3202_v51, %v3204_v60  ;;  %v3207_v4 = vsel %vm946_vm4, %v3204_v60, %v3206_v27 }
 0x484   :  { %v2872_v44 = vor.u32 %v2870_v12, %v2868_v16 }
 0x485   :  { %v2861_v6 = vsel %vm259_vm1, %v2856_v55, %v2860_v3  ;;  %v2864_v11 = vor.u32 %v2862_v45, %v2860_v3 }
 0x486   :  { %7234 = vmatmul.mubr.msk.bf16.gmra.mrb[72].mxu1 %vm2885_vm7, %v2861_v6 }
 0x487   :  { %v2869_v37 = vsel %vm259_vm1, %v2864_v11, %v2868_v16 }
 0x488   :  { %7237 = vmatprep.mubr.msk.bf16.mxu1 %vm2885_vm7, %v2869_v37 }
 0x48e   :  { %7238 = vmatmul.mubr.msk.bf16.gmra.mrb[76].mxu1 %vm2885_vm7, %v2872_v44 }
 0x48f   :  { %7245 = vmatprep.mubr.msk.bf16.mxu1 %vm2885_vm7, %v9373_v34  ;;  %v7710_v34 = vld [vmem:[%s9978_s10 + $0x4] ss:$8 sps:$4 sm:$0xff]  }
 0x496   :  { %7246 = vmatmul.mubr.msk.bf16.vlgmr.msra.gmra.mrb[60].mxu1 %vm2885_vm7, %v9371_v43  ;;  %v8296_v43 = vmov 0  }
 0x497   :  { %7249 = vmatprep.mubr.msk.bf16.mxu1 %vm2885_vm7, %v9387_v39  ;;  %7266 = vmatpush3.bf16.msra.mxu1 %v9423_v5 }
 0x498   :  { %7267 = vmatprep.subr.bf16.mxu1 %v7707_v40 }
 0x49b   :  { %7268 = vmatpush3.bf16.msra.mxu1 %v7707_v40 }
 0x49c   :  { %3629 = vmatprep.subr.bf16.mxu1 %v8296_v43 }
 0x49e   :  { %7250 = vmatmul.mubr.msk.bf16.gmra.mrb[64].mxu1 %vm2885_vm7, %v9385_v2 }
 0x49f   :  { %7253 = vmatprep.mubr.msk.bf16.mxu1 %vm2885_vm7, %v9414_v21 }
 0x4a6   :  { %7254 = vmatmul.mubr.msk.bf16.gmra.mrb[68].mxu1 %vm2885_vm7, %v9411_v15 }
 0x4a7   :  { %7257 = vmatprep.mubr.msk.bf16.mxu1 %vm2885_vm7, %v2781_v41 }
 0x4ae   :  { %7258 = vmatmul.mubr.msk.bf16.gmra.mrb[72].mxu1 %vm2885_vm7, %v2782_v33 }
 0x4af   :  { %7261 = vmatprep.mubr.msk.bf16.mxu1 %vm2885_vm7, %v2783_v26 }
 0x4b6   :  { %7262 = vmatmul.mubr.msk.bf16.gmra.mrb[76].mxu1 %vm2885_vm7, %v2784_v54 }
 0x4b7   :  { %7269 = vmatprep.mubr.msk.bf16.mxu1 %vm2885_vm7, %v9382_v28  ;;  %v9503_v28 = vld [vmem:[#allocation5] ss:$0 sm:$0xff] }
 0x4be   :  { %7270 = vmatmul.mubr.msk.bf16.vlgmr.msra.gmra.mrb[60].mxu1 %vm2885_vm7, %v9400_v14 }
 0x4bf   :  { %7273 = vmatprep.mubr.msk.bf16.mxu1 %vm2885_vm7, %v9403_v19 }
 0x4c6   :  { %7274 = vmatmul.mubr.msk.bf16.gmra.mrb[64].mxu1 %vm2885_vm7, %v9433_v17 }
 0x4c7   :  { %7277 = vmatprep.mubr.msk.bf16.mxu1 %vm2885_vm7, %v9436_v32 }
 0x4ce   :  { %7278 = vmatmul.mubr.msk.bf16.gmra.mrb[68].mxu1 %vm2885_vm7, %v3201_v36 }
 0x4cf   :  { %7281 = vmatprep.mubr.msk.bf16.mxu1 %vm2885_vm7, %v3203_v62 }
 0x4d6   :  { %7282 = vmatmul.mubr.msk.bf16.gmra.mrb[72].mxu1 %vm2885_vm7, %v3205_v50 }
 0x4d7   :  { %7285 = vmatprep.mubr.msk.bf16.mxu1 %vm2885_vm7, %v3207_v4 }
 0x4de   :  { %7286 = vmatmul.mubr.msk.bf16.gmra.mrb[76].mxu1 %vm2885_vm7, %v3206_v27 }
 0x4df   :  { %6446 = vmatprep.mubr.msk.bf16.mxu1 %vm3605_vm8, %v7710_v34 }
 0x591   :  { %v7271_v2 = vpop.f32.mrb[60].mxu1 }
 0x592   :  { %v3392_v39 = vadd.f32 %v7271_v2, %v9503_v28  ;;  %v3284_v14 = vpop.f32.mrb[61].mxu1 }
 0x593   :  { %v3390_v19 = vadd.f32 %v9503_v28, %v3284_v14  ;;  %v7272_v15 = vpop.f32.mrb[62].mxu1 }
 0x594   :  { %v3412_v21 = vmax.f32 %v3392_v39, 0.0  ;;  %v3393_v5 = vadd.f32 %v7272_v15, %v9503_v28  ;;  %v3287_v9 = vpop.f32.mrb[63].mxu1 }
 0x595   :  { %v3410_v17 = vmax.f32 %v3390_v19, 0.0  ;;  %v3391_v32 = vadd.f32 %v9503_v28, %v3287_v9 }
 0x596   :  { %v3413_v10 = vmax.f32 %v3393_v5, 0.0  ;;  %v3453_v49 = vrot.slane %v3412_v21, 1 }
 0x597   :  { %v3411_v46 = vmax.f32 %v3391_v32, 0.0  ;;  %v3450_v48 = vrot.slane %v3410_v17, 1 }
 0x598   :  { %v3455_v29 = vrot.slane %v3413_v10, 1 }
 0x599   :  { %v3451_v0 = vrot.slane %v3411_v46, 1  ;;  %v7275_v33 = vpop.f32.mrb[64].mxu1 }
 0x59a   :  { %v3456_v41 = vsel %vm946_vm4, %v3453_v49, %v3455_v29  ;;  %v3396_v1 = vadd.f32 %v7275_v33, %v9503_v28  ;;  %v3300_v30 = vpop.f32.mrb[65].mxu1 }
 0x59b   :  { %v3511_v51 = vmax.f32 %v3412_v21, %v3456_v41  ;;  %v3452_v61 = vsel %vm946_vm4, %v3450_v48, %v3451_v0  ;;  %v3454_v7 = vsel %vm946_vm4, %v3451_v0, %v3453_v49  ;;  %v3394_v47 = vadd.f32 %v9503_v28, %v3300_v30  ;;  %v7276_v18 = vpop.f32.mrb[66].mxu1 }
 0x59c   :  { %v3509_v23 = vmax.f32 %v3410_v17, %v3452_v61  ;;  %v3510_v53 = vmax.f32 %v3411_v46, %v3454_v7  ;;  %v3416_v24 = vmax.f32 %v3396_v1, 0.0  ;;  %v3397_v31 = vadd.f32 %v7276_v18, %v9503_v28  ;;  %v3303_v8 = vpop.f32.mrb[67].mxu1 }
 0x59d   :  { %v3414_v52 = vmax.f32 %v3394_v47, 0.0  ;;  %v3395_v63 = vadd.f32 %v9503_v28, %v3303_v8 }
 0x59e   :  { %v3529_v36 = vpack.c.bf16 %v3510_v53, %v3509_v23  ;;  %v3417_v62 = vmax.f32 %v3397_v31, 0.0  ;;  %v3461_v22 = vrot.slane %v3416_v24, 1 }
 0x59f   :  { %v3457_v38 = vrot.slane %v3414_v52, 1  ;;  %v3415_v58 = vmax.f32 %v3395_v63, 0.0 }
 0x5a0   :  { %v3463_v59 = vrot.slane %v3417_v62, 1  ;;  %3630 = vmatpush1.bf16.msra.mxu1 %v3529_v36 }
 0x5a1   :  { %v3458_v57 = vsel %vm946_vm4, %v3455_v29, %v3457_v38  ;;  %v3459_v56 = vrot.slane %v3415_v58, 1  ;;  %v7279_v54 = vpop.f32.mrb[68].mxu1  ;;  %3631 = vmatprep.subr.bf16.mxu1 %v8296_v43 }
 0x5a2   :  { %v3512_v26 = vmax.f32 %v3413_v10, %v3458_v57  ;;  %v3464_v42 = vsel %vm946_vm4, %v3461_v22, %v3463_v59  ;;  %v3400_v13 = vadd.f32 %v7279_v54, %v9503_v28  ;;  %v3316_v27 = vpop.f32.mrb[69].mxu1 }
 0x5a3   :  { %v3515_v25 = vmax.f32 %v3416_v24, %v3464_v42  ;;  %v3460_v20 = vsel %vm946_vm4, %v3457_v38, %v3459_v56  ;;  %v3462_v60 = vsel %vm946_vm4, %v3459_v56, %v3461_v22  ;;  %v3398_v55 = vadd.f32 %v9503_v28, %v3316_v27  ;;  %v7280_v3 = vpop.f32.mrb[70].mxu1 }
 0x5a4   :  { %v3513_v45 = vmax.f32 %v3414_v52, %v3460_v20  ;;  %v3514_v50 = vmax.f32 %v3415_v58, %v3462_v60  ;;  %v3420_v4 = vmax.f32 %v3400_v13, 0.0  ;;  %v3401_v6 = vadd.f32 %v7280_v3, %v9503_v28  ;;  %v3319_v11 = vpop.f32.mrb[71].mxu1 }
 0x5a5   :  { %v3418_v16 = vmax.f32 %v3398_v55, 0.0  ;;  %v3399_v37 = vadd.f32 %v9503_v28, %v3319_v11  ;;  %v3530_v12 = vpack.c.bf16 %v3512_v26, %v3511_v51 }
 0x5a6   :  { %v3531_v44 = vpack.c.bf16 %v3514_v50, %v3513_v45  ;;  %v3421_v40 = vmax.f32 %v3401_v6, 0.0  ;;  %v3469_v39 = vrot.slane %v3420_v4, 1 }
 0x5a7   :  { %v3465_v34 = vrot.slane %v3418_v16, 1  ;;  %v3419_v2 = vmax.f32 %v3399_v37, 0.0  ;;  %3632 = vmatpush1.bf16.msra.mxu1 %v3530_v12 }
 0x5a8   :  { %v3471_v14 = vrot.slane %v3421_v40, 1  ;;  %3633 = vmatprep.subr.bf16.mxu1 %v8296_v43 }
 0x5a9   :  { %v3466_v19 = vsel %vm946_vm4, %v3463_v59, %v3465_v34  ;;  %v3467_v15 = vrot.slane %v3419_v2, 1  ;;  %v7283_v21 = vpop.f32.mrb[72].mxu1 }
 0x5aa   :  { %v3516_v5 = vmax.f32 %v3417_v62, %v3466_v19  ;;  %v3472_v9 = vsel %vm946_vm4, %v3469_v39, %v3471_v14  ;;  %v3404_v17 = vadd.f32 %v7283_v21, %v9503_v28  ;;  %v3332_v32 = vpop.f32.mrb[73].mxu1 }
 0x5ab   :  { %v3519_v10 = vmax.f32 %v3420_v4, %v3472_v9  ;;  %v3468_v46 = vsel %vm946_vm4, %v3465_v34, %v3467_v15  ;;  %v3470_v49 = vsel %vm946_vm4, %v3467_v15, %v3469_v39  ;;  %v3402_v29 = vadd.f32 %v9503_v28, %v3332_v32  ;;  %3634 = vmatpush1.bf16.msra.mxu1 %v3531_v44  ;;  %v7284_v48 = vpop.f32.mrb[74].mxu1 }
 0x5ac   :  { %v3517_v0 = vmax.f32 %v3418_v16, %v3468_v46  ;;  %v3518_v33 = vmax.f32 %v3419_v2, %v3470_v49  ;;  %v3424_v41 = vmax.f32 %v3404_v17, 0.0  ;;  %v3405_v1 = vadd.f32 %v7284_v48, %v9503_v28  ;;  %v3335_v30 = vpop.f32.mrb[75].mxu1  ;;  %3635 = vmatprep.subr.bf16.mxu1 %v8296_v43  ;;  %v7726_v17 = vld [vmem:[#allocation7 + $0x20] sm:$0xff]   ;;  %v7717_v48 = vld [vmem:[%s9978_s10 + $0x34] ss:$8 sps:$4 sm:$0xff]  }
 0x5ad   :  { %v3422_v51 = vmax.f32 %v3402_v29, 0.0  ;;  %v3403_v61 = vadd.f32 %v9503_v28, %v3335_v30  ;;  %v3532_v7 = vpack.c.bf16 %v3516_v5, %v3515_v25  ;;  %v3624_v5 = vsel %vm485_vm0, 4294967295, %v8295_v35  ;;  %v7711_v35 = vld [vmem:[%s9978_s10 + $0x14] ss:$8 sps:$4 sm:$0xff]   ;;  %v7713_v46 = vld [vmem:[%s9978_s10 + $0x10] ss:$8 sps:$4 sm:$0xff]  }
 0x5ae   :  { %v3533_v47 = vpack.c.bf16 %v3518_v33, %v3517_v0  ;;  %v3425_v18 = vmax.f32 %v3405_v1, 0.0  ;;  %v3477_v24 = vrot.slane %v3424_v41, 1  ;;  %v9555_v9 = vsel %vm946_vm4, %v3624_v5, 0  ;;  %v7714_v49 = vld [vmem:[%s9978_s10 + $0x24] ss:$8 sps:$4 sm:$0xff]  }
 0x5af   :  { %v3473_v23 = vrot.slane %v3422_v51, 1  ;;  %v3423_v53 = vmax.f32 %v3403_v61, 0.0  ;;  %3636 = vmatpush1.bf16.msra.mxu1 %v3532_v7  ;;  %v7716_v29 = vld [vmem:[%s9978_s10 + $0x20] ss:$8 sps:$4 sm:$0xff]   ;;  %v7719_v0 = vld [vmem:[%s9978_s10 + $0x30] ss:$8 sps:$4 sm:$0xff]  }
 0x5b0   :  { %v3479_v31 = vrot.slane %v3425_v18, 1  ;;  %3637 = vmatprep.subr.bf16.mxu1 %v8296_v43  ;;  %v7720_v33 = vld [vmem:[%s9978_s10 + $0x44] ss:$8 sps:$4 sm:$0xff]   ;;  %v7723_v1 = vld [vmem:[%s9978_s10 + $0x54] ss:$8 sps:$4 sm:$0xff]  }
 0x5b1   :  { %v3474_v8 = vsel %vm946_vm4, %v3471_v14, %v3473_v23  ;;  %v3475_v52 = vrot.slane %v3423_v53, 1  ;;  %v7287_v63 = vpop.f32.mrb[76].mxu1  ;;  %v7725_v30 = vld [vmem:[%s9978_s10 + $0x50] ss:$8 sps:$4 sm:$0xff]   ;;  %v7729_v7 = vld [vmem:[#allocation7 + $0x38] sm:$0xff]  }
 0x5b2   :  { %v3520_v36 = vmax.f32 %v3421_v40, %v3474_v8  ;;  %v3480_v62 = vsel %vm946_vm4, %v3477_v24, %v3479_v31  ;;  %v3408_v38 = vadd.f32 %v7287_v63, %v9503_v28  ;;  %v3348_v58 = vpop.f32.mrb[77].mxu1  ;;  %v7728_v61 = vld [vmem:[#allocation7 + $0x30] sm:$0xff]  }
 0x5b3   :  { %v3523_v22 = vmax.f32 %v3424_v41, %v3480_v62  ;;  %v3476_v59 = vsel %vm946_vm4, %v3473_v23, %v3475_v52  ;;  %v3478_v57 = vsel %vm946_vm4, %v3475_v52, %v3477_v24  ;;  %v3406_v56 = vadd.f32 %v9503_v28, %v3348_v58  ;;  %3638 = vmatpush1.bf16.msra.mxu1 %v3533_v47  ;;  %v7288_v54 = vpop.f32.mrb[78].mxu1  ;;  %v7722_v41 = vld [vmem:[%s9978_s10 + $0x40] ss:$8 sps:$4 sm:$0xff]  }
 0x5b4   :  { %v3521_v26 = vmax.f32 %v3422_v51, %v3476_v59  ;;  %v3522_v42 = vmax.f32 %v3423_v53, %v3478_v57  ;;  %v3428_v13 = vmax.f32 %v3408_v38, 0.0  ;;  %v3409_v27 = vadd.f32 %v7288_v54, %v9503_v28  ;;  %v3351_v25 = vpop.f32.mrb[79].mxu1  ;;  %3639 = vmatprep.subr.bf16.mxu1 %v8296_v43  ;;  %v7727_v51 = vld [vmem:[#allocation7 + $0x28] sm:$0xff]   ;;  %v7730_v47 = vld [vmem:[#allocation7] sm:$0xff]  }
 0x5b5   :  { %v3426_v20 = vmax.f32 %v3406_v56, 0.0  ;;  %v3407_v60 = vadd.f32 %v9503_v28, %v3351_v25  ;;  %v3534_v55 = vpack.c.bf16 %v3520_v36, %v3519_v10  ;;  %v7708_v10 = vld [vmem:[%s9978_s10] ss:$8 sps:$4 sm:$0xff]  }
 0x5b6   :  { %v3535_v3 = vpack.c.bf16 %v3522_v42, %v3521_v26  ;;  %v3429_v45 = vmax.f32 %v3409_v27, 0.0  ;;  %v3485_v6 = vrot.slane %v3428_v13, 1 }
 0x5b7   :  { %v3481_v50 = vrot.slane %v3426_v20, 1  ;;  %v3427_v4 = vmax.f32 %v3407_v60, 0.0  ;;  %3640 = vmatpush1.bf16.msra.mxu1 %v3534_v55 }
 0x5b8   :  { %v3487_v11 = vrot.slane %v3429_v45, 1  ;;  %3641 = vmatprep.subr.bf16.mxu1 %v8296_v43 }
 0x5b9   :  { %v3482_v16 = vsel %vm946_vm4, %v3479_v31, %v3481_v50  ;;  %v3483_v37 = vrot.slane %v3427_v4, 1 }
 0x5ba   :  { %v3524_v12 = vmax.f32 %v3425_v18, %v3482_v16  ;;  %v3488_v44 = vsel %vm946_vm4, %v3485_v6, %v3487_v11  ;;  %v3528_v40 = vmax.f32 %v3429_v45, %v3487_v11 }
 0x5bb   :  { %v3527_v34 = vmax.f32 %v3428_v13, %v3488_v44  ;;  %v3484_v28 = vsel %vm946_vm4, %v3481_v50, %v3483_v37  ;;  %v3486_v2 = vsel %vm946_vm4, %v3483_v37, %v3485_v6  ;;  %3642 = vmatpush1.bf16.msra.mxu1 %v3535_v3  ;;  %v7731_v37 = vld [vmem:[#allocation7 + $0x8] sm:$0xff]  }
 0x5bc   :  { %v3525_v39 = vmax.f32 %v3426_v20, %v3484_v28  ;;  %v3526_v14 = vmax.f32 %v3427_v4, %v3486_v2  ;;  %3643 = vmatprep.subr.bf16.mxu1 %v8296_v43  ;;  %v3536_v19 = vpack.c.bf16 %v3524_v12, %v3523_v22  ;;  %v7732_v2 = vld [vmem:[#allocation7 + $0x10] sm:$0xff]  }
 0x5bd   :  { %v3538_v15 = vpack.c.bf16 %v3528_v40, %v3527_v34 }
 0x5be   :  { %v3537_v21 = vpack.c.bf16 %v3526_v14, %v3525_v39 }
 0x5bf   :  { %3644 = vmatpush1.bf16.msra.mxu1 %v3536_v19  ;;  %v3627_v32 = vand.u32 %v9555_v9, %v3538_v15 }
 0x5c0   :  { %3645 = vmatprep.subr.bf16.mxu1 %v8296_v43 }
 0x5c3   :  { %3646 = vmatpush1.bf16.msra.mxu1 %v3537_v21 }
 0x5c4   :  { %3647 = vmatprep.subr.bf16.mxu1 %v8296_v43 }
 0x5c7   :  { %3648 = vmatpush1.bf16.msra.mxu1 %v3627_v32  ;;  %v7733_v32 = vld [vmem:[#allocation7 + $0x18] sm:$0xff]  }
 0x5c8   :  { %7289 = vmatprep.subr.bf16.mxu1 %v7726_v17 }
 0x5ca   :  { %3662 = vmatmul.mubr.bf16.vlgmr.msra.gmra.mrb[80].mxu1 %v7708_v10 }
 0x5cb   :  { %6447 = vmatprep.mubr.msk.bf16.mxu1 %vm3605_vm8, %v7711_v35  ;;  %7290 = vmatpush3.bf16.msra.mxu1 %v7726_v17 }
 0x5cc   :  { %7291 = vmatprep.subr.bf16.mxu1 %v7727_v51 }
 0x5cf   :  { %7292 = vmatpush3.bf16.msra.mxu1 %v7727_v51 }
 0x5d0   :  { %7293 = vmatprep.subr.bf16.mxu1 %v7728_v61 }
 0x5d2   :  { %3670 = vmatmul.mubr.bf16.gmra.mrb[84].mxu1 %v7713_v46 }
 0x5d3   :  { %6448 = vmatprep.mubr.msk.bf16.mxu1 %vm3605_vm8, %v7714_v49  ;;  %7294 = vmatpush3.bf16.msra.mxu1 %v7728_v61 }
 0x5d4   :  { %7295 = vmatprep.subr.bf16.mxu1 %v7729_v7 }
 0x5d7   :  { %7296 = vmatpush3.bf16.msra.mxu1 %v7729_v7 }
 0x5d8   :  { %7309 = vmatprep.subr.bf16.mxu1 %v7730_v47 }
 0x5da   :  { %3678 = vmatmul.mubr.bf16.gmra.mrb[88].mxu1 %v7716_v29 }
 0x5db   :  { %6449 = vmatprep.mubr.msk.bf16.mxu1 %vm3605_vm8, %v7717_v48  ;;  %v7734_v48 = vld [vmem:[#allocation7 + $0x40] sm:$0xff]  }
 0x5e2   :  { %3686 = vmatmul.mubr.bf16.gmra.mrb[92].mxu1 %v7719_v0 }
 0x5e3   :  { %6450 = vmatprep.mubr.msk.bf16.mxu1 %vm3605_vm8, %v7720_v33 }
 0x5ea   :  { %3694 = vmatmul.mubr.bf16.gmra.mrb[96].mxu1 %v7722_v41 }
 0x5eb   :  { %6451 = vmatprep.mubr.msk.bf16.mxu1 %vm3605_vm8, %v7723_v1 }
 0x5f2   :  { %3702 = vmatmul.mubr.bf16.gmra.mrb[100].mxu1 %v7725_v30 }
 0x69d   :  { %v3663_v18 = vpop.f32.mrb[80].mxu1 }
 0x69e   :  { %v3665_v23 = vpop.f32.mrb[81].mxu1 }
 0x69f   :  { %v3666_v53 = vpop.f32.mrb[82].mxu1 }
 0x6a0   :  { %v9597_v24 = vpack.c.bf16 %v3666_v53, %v3663_v18  ;;  %v3668_v31 = vpop.f32.mrb[83].mxu1 }
 0x6a2   :  { %v3736_v8 = vshll.u32 %v9597_v24, 16  ;;  %v3734_v22 = vshrl.u32 %v9597_v24, 16  ;;  %v4036_v57 = vrot.slane %v9597_v24, 1 }
 0x6a4   :  { %v3738_v62 = vrot.slane %v3736_v8, 1 }
 0x6a5   :  { %v3671_v52 = vpop.f32.mrb[84].mxu1 }
 0x6a6   :  { %v3673_v63 = vpop.f32.mrb[85].mxu1  ;;  %v3739_v54 = vor.u32 %v3738_v62, %v3734_v22 }
 0x6a7   :  { %v3674_v36 = vpop.f32.mrb[86].mxu1 }
 0x6a8   :  { %v9600_v38 = vpack.c.bf16 %v3674_v36, %v3671_v52  ;;  %v3676_v58 = vpop.f32.mrb[87].mxu1 }
 0x6aa   :  { %v3741_v59 = vshll.u32 %v9600_v38, 16  ;;  %v4037_v56 = vrot.slane %v9600_v38, 1  ;;  %v3745_v3 = vshrl.u32 %v9600_v38, 16 }
 0x6ac   :  { %v3743_v26 = vrot.slane %v3741_v59, 1  ;;  %v9607_v42 = vsel %vm946_vm4, %v4036_v57, %v4037_v56  ;;  %v7735_v57 = vld [vmem:[#allocation7 + $0x48] sm:$0xff]  }
 0x6ad   :  { %v3679_v13 = vpop.f32.mrb[88].mxu1 }
 0x6ae   :  { %v3681_v27 = vpop.f32.mrb[89].mxu1  ;;  %v3744_v25 = vsel %vm259_vm1, %v3739_v54, %v3743_v26  ;;  %v3747_v6 = vor.u32 %v3745_v3, %v3743_v26  ;;  %v7737_v54 = vld [vmem:[#allocation7 + $0x58] sm:$0xff]   ;;  %v7744_v26 = vld [vmem:[#allocation10 + $0x4] ss:$8 sps:$4 sm:$0xff]   ;;  %v7754_v3 = vld [vmem:[#allocation10 + $0x40] ss:$8 sps:$4 sm:$0xff]  }
 0x6af   :  { %v3682_v20 = vpop.f32.mrb[90].mxu1  ;;  %7297 = vmatprep.mubr.msk.bf16.mxu1 %vm3804_vm9, %v3744_v25  ;;  %4741 = vmatprep.subr.bf16.mxu0 %v7744_v26  ;;  %v7750_v27 = vld [vmem:[#allocation10 + $0x24] ss:$8 sps:$4 sm:$0xff]   ;;  %v7748_v25 = vld [vmem:[#allocation10 + $0x20] ss:$8 sps:$4 sm:$0xff]  }
 0x6b0   :  { %v9611_v60 = vpack.c.bf16 %v3682_v20, %v3679_v13  ;;  %v3684_v55 = vpop.f32.mrb[91].mxu1  ;;  %v7745_v13 = vld [vmem:[#allocation10 + $0x10] ss:$8 sps:$4 sm:$0xff]   ;;  %v7753_v20 = vld [vmem:[#allocation10 + $0x34] ss:$8 sps:$4 sm:$0xff]  }
 0x6b1   :  { %v7756_v55 = vld [vmem:[#allocation10 + $0x44] ss:$8 sps:$4 sm:$0xff]  }
 0x6b2   :  { %v3749_v45 = vshll.u32 %v9611_v60, 16  ;;  %v4039_v50 = vrot.slane %v9611_v60, 1  ;;  %v3753_v39 = vshrl.u32 %v9611_v60, 16 }
 0x6b4   :  { %v3751_v4 = vrot.slane %v3749_v45, 1  ;;  %v9617_v11 = vsel %vm946_vm4, %v4037_v56, %v4039_v50  ;;  %v7736_v56 = vld [vmem:[#allocation7 + $0x50] sm:$0xff]  }
 0x6b5   :  { %v3687_v16 = vpop.f32.mrb[92].mxu1  ;;  %v7759_v45 = vld [vmem:[#allocation10 + $0x54] ss:$8 sps:$4 sm:$0xff]  }
 0x6b6   :  { %v3689_v12 = vpop.f32.mrb[93].mxu1  ;;  %v3752_v44 = vsel %vm259_vm1, %v3747_v6, %v3751_v4  ;;  %v3755_v15 = vor.u32 %v3753_v39, %v3751_v4  ;;  %v7762_v4 = vld [vmem:[#allocation10 + $0x64] ss:$8 sps:$4 sm:$0xff]   ;;  %v7760_v6 = vld [vmem:[#allocation10 + $0x60] ss:$8 sps:$4 sm:$0xff]  }
 0x6b7   :  { %v3690_v40 = vpop.f32.mrb[94].mxu1  ;;  %7298 = vmatmul.mubr.msk.bf16.vlgmr.msra.gmra.mrb[104].mxu1 %vm3804_vm9, %v3752_v44  ;;  %v7766_v12 = vld [vmem:[#allocation10 + $0x80] ss:$8 sps:$4 sm:$0xff]   ;;  %v7771_v44 = vld [vmem:[#allocation10 + $0x94] ss:$8 sps:$4 sm:$0xff]  }
 0x6b8   :  { %v3713_v34 = vpack.c.bf16 %v3690_v40, %v3687_v16  ;;  %v3692_v28 = vpop.f32.mrb[95].mxu1  ;;  %7310 = vmatpush3.bf16.msra.mxu1 %v7730_v47  ;;  %v7763_v16 = vld [vmem:[#allocation10 + $0x70] ss:$8 sps:$4 sm:$0xff]  }
 0x6b9   :  { %7311 = vmatprep.subr.bf16.mxu1 %v7731_v37  ;;  %v7769_v40 = vld [vmem:[#allocation10 + $0x90] ss:$8 sps:$4 sm:$0xff]   ;;  %v7772_v28 = vld [vmem:[#allocation10 + $0xa0] ss:$8 sps:$4 sm:$0xff]  }
 0x6ba   :  { %v3757_v14 = vshll.u32 %v3713_v34, 16  ;;  %v4041_v19 = vrot.slane %v3713_v34, 1  ;;  %v3761_v0 = vshrl.u32 %v3713_v34, 16  ;;  %v7775_v39 = vld [vmem:[#allocation10 + $0xb0] ss:$8 sps:$4 sm:$0xff]  }
 0x6bc   :  { %v3759_v21 = vrot.slane %v3757_v14, 1  ;;  %7312 = vmatpush3.bf16.msra.mxu1 %v7731_v37  ;;  %v4042_v5 = vsel %vm946_vm4, %v4039_v50, %v4041_v19  ;;  %v7757_v50 = vld [vmem:[#allocation10 + $0x50] ss:$8 sps:$4 sm:$0xff]   ;;  %v7768_v37 = vld [vmem:[#allocation10 + $0x84] ss:$8 sps:$4 sm:$0xff]  }
 0x6bd   :  { %v3695_v17 = vpop.f32.mrb[96].mxu1  ;;  %7313 = vmatprep.subr.bf16.mxu1 %v7732_v2  ;;  %v7780_v14 = vld [vmem:[#allocation10 + $0xc4] ss:$8 sps:$4 sm:$0xff]  }
 0x6be   :  { %v3697_v10 = vpop.f32.mrb[97].mxu1  ;;  %v3760_v35 = vsel %vm259_vm1, %v3755_v15, %v3759_v21  ;;  %v3763_v1 = vor.u32 %v3761_v0, %v3759_v21  ;;  %v6482_v15 = vld [vmem:[#allocation8] ss:$0 sm:$0xff] }
 0x6bf   :  { %v3698_v46 = vpop.f32.mrb[98].mxu1  ;;  %7301 = vmatprep.mubr.msk.bf16.mxu1 %vm3804_vm9, %v3760_v35 }
 0x6c0   :  { %v3714_v49 = vpack.c.bf16 %v3698_v46, %v3695_v17  ;;  %v3700_v29 = vpop.f32.mrb[99].mxu1  ;;  %7314 = vmatpush3.bf16.msra.mxu1 %v7732_v2  ;;  %v7777_v2 = vld [vmem:[#allocation10 + $0xb4] ss:$8 sps:$4 sm:$0xff]  }
 0x6c1   :  { %7315 = vmatprep.subr.bf16.mxu1 %v7733_v32 }
 0x6c2   :  { %v3765_v33 = vshll.u32 %v3714_v49, 16  ;;  %v4043_v41 = vrot.slane %v3714_v49, 1  ;;  %v3769_v31 = vshrl.u32 %v3714_v49, 16 }
 0x6c4   :  { %v3767_v30 = vrot.slane %v3765_v33, 1  ;;  %7316 = vmatpush3.bf16.msra.mxu1 %v7733_v32  ;;  %v4044_v51 = vsel %vm946_vm4, %v4041_v19, %v4043_v41  ;;  %v7778_v19 = vld [vmem:[#allocation10 + $0xc0] ss:$8 sps:$4 sm:$0xff]  }
 0x6c5   :  { %v3703_v61 = vpop.f32.mrb[100].mxu1  ;;  %7329 = vmatprep.subr.bf16.mxu1 %v7734_v48 }
 0x6c6   :  { %v3705_v7 = vpop.f32.mrb[101].mxu1  ;;  %v3768_v47 = vsel %vm259_vm1, %v3763_v1, %v3767_v30  ;;  %v3771_v36 = vor.u32 %v3769_v31, %v3767_v30 }
 0x6c7   :  { %v3706_v18 = vpop.f32.mrb[102].mxu1  ;;  %7302 = vmatmul.mubr.msk.bf16.gmra.mrb[108].mxu1 %vm3804_vm9, %v3768_v47 }
 0x6c8   :  { %v3715_v23 = vpack.c.bf16 %v3706_v18, %v3703_v61  ;;  %v3708_v53 = vpop.f32.mrb[103].mxu1 }
 0x6ca   :  { %v3773_v8 = vshll.u32 %v3715_v23, 16  ;;  %v4045_v52 = vrot.slane %v3715_v23, 1  ;;  %v3777_v63 = vshrl.u32 %v3715_v23, 16 }
 0x6cc   :  { %v3775_v62 = vrot.slane %v3773_v8, 1  ;;  %v4046_v58 = vsel %vm946_vm4, %v4043_v41, %v4045_v52 }
 0x6ce   :  { %v3776_v22 = vsel %vm259_vm1, %v3771_v36, %v3775_v62  ;;  %v3779_v59 = vor.u32 %v3777_v63, %v3775_v62 }
 0x6cf   :  { %7305 = vmatprep.mubr.msk.bf16.mxu1 %vm3804_vm9, %v3776_v22 }
 0x6d0   :  { %7306 = vmatmul.mubr.msk.bf16.gmra.mrb[112].mxu1 %vm3804_vm9, %v3779_v59 }
 0x6d1   :  { %7317 = vmatprep.mubr.msk.bf16.mxu1 %vm3804_vm9, %v9597_v24  ;;  %v7738_v24 = vld [vmem:[%s9979_s11] sm:$0xff]  }
 0x6d8   :  { %7318 = vmatmul.mubr.msk.bf16.vlgmr.msra.gmra.mrb[104].mxu1 %vm3804_vm9, %v9600_v38  ;;  %v7742_v38 = vld [vmem:[#allocation10] ss:$8 sps:$4 sm:$0xff]  }
 0x6d9   :  { %7321 = vmatprep.mubr.msk.bf16.mxu1 %vm3804_vm9, %v9611_v60  ;;  %7330 = vmatpush3.bf16.msra.mxu1 %v7734_v48  ;;  %v7751_v60 = vld [vmem:[#allocation10 + $0x30] ss:$8 sps:$4 sm:$0xff]  }
 0x6da   :  { %7331 = vmatprep.subr.bf16.mxu1 %v7735_v57  ;;  %4742 = vmatpush1.bf16.msra.mxu0 %v7742_v38 }
 0x6dd   :  { %7332 = vmatpush3.bf16.msra.mxu1 %v7735_v57 }
 0x6de   :  { %7333 = vmatprep.subr.bf16.mxu1 %v7736_v56 }
 0x6e0   :  { %7322 = vmatmul.mubr.msk.bf16.gmra.mrb[108].mxu1 %vm3804_vm9, %v3713_v34  ;;  %v7774_v34 = vld [vmem:[#allocation10 + $0xa4] ss:$8 sps:$4 sm:$0xff]  }
 0x6e1   :  { %7325 = vmatprep.mubr.msk.bf16.mxu1 %vm3804_vm9, %v3714_v49  ;;  %7334 = vmatpush3.bf16.msra.mxu1 %v7736_v56 }
 0x6e2   :  { %7335 = vmatprep.subr.bf16.mxu1 %v7737_v54 }
 0x6e5   :  { %7336 = vmatpush3.bf16.msra.mxu1 %v7737_v54 }
 0x6e8   :  { %7326 = vmatmul.mubr.msk.bf16.gmra.mrb[112].mxu1 %vm3804_vm9, %v3715_v23 }
 0x6e9   :  { %7337 = vmatprep.mubr.msk.bf16.mxu1 %vm3804_vm9, %v9607_v42  ;;  %v7747_v42 = vld [vmem:[#allocation10 + $0x14] ss:$8 sps:$4 sm:$0xff]  }
 0x6ea   :  { %4743 = vmatprep.subr.bf16.mxu0 %v7747_v42 }
 0x6eb   :  { %4744 = vmatpush1.bf16.msra.mxu0 %v7745_v13 }
 0x6ec   :  { %4745 = vmatprep.subr.bf16.mxu0 %v7750_v27 }
 0x6ef   :  { %4746 = vmatpush1.bf16.msra.mxu0 %v7748_v25 }
 0x6f0   :  { %7338 = vmatmul.mubr.msk.bf16.vlgmr.msra.gmra.mrb[104].mxu1 %vm3804_vm9, %v9617_v11  ;;  %4747 = vmatprep.subr.bf16.mxu0 %v7753_v20  ;;  %v7765_v11 = vld [vmem:[#allocation10 + $0x74] ss:$8 sps:$4 sm:$0xff]  }
 0x6f1   :  { %7341 = vmatprep.mubr.msk.bf16.mxu1 %vm3804_vm9, %v4042_v5 }
 0x6f3   :  { %4748 = vmatpush1.bf16.msra.mxu0 %v7751_v60 }
 0x6f4   :  { %4749 = vmatprep.subr.bf16.mxu0 %v7756_v55 }
 0x6f7   :  { %4750 = vmatpush1.bf16.msra.mxu0 %v7754_v3 }
 0x6f8   :  { %7342 = vmatmul.mubr.msk.bf16.gmra.mrb[108].mxu1 %vm3804_vm9, %v4044_v51  ;;  %4751 = vmatprep.subr.bf16.mxu0 %v7759_v45 }
 0x6f9   :  { %7345 = vmatprep.mubr.msk.bf16.mxu1 %vm3804_vm9, %v4046_v58 }
 0x6fb   :  { %4752 = vmatpush1.bf16.msra.mxu0 %v7757_v50 }
 0x6fc   :  { %4753 = vmatprep.subr.bf16.mxu0 %v7762_v4 }
 0x6ff   :  { %4754 = vmatpush1.bf16.msra.mxu0 %v7760_v6 }
 0x700   :  { %7346 = vmatmul.mubr.msk.bf16.gmra.mrb[112].mxu1 %vm3804_vm9, %v4045_v52  ;;  %4755 = vmatprep.subr.bf16.mxu0 %v7765_v11 }
 0x701   :  { %7361 = vmatprep.mubr.msk.bf16.mxu1 %vm4306_vm10, %v7738_v24 }
 0x703   :  { %4756 = vmatpush1.bf16.msra.mxu0 %v7763_v16 }
 0x704   :  { %4757 = vmatprep.subr.bf16.mxu0 %v7768_v37 }
 0x707   :  { %4758 = vmatpush1.bf16.msra.mxu0 %v7766_v12 }
 0x708   :  { %4759 = vmatprep.subr.bf16.mxu0 %v7771_v44 }
 0x70b   :  { %4760 = vmatpush1.bf16.msra.mxu0 %v7769_v40 }
 0x70c   :  { %4761 = vmatprep.subr.bf16.mxu0 %v7774_v34 }
 0x70f   :  { %4762 = vmatpush1.bf16.msra.mxu0 %v7772_v28 }
 0x710   :  { %4763 = vmatprep.subr.bf16.mxu0 %v7777_v2 }
 0x713   :  { %4764 = vmatpush1.bf16.msra.mxu0 %v7775_v39 }
 0x714   :  { %4765 = vmatprep.subr.bf16.mxu0 %v7780_v14 }
 0x717   :  { %4766 = vmatpush1.bf16.msra.mxu0 %v7778_v19 }
 0x7c3   :  { %v7339_v21 = vpop.f32.mrb[104].mxu1 }
 0x7c4   :  { %v4191_v5 = vadd.f32 %v7339_v21, %v6482_v15  ;;  %v4123_v17 = vpop.f32.mrb[105].mxu1 }
 0x7c5   :  { %v4189_v32 = vadd.f32 %v6482_v15, %v4123_v17  ;;  %v7340_v10 = vpop.f32.mrb[106].mxu1 }
 0x7c6   :  { %v4203_v35 = vmax.f32 %v4191_v5, 0.0  ;;  %v4192_v46 = vadd.f32 %v7340_v10, %v6482_v15  ;;  %v4126_v49 = vpop.f32.mrb[107].mxu1 }
 0x7c7   :  { %v4201_v29 = vmax.f32 %v4189_v32, 0.0  ;;  %v4190_v48 = vadd.f32 %v6482_v15, %v4126_v49 }
 0x7c8   :  { %v4204_v0 = vmax.f32 %v4192_v46, 0.0  ;;  %v4228_v41 = vrot.slane %v4203_v35, 1 }
 0x7c9   :  { %v4202_v33 = vmax.f32 %v4190_v48, 0.0  ;;  %v4225_v30 = vrot.slane %v4201_v29, 1 }
 0x7ca   :  { %v4230_v1 = vrot.slane %v4204_v0, 1 }
 0x7cb   :  { %v4226_v51 = vrot.slane %v4202_v33, 1  ;;  %v7343_v61 = vpop.f32.mrb[108].mxu1 }
 0x7cc   :  { %v4195_v7 = vadd.f32 %v7343_v61, %v6482_v15  ;;  %v4139_v47 = vpop.f32.mrb[109].mxu1  ;;  %v4231_v18 = vsel %vm946_vm4, %v4228_v41, %v4230_v1  ;;  %v7739_v61 = vld [vmem:[%s9979_s11 + $0x8] sm:$0xff]  }
 0x7cd   :  { %v4229_v23 = vsel %vm946_vm4, %v4226_v51, %v4228_v41  ;;  %v4193_v53 = vadd.f32 %v6482_v15, %v4139_v47  ;;  %v7344_v31 = vpop.f32.mrb[110].mxu1  ;;  %v4227_v8 = vsel %vm946_vm4, %v4225_v30, %v4226_v51  ;;  %v4262_v52 = vmax.f32 %v4203_v35, %v4231_v18  ;;  %v7741_v47 = vld [vmem:[%s9979_s11 + $0x18] sm:$0xff]   ;;  %v7783_v18 = vld [vmem:[#allocation10 + $0xd4] ss:$8 sps:$4 sm:$0xff]  }
 0x7ce   :  { %v4261_v63 = vmax.f32 %v4202_v33, %v4229_v23  ;;  %v4207_v36 = vmax.f32 %v4195_v7, 0.0  ;;  %v4196_v62 = vadd.f32 %v7344_v31, %v6482_v15  ;;  %v4142_v58 = vpop.f32.mrb[111].mxu1  ;;  %v4260_v22 = vmax.f32 %v4201_v29, %v4227_v8  ;;  %v7740_v7 = vld [vmem:[%s9979_s11 + $0x10] sm:$0xff]   ;;  %v7781_v23 = vld [vmem:[#allocation10 + $0xd0] ss:$8 sps:$4 sm:$0xff]   ;;  %4767 = vmatprep.subr.bf16.mxu0 %v7783_v18 }
 0x7cf   :  { %v4205_v59 = vmax.f32 %v4193_v53, 0.0  ;;  %v4194_v57 = vadd.f32 %v6482_v15, %v4142_v58  ;;  %4768 = vmatpush1.bf16.msra.mxu0 %v7781_v23  ;;  %v7786_v53 = vld [vmem:[#allocation10 + $0xe4] ss:$8 sps:$4 sm:$0xff]   ;;  %v7784_v31 = vld [vmem:[#allocation10 + $0xe0] ss:$8 sps:$4 sm:$0xff]  }
 0x7d0   :  { %v4208_v56 = vmax.f32 %v4196_v62, 0.0  ;;  %v4272_v54 = vpack.c.bf16 %v4261_v63, %v4260_v22  ;;  %v4236_v26 = vrot.slane %v4207_v36, 1  ;;  %4769 = vmatprep.subr.bf16.mxu0 %v7786_v53  ;;  %v7789_v8 = vld [vmem:[#allocation10 + $0xf4] ss:$8 sps:$4 sm:$0xff]   ;;  %v7792_v63 = vld [vmem:[#allocation10 + $0x104] ss:$8 sps:$4 sm:$0xff]  }
 0x7d1   :  { %v4232_v24 = vrot.slane %v4205_v59, 1  ;;  %v4206_v38 = vmax.f32 %v4194_v57, 0.0  ;;  %v7823_v18 = vld [vmem:[%s9981_s13 + $0x24] ss:$16 sps:$4 sm:$0xff]   ;;  %v7821_v23 = vld [vmem:[%s9981_s13 + $0x20] ss:$16 sps:$4 sm:$0xff]  }
 0x7d2   :  { %v4238_v42 = vrot.slane %v4208_v56, 1  ;;  %7349 = vmatprep.subr.bf16.mxu1 %v4272_v54  ;;  %v7827_v53 = vld [vmem:[%s9981_s13 + $0x40] ss:$16 sps:$4 sm:$0xff]  }
 0x7d3   :  { %v4234_v13 = vrot.slane %v4206_v38, 1  ;;  %v7347_v27 = vpop.f32.mrb[112].mxu1  ;;  %7350 = vmatpush3.bf16.msra.mxu1 %v4272_v54  ;;  %v4233_v25 = vsel %vm946_vm4, %v4230_v1, %v4232_v24  ;;  %4770 = vmatpush1.bf16.msra.mxu0 %v7784_v31  ;;  %v7835_v31 = vld [vmem:[%s9981_s13 + $0x64] ss:$16 sps:$4 sm:$0xff]  }
 0x7d4   :  { %v4199_v20 = vadd.f32 %v7347_v27, %v6482_v15  ;;  %v4155_v60 = vpop.f32.mrb[113].mxu1  ;;  %v4263_v55 = vmax.f32 %v4204_v0, %v4233_v25  ;;  %v4239_v3 = vsel %vm946_vm4, %v4236_v26, %v4238_v42  ;;  %4771 = vmatprep.subr.bf16.mxu0 %v7789_v8  ;;  %v7833_v8 = vld [vmem:[%s9981_s13 + $0x60] ss:$16 sps:$4 sm:$0xff]  }
 0x7d5   :  { %v4237_v45 = vsel %vm946_vm4, %v4234_v13, %v4236_v26  ;;  %v4197_v50 = vadd.f32 %v6482_v15, %v4155_v60  ;;  %v7348_v4 = vpop.f32.mrb[114].mxu1  ;;  %v4235_v6 = vsel %vm946_vm4, %v4232_v24, %v4234_v13  ;;  %v4266_v11 = vmax.f32 %v4207_v36, %v4239_v3 }
 0x7d6   :  { %v4265_v16 = vmax.f32 %v4206_v38, %v4237_v45  ;;  %v4211_v37 = vmax.f32 %v4199_v20, 0.0  ;;  %v4200_v12 = vadd.f32 %v7348_v4, %v6482_v15  ;;  %v4158_v44 = vpop.f32.mrb[115].mxu1  ;;  %v4273_v40 = vpack.c.bf16 %v4263_v55, %v4262_v52  ;;  %v7787_v52 = vld [vmem:[#allocation10 + $0xf0] ss:$8 sps:$4 sm:$0xff]  }
 0x7d7   :  { %v4209_v34 = vmax.f32 %v4197_v50, 0.0  ;;  %v4198_v28 = vadd.f32 %v6482_v15, %v4158_v44  ;;  %v4264_v2 = vmax.f32 %v4205_v59, %v4235_v6  ;;  %4772 = vmatpush1.bf16.msra.mxu0 %v7787_v52  ;;  %v7790_v50 = vld [vmem:[#allocation10 + $0x100] ss:$8 sps:$4 sm:$0xff]  }
 0x7d8   :  { %v4212_v39 = vmax.f32 %v4200_v12, 0.0  ;;  %7351 = vmatprep.subr.bf16.mxu1 %v4273_v40  ;;  %v4244_v5 = vrot.slane %v4211_v37, 1  ;;  %4814 = vmatprep.subr.bf16.mxu0 %v7792_v63  ;;  %v7841_v52 = vld [vmem:[%s9981_s13 + $0x84] ss:$16 sps:$4 sm:$0xff]   ;;  %v7839_v63 = vld [vmem:[%s9981_s13 + $0x80] ss:$16 sps:$4 sm:$0xff]  }
 0x7d9   :  { %v4240_v14 = vrot.slane %v4209_v34, 1  ;;  %v4210_v19 = vmax.f32 %v4198_v28, 0.0  ;;  %7352 = vmatpush3.bf16.msra.mxu1 %v4273_v40  ;;  %v4274_v21 = vpack.c.bf16 %v4265_v16, %v4264_v2 }
 0x7da   :  { %v4246_v17 = vrot.slane %v4212_v39, 1 }
 0x7db   :  { %v4242_v32 = vrot.slane %v4210_v19, 1  ;;  %7353 = vmatprep.subr.bf16.mxu1 %v4274_v21  ;;  %v4241_v10 = vsel %vm946_vm4, %v4238_v42, %v4240_v14 }
 0x7dc   :  { %v4247_v35 = vsel %vm946_vm4, %v4244_v5, %v4246_v17  ;;  %v4271_v46 = vmax.f32 %v4212_v39, %v4246_v17  ;;  %v4267_v49 = vmax.f32 %v4208_v56, %v4241_v10  ;;  %v7798_v39 = vld [vmem:[#allocation10 + $0x124] ss:$8 sps:$4 sm:$0xff]   ;;  %v7796_v10 = vld [vmem:[#allocation10 + $0x120] ss:$8 sps:$4 sm:$0xff]  }
 0x7dd   :  { %v4270_v29 = vmax.f32 %v4211_v37, %v4247_v35  ;;  %v4245_v15 = vsel %vm946_vm4, %v4242_v32, %v4244_v5  ;;  %7354 = vmatpush3.bf16.msra.mxu1 %v4274_v21  ;;  %v4243_v48 = vsel %vm946_vm4, %v4240_v14, %v4242_v32 }
 0x7de   :  { %v4269_v0 = vmax.f32 %v4210_v19, %v4245_v15  ;;  %v4275_v33 = vpack.c.bf16 %v4267_v49, %v4266_v11  ;;  %v4268_v41 = vmax.f32 %v4209_v34, %v4243_v48  ;;  %v7795_v11 = vld [vmem:[#allocation10 + $0x114] ss:$8 sps:$4 sm:$0xff]   ;;  %v7793_v34 = vld [vmem:[#allocation10 + $0x110] ss:$8 sps:$4 sm:$0xff]   ;;  %v7802_v15 = vld [vmem:[#allocation10 + $0x140] ss:$8 sps:$4 sm:$0xff]  }
 0x7df   :  { %v4277_v1 = vpack.c.bf16 %v4271_v46, %v4270_v29  ;;  %v7801_v46 = vld [vmem:[#allocation10 + $0x134] ss:$8 sps:$4 sm:$0xff]   ;;  %v7799_v49 = vld [vmem:[#allocation10 + $0x130] ss:$8 sps:$4 sm:$0xff]   ;;  %v7804_v29 = vld [vmem:[#allocation10 + $0x144] ss:$8 sps:$4 sm:$0xff]  }
 0x7e0   :  { %7355 = vmatprep.subr.bf16.mxu1 %v4275_v33  ;;  %v4276_v30 = vpack.c.bf16 %v4269_v0, %v4268_v41  ;;  %v7807_v0 = vld [vmem:[#allocation10 + $0x154] ss:$8 sps:$4 sm:$0xff]   ;;  %v7805_v41 = vld [vmem:[#allocation10 + $0x150] ss:$8 sps:$4 sm:$0xff]  }
 0x7e1   :  { %7356 = vmatpush3.bf16.msra.mxu1 %v4275_v33  ;;  %v4320_v51 = vand.u32 %v4277_v1, %v9555_v9  ;;  %v7810_v1 = vld [vmem:[#allocation10 + $0x164] ss:$8 sps:$4 sm:$0xff]  }
 0x7e2   :  { %7357 = vmatprep.subr.bf16.mxu1 %v4276_v30 }
 0x7e5   :  { %7358 = vmatpush3.bf16.msra.mxu1 %v4276_v30  ;;  %v7808_v30 = vld [vmem:[#allocation10 + $0x160] ss:$8 sps:$4 sm:$0xff]  }
 0x7e6   :  { %7359 = vmatprep.subr.bf16.mxu1 %v4320_v51 }
 0x7e9   :  { %7360 = vmatpush3.bf16.msra.mxu1 %v4320_v51  ;;  %v7813_v51 = vld [vmem:[#allocation10 + $0x174] ss:$8 sps:$4 sm:$0xff]  }
 0x7ec   :  { %7362 = vmatmul.mubr.msk.bf16.vlgmr.msra.gmra.mrb[116].mxu1 %vm4306_vm10, %v7739_v61  ;;  %v7811_v61 = vld [vmem:[#allocation10 + $0x170] ss:$8 sps:$4 sm:$0xff]  }
 0x7ed   :  { %7365 = vmatprep.mubr.msk.bf16.mxu1 %vm4306_vm10, %v7740_v7  ;;  %v7815_v7 = vld [vmem:[%s9981_s13] ss:$16 sps:$4 sm:$0xff]  }
 0x7f4   :  { %7366 = vmatmul.mubr.msk.bf16.gmra.mrb[120].mxu1 %vm4306_vm10, %v7741_v47  ;;  %v7817_v47 = vld [vmem:[%s9981_s13 + $0x4] ss:$16 sps:$4 sm:$0xff]  }
 0x7f5   :  { %5457 = vmatprep.subr.bf16.mxu1 %v7817_v47 }
 0x7f6   :  { %5458 = vmatpush1.bf16.msra.mxu1 %v7815_v7 }
 0x7f7   :  { %5459 = vmatprep.subr.bf16.mxu1 %v7823_v18 }
 0x7fa   :  { %5460 = vmatpush1.bf16.msra.mxu1 %v7821_v23 }
 0x8bf   :  { %v7363_v36 = vpop.f32.mrb[116].mxu1 }
 0x8c0   :  { %v4356_v62 = vpop.f32.mrb[117].mxu1 }
 0x8c1   :  { %v7364_v58 = vpop.f32.mrb[118].mxu1 }
 0x8c2   :  { %v4388_v22 = vpack.c.bf16 %v7364_v58, %v7363_v36  ;;  %v4359_v59 = vpop.f32.mrb[119].mxu1  ;;  %v7847_v36 = vld [vmem:[%s9981_s13 + $0xa4] ss:$16 sps:$4 sm:$0xff]  }
 0x8c3   :  { %v4387_v57 = vpack.c.bf16 %v4359_v59, %v4356_v62  ;;  %v7845_v62 = vld [vmem:[%s9981_s13 + $0xa0] ss:$16 sps:$4 sm:$0xff]   ;;  %v7853_v58 = vld [vmem:[%s9981_s13 + $0xc4] ss:$16 sps:$4 sm:$0xff]  }
 0x8c4   :  { %v4431_v56 = vrot.slane %v4388_v22, 1  ;;  %v4399_v38 = vshll.u32 %v4388_v22, 16  ;;  %v4403_v16 = vshrl.u32 %v4388_v22, 16  ;;  %v7859_v59 = vld [vmem:[%s9981_s13 + $0xe4] ss:$16 sps:$4 sm:$0xff]  }
 0x8c5   :  { %v4394_v54 = vshll.u32 %v4387_v57, 16  ;;  %v4430_v24 = vrot.slane %v4387_v57, 1  ;;  %v4392_v42 = vshrl.u32 %v4387_v57, 16 }
 0x8c6   :  { %v4401_v55 = vrot.slane %v4399_v38, 1  ;;  %v7869_v38 = vld [vmem:[%s9981_s13 + $0x120] ss:$16 sps:$4 sm:$0xff]  }
 0x8c7   :  { %v7367_v26 = vpop.f32.mrb[120].mxu1  ;;  %v4396_v13 = vrot.slane %v4394_v54, 1  ;;  %v9678_v27 = vsel %vm946_vm4, %v4430_v24, %v4431_v56  ;;  %v7863_v54 = vld [vmem:[%s9981_s13 + $0x100] ss:$16 sps:$4 sm:$0xff]   ;;  %v7871_v24 = vld [vmem:[%s9981_s13 + $0x124] ss:$16 sps:$4 sm:$0xff]  }
 0x8c8   :  { %v4372_v25 = vpop.f32.mrb[121].mxu1  ;;  %v4405_v28 = vor.u32 %v4403_v16, %v4401_v55 }
 0x8c9   :  { %v7368_v20 = vpop.f32.mrb[122].mxu1  ;;  %v4397_v60 = vor.u32 %v4396_v13, %v4392_v42  ;;  %v7875_v42 = vld [vmem:[%s9981_s13 + $0x140] ss:$16 sps:$4 sm:$0xff]   ;;  %v7883_v13 = vld [vmem:[%s9981_s13 + $0x164] ss:$16 sps:$4 sm:$0xff]  }
 0x8ca   :  { %v9680_v3 = vpack.c.bf16 %v7368_v20, %v7367_v26  ;;  %v4375_v45 = vpop.f32.mrb[123].mxu1  ;;  %v7877_v26 = vld [vmem:[%s9981_s13 + $0x144] ss:$16 sps:$4 sm:$0xff]   ;;  %v7887_v20 = vld [vmem:[%s9981_s13 + $0x180] ss:$16 sps:$4 sm:$0xff]  }
 0x8cb   :  { %v4389_v4 = vpack.c.bf16 %v4375_v45, %v4372_v25  ;;  %v4402_v6 = vsel %vm259_vm1, %v4397_v60, %v4401_v55  ;;  %v7889_v25 = vld [vmem:[%s9981_s13 + $0x184] ss:$16 sps:$4 sm:$0xff]   ;;  %v7893_v55 = vld [vmem:[%s9981_s13 + $0x1a0] ss:$16 sps:$4 sm:$0xff]  }
 0x8cc   :  { %4773 = vmatprep.mubr.bf16.mxu0 %v4402_v6  ;;  %v4435_v37 = vrot.slane %v9680_v3, 1  ;;  %v4415_v44 = vshll.u32 %v9680_v3, 16  ;;  %v4419_v48 = vshrl.u32 %v9680_v3, 16  ;;  %v7895_v60 = vld [vmem:[%s9981_s13 + $0x1a4] ss:$16 sps:$4 sm:$0xff]  }
 0x8cd   :  { %4774 = vmatmul.mubr.bf16.vlgmr.msra.gmra.mrb[40].mxu0 %v4387_v57  ;;  %v4407_v12 = vshll.u32 %v4389_v4, 16  ;;  %v4433_v40 = vrot.slane %v4389_v4, 1  ;;  %v4411_v14 = vshrl.u32 %v4389_v4, 16  ;;  %v7857_v57 = vld [vmem:[%s9981_s13 + $0xe0] ss:$16 sps:$4 sm:$0xff]  }
 0x8ce   :  { %4815 = vmatpush1.bf16.msra.mxu0 %v7790_v50  ;;  %v4417_v32 = vrot.slane %v4415_v44, 1  ;;  %v7899_v45 = vld [vmem:[%s9981_s13 + $0x1c0] ss:$16 sps:$4 sm:$0xff]   ;;  %v4491_v50 = vlaneseq }
 0x8cf   :  { %4816 = vmatprep.subr.bf16.mxu0 %v7795_v11  ;;  %v4409_v2 = vrot.slane %v4407_v12, 1  ;;  %v4434_v19 = vsel %vm946_vm4, %v4431_v56, %v4433_v40  ;;  %v4436_v21 = vsel %vm946_vm4, %v4433_v40, %v4435_v37  ;;  %v7865_v56 = vld [vmem:[%s9981_s13 + $0x104] ss:$16 sps:$4 sm:$0xff]   ;;  %v4489_v11 = vld [vmem:[#allocation11] sm:$0x3] }
 0x8d0   :  { %v4421_v33 = vor.u32 %v4419_v48, %v4417_v32 }
 0x8d1   :  { %v4410_v5 = vsel %vm259_vm1, %v4405_v28, %v4409_v2  ;;  %v4413_v17 = vor.u32 %v4411_v14, %v4409_v2 }
 0x8d2   :  { %4783 = vmatprep.mubr.bf16.mxu0 %v4410_v5  ;;  %4817 = vmatpush1.bf16.msra.mxu0 %v7793_v34 }
 0x8d3   :  { %4818 = vmatprep.subr.bf16.mxu0 %v7798_v39  ;;  %v4418_v35 = vsel %vm259_vm1, %v4413_v17, %v4417_v32 }
 0x8d5   :  { %4784 = vmatmul.mubr.bf16.gmra.mrb[44].mxu0 %v4388_v22  ;;  %v7851_v22 = vld [vmem:[%s9981_s13 + $0xc0] ss:$16 sps:$4 sm:$0xff]  }
 0x8d6   :  { %4793 = vmatprep.mubr.bf16.mxu0 %v4418_v35  ;;  %4819 = vmatpush1.bf16.msra.mxu0 %v7796_v10 }
 0x8d7   :  { %4820 = vmatprep.subr.bf16.mxu0 %v7801_v46 }
 0x8da   :  { %4821 = vmatpush1.bf16.msra.mxu0 %v7799_v49 }
 0x8db   :  { %4822 = vmatprep.subr.bf16.mxu0 %v7804_v29 }
 0x8dd   :  { %4794 = vmatmul.mubr.bf16.gmra.mrb[48].mxu0 %v4389_v4  ;;  %v9787_v4 = vshrl.u32 %v4491_v50, 7 }
 0x8de   :  { %4803 = vmatprep.mubr.bf16.mxu0 %v4421_v33  ;;  %4823 = vmatpush1.bf16.msra.mxu0 %v7802_v15 }
 0x8df   :  { %4824 = vmatprep.subr.bf16.mxu0 %v7807_v0  ;;  %v9790_v6 = vsub.s32 0, %v9787_v4  ;;  %v9793_v16 = vsub.s32 1, %v9787_v4 }
 0x8e1   :  { %v9799_v12 = vrot.slane %v4489_v11, %v9793_v16 }
 0x8e2   :  { %4825 = vmatpush1.bf16.msra.mxu0 %v7805_v41 }
 0x8e3   :  { %4826 = vmatprep.subr.bf16.mxu0 %v7810_v1 }
 0x8e5   :  { %4804 = vmatmul.mubr.bf16.gmra.mrb[52].mxu0 %v9680_v3  ;;  %v7901_v3 = vld [vmem:[%s9981_s13 + $0x1c4] ss:$16 sps:$4 sm:$0xff]  }
 0x8e6   :  { %4827 = vmatpush1.bf16.msra.mxu0 %v7808_v30  ;;  %4846 = vmatprep.mubr.bf16.mxu0 %v8296_v43 }
 0x8e7   :  { %4828 = vmatprep.subr.bf16.mxu0 %v7813_v51 }
 0x8ea   :  { %4829 = vmatpush1.bf16.msra.mxu0 %v7811_v61 }
 0x8ed   :  { %4847 = vmatmul.mubr.bf16.vlgmr.msra.gmra.mrb[40].mxu0 %v9678_v27  ;;  %v7881_v27 = vld [vmem:[%s9981_s13 + $0x160] ss:$16 sps:$4 sm:$0xff]  }
 0x8ee   :  { %4856 = vmatprep.mubr.bf16.mxu0 %v8296_v43 }
 0x8f5   :  { %4857 = vmatmul.mubr.bf16.gmra.mrb[44].mxu0 %v4434_v19 }
 0x8f6   :  { %4866 = vmatprep.mubr.bf16.mxu0 %v8296_v43 }
 0x8fd   :  { %4867 = vmatmul.mubr.bf16.gmra.mrb[48].mxu0 %v4436_v21 }
 0x8fe   :  { %4876 = vmatprep.mubr.bf16.mxu0 %v8296_v43 }
 0x905   :  { %4877 = vmatmul.mubr.bf16.gmra.mrb[52].mxu0 %v4435_v37  ;;  %v9796_v37 = vrot.slane %v4489_v11, %v9790_v6 }
 0x906   :  { %5038 = vmatprep.mubr.bf16.mxu0 %v8296_v43  ;;  %v7829_v43 = vld [vmem:[%s9981_s13 + $0x44] ss:$16 sps:$4 sm:$0xff]  }
 0x907   :  { %5461 = vmatprep.subr.bf16.mxu1 %v7829_v43 }
 0x908   :  { %5462 = vmatpush1.bf16.msra.mxu1 %v7827_v53 }
 0x909   :  { %5463 = vmatprep.subr.bf16.mxu1 %v7835_v31 }
 0x90c   :  { %5464 = vmatpush1.bf16.msra.mxu1 %v7833_v8 }
 0x90d   :  { %5465 = vmatprep.subr.bf16.mxu1 %v7841_v52 }
 0x910   :  { %5466 = vmatpush1.bf16.msra.mxu1 %v7839_v63 }
 0x911   :  { %5467 = vmatprep.subr.bf16.mxu1 %v7847_v36 }
 0x914   :  { %5468 = vmatpush1.bf16.msra.mxu1 %v7845_v62 }
 0x915   :  { %5469 = vmatprep.subr.bf16.mxu1 %v7853_v58 }
 0x918   :  { %5470 = vmatpush1.bf16.msra.mxu1 %v7851_v22 }
 0x919   :  { %5471 = vmatprep.subr.bf16.mxu1 %v7859_v59 }
 0x91c   :  { %5472 = vmatpush1.bf16.msra.mxu1 %v7857_v57 }
 0x91d   :  { %5473 = vmatprep.subr.bf16.mxu1 %v7865_v56 }
 0x920   :  { %5474 = vmatpush1.bf16.msra.mxu1 %v7863_v54 }
 0x921   :  { %5475 = vmatprep.subr.bf16.mxu1 %v7871_v24 }
 0x924   :  { %5476 = vmatpush1.bf16.msra.mxu1 %v7869_v38 }
 0x925   :  { %5477 = vmatprep.subr.bf16.mxu1 %v7877_v26 }
 0x928   :  { %5478 = vmatpush1.bf16.msra.mxu1 %v7875_v42 }
 0x929   :  { %5479 = vmatprep.subr.bf16.mxu1 %v7883_v13 }
 0x92c   :  { %5480 = vmatpush1.bf16.msra.mxu1 %v7881_v27 }
 0x92d   :  { %5481 = vmatprep.subr.bf16.mxu1 %v7889_v25 }
 0x930   :  { %5482 = vmatpush1.bf16.msra.mxu1 %v7887_v20 }
 0x931   :  { %5483 = vmatprep.subr.bf16.mxu1 %v7895_v60 }
 0x934   :  { %5484 = vmatpush1.bf16.msra.mxu1 %v7893_v55 }
 0x935   :  { %5485 = vmatprep.subr.bf16.mxu1 %v7901_v3 }
 0x938   :  { %5486 = vmatpush1.bf16.msra.mxu1 %v7899_v45 }
 0x9c0   :  { %v4848_v44 = vpop.f32.mrb[40].mxu0 }
 0x9c1   :  { %v7369_v40 = vadd.f32 %v4848_v44, %v9796_v37  ;;  %v4850_v34 = vpop.f32.mrb[41].mxu0 }
 0x9c2   :  { %v7370_v28 = vadd.f32 %v4850_v34, %v9799_v12  ;;  %v4852_v2 = vpop.f32.mrb[42].mxu0 }
 0x9c3   :  { %v4887_v39 = vmax.f32 %v7369_v40, 0.0  ;;  %v7371_v14 = vadd.f32 %v4852_v2, %v9796_v37  ;;  %v4854_v19 = vpop.f32.mrb[43].mxu0 }
 0x9c4   :  { %v4888_v21 = vmax.f32 %v7370_v28, 0.0  ;;  %v7372_v5 = vadd.f32 %v4854_v19, %v9799_v12 }
 0x9c5   :  { %v4889_v17 = vmax.f32 %v7371_v14, 0.0  ;;  %v4919_v10 = vrot.slane %v4887_v39, 1 }
 0x9c6   :  { %v4890_v32 = vmax.f32 %v7372_v5, 0.0  ;;  %v4922_v46 = vrot.slane %v4888_v21, 1 }
 0x9c7   :  { %v4920_v35 = vrot.slane %v4889_v17, 1 }
 0x9c8   :  { %v4923_v49 = vrot.slane %v4890_v32, 1  ;;  %v4858_v29 = vpop.f32.mrb[44].mxu0 }
 0x9c9   :  { %v4921_v15 = vsel %vm946_vm4, %v4919_v10, %v4920_v35  ;;  %v7373_v48 = vadd.f32 %v4858_v29, %v9796_v37  ;;  %v4860_v0 = vpop.f32.mrb[45].mxu0 }
 0x9ca   :  { %v4965_v33 = vmax.f32 %v4887_v39, %v4921_v15  ;;  %v7374_v41 = vadd.f32 %v4860_v0, %v9799_v12  ;;  %v4862_v1 = vpop.f32.mrb[46].mxu0  ;;  %v4924_v30 = vsel %vm946_vm4, %v4922_v46, %v4923_v49 }
 0x9cb   :  { %v4891_v51 = vmax.f32 %v7373_v48, 0.0  ;;  %v7375_v61 = vadd.f32 %v4862_v1, %v9796_v37  ;;  %v4864_v7 = vpop.f32.mrb[47].mxu0  ;;  %v4966_v47 = vmax.f32 %v4888_v21, %v4924_v30 }
 0x9cc   :  { %v4892_v18 = vmax.f32 %v7374_v41, 0.0  ;;  %v7376_v23 = vadd.f32 %v4864_v7, %v9799_v12 }
 0x9cd   :  { %v4925_v43 = vrot.slane %v4891_v51, 1  ;;  %v4893_v53 = vmax.f32 %v7375_v61, 0.0 }
 0x9ce   :  { %v4927_v31 = vrot.slane %v4892_v18, 1  ;;  %v4894_v8 = vmax.f32 %v7376_v23, 0.0 }
 0x9cf   :  { %v4926_v52 = vsel %vm946_vm4, %v4920_v35, %v4925_v43  ;;  %v4929_v63 = vrot.slane %v4893_v53, 1 }
 0x9d0   :  { %v4967_v36 = vmax.f32 %v4889_v17, %v4926_v52  ;;  %v4931_v62 = vrot.slane %v4894_v8, 1  ;;  %v4868_v58 = vpop.f32.mrb[48].mxu0  ;;  %v4928_v22 = vsel %vm946_vm4, %v4923_v49, %v4927_v31 }
 0x9d1   :  { %v4930_v59 = vsel %vm946_vm4, %v4925_v43, %v4929_v63  ;;  %v7377_v57 = vadd.f32 %v4868_v58, %v9796_v37  ;;  %v4870_v56 = vpop.f32.mrb[49].mxu0  ;;  %v4968_v54 = vmax.f32 %v4890_v32, %v4928_v22 }
 0x9d2   :  { %v4969_v24 = vmax.f32 %v4891_v51, %v4930_v59  ;;  %v7378_v38 = vadd.f32 %v4870_v56, %v9799_v12  ;;  %v4872_v26 = vpop.f32.mrb[50].mxu0  ;;  %v4981_v42 = vpack.c.bf16 %v4967_v36, %v4965_v33  ;;  %v4932_v13 = vsel %vm946_vm4, %v4927_v31, %v4931_v62 }
 0x9d3   :  { %v4895_v27 = vmax.f32 %v7377_v57, 0.0  ;;  %v7379_v25 = vadd.f32 %v4872_v26, %v9796_v37  ;;  %v4874_v20 = vpop.f32.mrb[51].mxu0  ;;  %v4982_v60 = vpack.c.bf16 %v4968_v54, %v4966_v47  ;;  %v4970_v55 = vmax.f32 %v4892_v18, %v4932_v13  ;;  %v7820_v54 = vld [vmem:[%s9981_s13 + $0xc] ss:$16 sps:$4 sm:$0xff]   ;;  %v7818_v26 = vld [vmem:[%s9981_s13 + $0x8] ss:$16 sps:$4 sm:$0xff]  }
 0x9d4   :  { %v4896_v3 = vmax.f32 %v7378_v38, 0.0  ;;  %v7380_v45 = vadd.f32 %v4874_v20, %v9799_v12  ;;  %v7814_v38 = vld [vmem:[#allocation14] sm:$0xff]   ;;  %v7824_v13 = vld [vmem:[%s9981_s13 + $0x28] ss:$16 sps:$4 sm:$0xff]  }
 0x9d5   :  { %v4933_v50 = vrot.slane %v4895_v27, 1  ;;  %v4897_v11 = vmax.f32 %v7379_v25, 0.0  ;;  %5006 = vmatprep.subr.bf16.mxu0 %v4982_v60  ;;  %v7838_v25 = vld [vmem:[%s9981_s13 + $0x6c] ss:$16 sps:$4 sm:$0xff]   ;;  %v7836_v20 = vld [vmem:[%s9981_s13 + $0x68] ss:$16 sps:$4 sm:$0xff]  }
 0x9d6   :  { %v4935_v44 = vrot.slane %v4896_v3, 1  ;;  %v4898_v40 = vmax.f32 %v7380_v45, 0.0  ;;  %5007 = vmatpush1.bf16.msra.mxu0 %v4981_v42  ;;  %v7826_v42 = vld [vmem:[%s9981_s13 + $0x2c] ss:$16 sps:$4 sm:$0xff]   ;;  %v7848_v45 = vld [vmem:[%s9981_s13 + $0xa8] ss:$16 sps:$4 sm:$0xff]  }
 0x9d7   :  { %v4934_v34 = vsel %vm946_vm4, %v4929_v63, %v4933_v50  ;;  %v4937_v28 = vrot.slane %v4897_v11, 1  ;;  %v7844_v60 = vld [vmem:[%s9981_s13 + $0x8c] ss:$16 sps:$4 sm:$0xff]  }
 0x9d8   :  { %v4971_v2 = vmax.f32 %v4893_v53, %v4934_v34  ;;  %v4939_v39 = vrot.slane %v4898_v40, 1  ;;  %v4878_v14 = vpop.f32.mrb[52].mxu0  ;;  %v4936_v19 = vsel %vm946_vm4, %v4931_v62, %v4935_v44  ;;  %v7868_v34 = vld [vmem:[%s9981_s13 + $0x10c] ss:$16 sps:$4 sm:$0xff]  }
 0x9d9   :  { %v4938_v21 = vsel %vm946_vm4, %v4933_v50, %v4937_v28  ;;  %v7381_v5 = vadd.f32 %v4878_v14, %v9796_v37  ;;  %v4880_v17 = vpop.f32.mrb[53].mxu0  ;;  %v4972_v32 = vmax.f32 %v4894_v8, %v4936_v19  ;;  %v7856_v50 = vld [vmem:[%s9981_s13 + $0xcc] ss:$16 sps:$4 sm:$0xff]   ;;  %v7878_v19 = vld [vmem:[%s9981_s13 + $0x148] ss:$16 sps:$4 sm:$0xff]  }
 0x9da   :  { %v4973_v10 = vmax.f32 %v4895_v27, %v4938_v21  ;;  %v7382_v35 = vadd.f32 %v4880_v17, %v9799_v12  ;;  %v4882_v46 = vpop.f32.mrb[54].mxu0  ;;  %v4983_v49 = vpack.c.bf16 %v4971_v2, %v4969_v24  ;;  %v4940_v29 = vsel %vm946_vm4, %v4935_v44, %v4939_v39  ;;  %v7830_v27 = vld [vmem:[%s9981_s13 + $0x48] ss:$16 sps:$4 sm:$0xff]   ;;  %v7862_v44 = vld [vmem:[%s9981_s13 + $0xec] ss:$16 sps:$4 sm:$0xff]  }
 0x9db   :  { %v4899_v15 = vmax.f32 %v7381_v5, 0.0  ;;  %v7383_v48 = vadd.f32 %v4882_v46, %v9796_v37  ;;  %v4884_v0 = vpop.f32.mrb[55].mxu0  ;;  %v4984_v33 = vpack.c.bf16 %v4972_v32, %v4970_v55  ;;  %v4974_v41 = vmax.f32 %v4896_v3, %v4940_v29  ;;  %v7842_v55 = vld [vmem:[%s9981_s13 + $0x88] ss:$16 sps:$4 sm:$0xff]   ;;  %v7850_v3 = vld [vmem:[%s9981_s13 + $0xac] ss:$16 sps:$4 sm:$0xff]  }
 0x9dc   :  { %v4900_v1 = vmax.f32 %v7382_v35, 0.0  ;;  %v7384_v30 = vadd.f32 %v4884_v0, %v9799_v12  ;;  %v7874_v2 = vld [vmem:[%s9981_s13 + $0x12c] ss:$16 sps:$4 sm:$0xff]   ;;  %v7884_v5 = vld [vmem:[%s9981_s13 + $0x168] ss:$16 sps:$4 sm:$0xff]  }
 0x9dd   :  { %v4941_v51 = vrot.slane %v4899_v15, 1  ;;  %v4901_v61 = vmax.f32 %v7383_v48, 0.0  ;;  %5008 = vmatprep.subr.bf16.mxu0 %v4984_v33  ;;  %v7880_v14 = vld [vmem:[%s9981_s13 + $0x14c] ss:$16 sps:$4 sm:$0xff]   ;;  %v7890_v32 = vld [vmem:[%s9981_s13 + $0x188] ss:$16 sps:$4 sm:$0xff]  }
 0x9de   :  { %v4943_v7 = vrot.slane %v4900_v1, 1  ;;  %v4902_v47 = vmax.f32 %v7384_v30, 0.0  ;;  %5009 = vmatpush1.bf16.msra.mxu0 %v4983_v49  ;;  %v7886_v21 = vld [vmem:[%s9981_s13 + $0x16c] ss:$16 sps:$4 sm:$0xff]   ;;  %v7896_v35 = vld [vmem:[%s9981_s13 + $0x1a8] ss:$16 sps:$4 sm:$0xff]  }
 0x9df   :  { %v4942_v18 = vsel %vm946_vm4, %v4937_v28, %v4941_v51  ;;  %v4945_v23 = vrot.slane %v4901_v61, 1  ;;  %v7866_v28 = vld [vmem:[%s9981_s13 + $0x108] ss:$16 sps:$4 sm:$0xff]   ;;  %v7892_v17 = vld [vmem:[%s9981_s13 + $0x18c] ss:$16 sps:$4 sm:$0xff]  }
 0x9e0   :  { %v4975_v43 = vmax.f32 %v4897_v11, %v4942_v18  ;;  %v4947_v53 = vrot.slane %v4902_v47, 1  ;;  %v4944_v31 = vsel %vm946_vm4, %v4939_v39, %v4943_v7  ;;  %v7854_v11 = vld [vmem:[%s9981_s13 + $0xc8] ss:$16 sps:$4 sm:$0xff]   ;;  %v7904_v46 = vld [vmem:[%s9981_s13 + $0x1cc] ss:$16 sps:$4 sm:$0xff]  }
 0x9e1   :  { %v4946_v37 = vsel %vm946_vm4, %v4941_v51, %v4945_v23  ;;  %v4979_v8 = vmax.f32 %v4901_v61, %v4945_v23  ;;  %v4976_v52 = vmax.f32 %v4898_v40, %v4944_v31  ;;  %v7860_v40 = vld [vmem:[%s9981_s13 + $0xe8] ss:$16 sps:$4 sm:$0xff]   ;;  %v7907_v29 = vld [vmem:[%s9981_s13 + $0x1e4] ss:$16 sps:$4 sm:$0xff]   ;;  %v7905_v48 = vld [vmem:[%s9981_s13 + $0x1e0] ss:$16 sps:$4 sm:$0xff]  }
 0x9e2   :  { %v4977_v63 = vmax.f32 %v4899_v15, %v4946_v37  ;;  %v4948_v12 = vsel %vm946_vm4, %v4943_v7, %v4947_v53  ;;  %v4980_v36 = vmax.f32 %v4902_v47, %v4947_v53  ;;  %v4985_v62 = vpack.c.bf16 %v4975_v43, %v4973_v10  ;;  %v7872_v39 = vld [vmem:[%s9981_s13 + $0x128] ss:$16 sps:$4 sm:$0xff]   ;;  %v7898_v10 = vld [vmem:[%s9981_s13 + $0x1ac] ss:$16 sps:$4 sm:$0xff]   ;;  %5487 = vmatprep.subr.bf16.mxu1 %v7907_v29 }
 0x9e3   :  { %v4978_v58 = vmax.f32 %v4900_v1, %v4948_v12  ;;  %v4986_v22 = vpack.c.bf16 %v4976_v52, %v4974_v41  ;;  %v7902_v49 = vld [vmem:[%s9981_s13 + $0x1c8] ss:$16 sps:$4 sm:$0xff]   ;;  %v7910_v15 = vld [vmem:[%s9981_s13 + $0x1ec] ss:$16 sps:$4 sm:$0xff]   ;;  %5488 = vmatpush1.bf16.msra.mxu1 %v7905_v48 }
 0x9e4   :  { %v4987_v59 = vpack.c.bf16 %v4979_v8, %v4977_v63  ;;  %v7908_v0 = vld [vmem:[%s9981_s13 + $0x1e8] ss:$16 sps:$4 sm:$0xff]  }
 0x9e5   :  { %v4988_v57 = vpack.c.bf16 %v4980_v36, %v4978_v58  ;;  %5010 = vmatprep.subr.bf16.mxu0 %v4986_v22  ;;  %v7913_v33 = vld [vmem:[#allocation16 + $0x4] ss:$8 sps:$4 sm:$0xff]   ;;  %v7911_v47 = vld [vmem:[#allocation16] ss:$8 sps:$4 sm:$0xff]   ;;  %v7916_v18 = vld [vmem:[#allocation16 + $0x14] ss:$8 sps:$4 sm:$0xff]  }
 0x9e6   :  { %5011 = vmatpush1.bf16.msra.mxu0 %v4985_v62  ;;  %v5001_v24 = vand.u32 %v4987_v59, %v9555_v9  ;;  %5951 = vmatprep.subr.bf16.mxu1 %v7913_v33  ;;  %v7914_v23 = vld [vmem:[#allocation16 + $0x10] ss:$8 sps:$4 sm:$0xff]   ;;  %v7919_v43 = vld [vmem:[#allocation16 + $0x24] ss:$8 sps:$4 sm:$0xff]   ;;  %v7917_v53 = vld [vmem:[#allocation16 + $0x20] ss:$8 sps:$4 sm:$0xff]  }
 0x9e7   :  { %v5004_v56 = vand.u32 %v4988_v57, %v9555_v9  ;;  %v7832_v9 = vld [vmem:[%s9981_s13 + $0x4c] ss:$16 sps:$4 sm:$0xff]  }
 0x9e8   :  { %v7922_v31 = vld [vmem:[#allocation16 + $0x34] ss:$8 sps:$4 sm:$0xff]   ;;  %v7920_v37 = vld [vmem:[#allocation16 + $0x30] ss:$8 sps:$4 sm:$0xff]   ;;  %v7925_v8 = vld [vmem:[#allocation16 + $0x44] ss:$8 sps:$4 sm:$0xff]  }
 0x9e9   :  { %5012 = vmatprep.subr.bf16.mxu0 %v5004_v56  ;;  %v7923_v52 = vld [vmem:[#allocation16 + $0x40] ss:$8 sps:$4 sm:$0xff]   ;;  %v7928_v63 = vld [vmem:[#allocation16 + $0x54] ss:$8 sps:$4 sm:$0xff]   ;;  %v7926_v12 = vld [vmem:[#allocation16 + $0x50] ss:$8 sps:$4 sm:$0xff]  }
 0x9ea   :  { %5013 = vmatpush1.bf16.msra.mxu0 %v5001_v24  ;;  %v7931_v36 = vld [vmem:[#allocation16 + $0x64] ss:$8 sps:$4 sm:$0xff]   ;;  %v7929_v62 = vld [vmem:[#allocation16 + $0x60] ss:$8 sps:$4 sm:$0xff]   ;;  %v7934_v58 = vld [vmem:[#allocation16 + $0x74] ss:$8 sps:$4 sm:$0xff]  }
 0x9eb   :  { %5500 = vmatprep.subr.bf16.mxu0 %v7820_v54  ;;  %v7932_v22 = vld [vmem:[#allocation16 + $0x70] ss:$8 sps:$4 sm:$0xff]   ;;  %v7937_v59 = vld [vmem:[#allocation16 + $0x84] ss:$8 sps:$4 sm:$0xff]   ;;  %v7935_v57 = vld [vmem:[#allocation16 + $0x80] ss:$8 sps:$4 sm:$0xff]  }
 0x9ec   :  { %v7940_v56 = vld [vmem:[#allocation16 + $0x94] ss:$8 sps:$4 sm:$0xff]   ;;  %v7938_v54 = vld [vmem:[#allocation16 + $0x90] ss:$8 sps:$4 sm:$0xff]   ;;  %v7943_v24 = vld [vmem:[#allocation16 + $0xa4] ss:$8 sps:$4 sm:$0xff]  }
 0x9ed   :  { %6540 = vmatmul.mubr.msk.bf16.vlgmr.msra.gmra.mrb[56].mxu0 %vm4996_vm11, %v7814_v38  ;;  %v7941_v38 = vld [vmem:[#allocation16 + $0xa0] ss:$8 sps:$4 sm:$0xff]  }
 0x9ee   :  { %5501 = vmatpush1.bf16.msra.mxu0 %v7818_v26  ;;  %v7946_v26 = vld [vmem:[#allocation16 + $0xb4] ss:$8 sps:$4 sm:$0xff]  }
 0x9ef   :  { %5502 = vmatprep.subr.bf16.mxu0 %v7826_v42  ;;  %v7944_v42 = vld [vmem:[#allocation16 + $0xb0] ss:$8 sps:$4 sm:$0xff]  }
 0x9f2   :  { %5503 = vmatpush1.bf16.msra.mxu0 %v7824_v13  ;;  %v7949_v13 = vld [vmem:[#allocation16 + $0xc4] ss:$8 sps:$4 sm:$0xff]  }
 0x9f3   :  { %5504 = vmatprep.subr.bf16.mxu0 %v7832_v9  ;;  %v7947_v9 = vld [vmem:[#allocation16 + $0xc0] ss:$8 sps:$4 sm:$0xff]  }
 0x9f6   :  { %5505 = vmatpush1.bf16.msra.mxu0 %v7830_v27  ;;  %v7952_v27 = vld [vmem:[#allocation16 + $0xd4] ss:$8 sps:$4 sm:$0xff]  }
 0x9f7   :  { %5506 = vmatprep.subr.bf16.mxu0 %v7838_v25  ;;  %v7950_v25 = vld [vmem:[#allocation16 + $0xd0] ss:$8 sps:$4 sm:$0xff]  }
 0x9fa   :  { %5507 = vmatpush1.bf16.msra.mxu0 %v7836_v20  ;;  %v7955_v20 = vld [vmem:[#allocation16 + $0xe4] ss:$8 sps:$4 sm:$0xff]  }
 0x9fb   :  { %5508 = vmatprep.subr.bf16.mxu0 %v7844_v60  ;;  %v7953_v60 = vld [vmem:[#allocation16 + $0xe0] ss:$8 sps:$4 sm:$0xff]  }
 0x9fe   :  { %5509 = vmatpush1.bf16.msra.mxu0 %v7842_v55  ;;  %v7958_v55 = vld [vmem:[#allocation16 + $0xf4] ss:$8 sps:$4 sm:$0xff]  }
 0x9ff   :  { %5510 = vmatprep.subr.bf16.mxu0 %v7850_v3  ;;  %v7956_v3 = vld [vmem:[#allocation16 + $0xf0] ss:$8 sps:$4 sm:$0xff]  }
 0xa02   :  { %5511 = vmatpush1.bf16.msra.mxu0 %v7848_v45  ;;  %v7961_v45 = vld [vmem:[#allocation16 + $0x104] ss:$8 sps:$4 sm:$0xff]  }
 0xa03   :  { %5512 = vmatprep.subr.bf16.mxu0 %v7856_v50  ;;  %v8007_v50 = vld [vmem:[#allocation17 + $0x40] sm:$0xff]  }
 0xa06   :  { %5513 = vmatpush1.bf16.msra.mxu0 %v7854_v11  ;;  %v8008_v11 = vld [vmem:[#allocation17] sm:$0xff]  }
 0xa07   :  { %5514 = vmatprep.subr.bf16.mxu0 %v7862_v44  ;;  %v8009_v44 = vld [vmem:[#allocation17 + $0x48] sm:$0xff]  }
 0xa0a   :  { %5515 = vmatpush1.bf16.msra.mxu0 %v7860_v40  ;;  %v8010_v40 = vld [vmem:[#allocation17 + $0x8] sm:$0xff]  }
 0xa0b   :  { %5516 = vmatprep.subr.bf16.mxu0 %v7868_v34  ;;  %v8011_v34 = vld [vmem:[#allocation17 + $0x50] sm:$0xff]  }
 0xa0e   :  { %5517 = vmatpush1.bf16.msra.mxu0 %v7866_v28  ;;  %v8012_v28 = vld [vmem:[#allocation17 + $0x10] sm:$0xff]  }
 0xa0f   :  { %5518 = vmatprep.subr.bf16.mxu0 %v7874_v2  ;;  %v8013_v2 = vld [vmem:[#allocation17 + $0x58] sm:$0xff]  }
 0xa12   :  { %5519 = vmatpush1.bf16.msra.mxu0 %v7872_v39  ;;  %v8014_v39 = vld [vmem:[#allocation17 + $0x18] sm:$0xff]  }
 0xa13   :  { %5520 = vmatprep.subr.bf16.mxu0 %v7880_v14  ;;  %v8015_v14 = vld [vmem:[#allocation17 + $0x60] sm:$0xff]  }
 0xa16   :  { %5521 = vmatpush1.bf16.msra.mxu0 %v7878_v19  ;;  %v8016_v19 = vld [vmem:[#allocation17 + $0x20] sm:$0xff]  }
 0xa17   :  { %5522 = vmatprep.subr.bf16.mxu0 %v7886_v21  ;;  %v8017_v21 = vld [vmem:[#allocation17 + $0x68] sm:$0xff]  }
 0xa1a   :  { %5523 = vmatpush1.bf16.msra.mxu0 %v7884_v5  ;;  %v5127_v5 = vsub.s32 2, %v9787_v4 }
 0xa1b   :  { %5524 = vmatprep.subr.bf16.mxu0 %v7892_v17  ;;  %v5115_v17 = vld [vmem:[%s9982_s14] sm:$0xf] }
 0xa1e   :  { %5525 = vmatpush1.bf16.msra.mxu0 %v7890_v32  ;;  %v5131_v32 = vsub.s32 3, %v9787_v4 }
 0xa1f   :  { %5526 = vmatprep.subr.bf16.mxu0 %v7898_v10  ;;  %v5120_v10 = vrot.slane %v5115_v17, %v9790_v6 }
 0xa22   :  { %5527 = vmatpush1.bf16.msra.mxu0 %v7896_v35  ;;  %v5128_v35 = vrot.slane %v5115_v17, %v5127_v5  ;;  %v8003_v5 = vld [vmem:[#allocation16 + $0x1e4] ss:$8 sps:$4 sm:$0xff]  }
 0xa23   :  { %5528 = vmatprep.subr.bf16.mxu0 %v7904_v46  ;;  %v5124_v46 = vrot.slane %v5115_v17, %v9793_v16 }
 0xa26   :  { %5529 = vmatpush1.bf16.msra.mxu0 %v7902_v49  ;;  %v5132_v49 = vrot.slane %v5115_v17, %v5131_v32  ;;  %v8001_v17 = vld [vmem:[#allocation16 + $0x1e0] ss:$8 sps:$4 sm:$0xff]   ;;  %v8006_v32 = vld [vmem:[#allocation16 + $0x1f4] ss:$8 sps:$4 sm:$0xff]  }
 0xa27   :  { %5530 = vmatprep.subr.bf16.mxu0 %v7910_v15 }
 0xa2a   :  { %5531 = vmatpush1.bf16.msra.mxu0 %v7908_v0 }
 0xa2b   :  { %6957 = vmatprep.subr.bf16.mxu0 %v8007_v50  ;;  %v7983_v50 = vld [vmem:[#allocation16 + $0x180] ss:$8 sps:$4 sm:$0xff]  }
 0xac0   :  { %v5040_v41 = vpop.f32.mrb[56].mxu0 }
 0xac1   :  { %v5042_v1 = vpop.f32.mrb[57].mxu0 }
 0xac2   :  { %v5044_v30 = vpop.f32.mrb[58].mxu0 }
 0xac3   :  { %v5049_v51 = vpack.c.bf16 %v5044_v30, %v5040_v41  ;;  %v5046_v61 = vpop.f32.mrb[59].mxu0 }
 0xac4   :  { %v5050_v7 = vpack.c.bf16 %v5046_v61, %v5042_v1 }
 0xac6   :  { %5489 = vmatprep.mubr.bf16.mxu1 %v5050_v7  ;;  %5532 = vmatprep.mubr.bf16.mxu0 %v5050_v7 }
 0xac7   :  { %5490 = vmatmul.mubr.bf16.vlgmr.msra.gmra.mrb[124].mxu1 %v5049_v51  ;;  %5533 = vmatmul.mubr.bf16.vlgmr.msra.gmra.mrb[60].mxu0 %v5049_v51 }
 0xac8   :  { %5952 = vmatpush1.bf16.msra.mxu1 %v7911_v47  ;;  %6958 = vmatpush3.bf16.msra.mxu0 %v8008_v11  ;;  %v7988_v11 = vld [vmem:[#allocation16 + $0x194] ss:$8 sps:$4 sm:$0xff]  }
 0xac9   :  { %5953 = vmatprep.subr.bf16.mxu1 %v7916_v18  ;;  %6959 = vmatprep.subr.bf16.mxu0 %v8009_v44  ;;  %v7986_v44 = vld [vmem:[#allocation16 + $0x190] ss:$8 sps:$4 sm:$0xff]  }
 0xacc   :  { %5954 = vmatpush1.bf16.msra.mxu1 %v7914_v23  ;;  %6960 = vmatpush3.bf16.msra.mxu0 %v8010_v40  ;;  %v7991_v40 = vld [vmem:[#allocation16 + $0x1a4] ss:$8 sps:$4 sm:$0xff]  }
 0xacd   :  { %5955 = vmatprep.subr.bf16.mxu1 %v7919_v43  ;;  %6961 = vmatprep.subr.bf16.mxu0 %v8011_v34  ;;  %v7989_v34 = vld [vmem:[#allocation16 + $0x1a0] ss:$8 sps:$4 sm:$0xff]  }
 0xad0   :  { %5956 = vmatpush1.bf16.msra.mxu1 %v7917_v53  ;;  %6962 = vmatpush3.bf16.msra.mxu0 %v8012_v28  ;;  %v7994_v28 = vld [vmem:[#allocation16 + $0x1b4] ss:$8 sps:$4 sm:$0xff]  }
 0xad1   :  { %5957 = vmatprep.subr.bf16.mxu1 %v7922_v31  ;;  %6963 = vmatprep.subr.bf16.mxu0 %v8013_v2  ;;  %v7992_v2 = vld [vmem:[#allocation16 + $0x1b0] ss:$8 sps:$4 sm:$0xff]  }
 0xad4   :  { %5958 = vmatpush1.bf16.msra.mxu1 %v7920_v37  ;;  %6964 = vmatpush3.bf16.msra.mxu0 %v8014_v39  ;;  %v7997_v39 = vld [vmem:[#allocation16 + $0x1c4] ss:$8 sps:$4 sm:$0xff]  }
 0xad5   :  { %5959 = vmatprep.subr.bf16.mxu1 %v7925_v8  ;;  %6965 = vmatprep.subr.bf16.mxu0 %v8015_v14  ;;  %v7995_v14 = vld [vmem:[#allocation16 + $0x1c0] ss:$8 sps:$4 sm:$0xff]  }
 0xad8   :  { %5960 = vmatpush1.bf16.msra.mxu1 %v7923_v52  ;;  %6966 = vmatpush3.bf16.msra.mxu0 %v8016_v19  ;;  %v8000_v19 = vld [vmem:[#allocation16 + $0x1d4] ss:$8 sps:$4 sm:$0xff]  }
 0xad9   :  { %5961 = vmatprep.subr.bf16.mxu1 %v7928_v63  ;;  %6967 = vmatprep.subr.bf16.mxu0 %v8017_v21  ;;  %v7998_v21 = vld [vmem:[#allocation16 + $0x1d0] ss:$8 sps:$4 sm:$0xff]  }
 0xadc   :  { %5962 = vmatpush1.bf16.msra.mxu1 %v7926_v12 }
 0xadd   :  { %5963 = vmatprep.subr.bf16.mxu1 %v7931_v36 }
 0xae0   :  { %5964 = vmatpush1.bf16.msra.mxu1 %v7929_v62 }
 0xae1   :  { %5965 = vmatprep.subr.bf16.mxu1 %v7934_v58 }
 0xae4   :  { %5966 = vmatpush1.bf16.msra.mxu1 %v7932_v22 }
 0xae5   :  { %5967 = vmatprep.subr.bf16.mxu1 %v7937_v59 }
 0xae8   :  { %5968 = vmatpush1.bf16.msra.mxu1 %v7935_v57  ;;  %v7959_v57 = vld [vmem:[#allocation16 + $0x100] ss:$8 sps:$4 sm:$0xff]  }
 0xae9   :  { %5969 = vmatprep.subr.bf16.mxu1 %v7940_v56  ;;  %v7964_v56 = vld [vmem:[#allocation16 + $0x114] ss:$8 sps:$4 sm:$0xff]  }
 0xaec   :  { %5970 = vmatpush1.bf16.msra.mxu1 %v7938_v54  ;;  %v7962_v54 = vld [vmem:[#allocation16 + $0x110] ss:$8 sps:$4 sm:$0xff]  }
 0xaed   :  { %5971 = vmatprep.subr.bf16.mxu1 %v7943_v24  ;;  %v7967_v24 = vld [vmem:[#allocation16 + $0x124] ss:$8 sps:$4 sm:$0xff]  }
 0xaf0   :  { %5972 = vmatpush1.bf16.msra.mxu1 %v7941_v38  ;;  %v7965_v38 = vld [vmem:[#allocation16 + $0x120] ss:$8 sps:$4 sm:$0xff]  }
 0xaf1   :  { %5973 = vmatprep.subr.bf16.mxu1 %v7946_v26  ;;  %v7970_v26 = vld [vmem:[#allocation16 + $0x134] ss:$8 sps:$4 sm:$0xff]  }
 0xaf4   :  { %5974 = vmatpush1.bf16.msra.mxu1 %v7944_v42  ;;  %v7968_v42 = vld [vmem:[#allocation16 + $0x130] ss:$8 sps:$4 sm:$0xff]  }
 0xaf5   :  { %5975 = vmatprep.subr.bf16.mxu1 %v7949_v13  ;;  %v7973_v13 = vld [vmem:[#allocation16 + $0x144] ss:$8 sps:$4 sm:$0xff]  }
 0xaf8   :  { %5976 = vmatpush1.bf16.msra.mxu1 %v7947_v9  ;;  %v7971_v9 = vld [vmem:[#allocation16 + $0x140] ss:$8 sps:$4 sm:$0xff]  }
 0xaf9   :  { %5977 = vmatprep.subr.bf16.mxu1 %v7952_v27  ;;  %v7976_v27 = vld [vmem:[#allocation16 + $0x154] ss:$8 sps:$4 sm:$0xff]  }
 0xafc   :  { %5978 = vmatpush1.bf16.msra.mxu1 %v7950_v25  ;;  %v7974_v25 = vld [vmem:[#allocation16 + $0x150] ss:$8 sps:$4 sm:$0xff]  }
 0xafd   :  { %5979 = vmatprep.subr.bf16.mxu1 %v7955_v20  ;;  %v7979_v20 = vld [vmem:[#allocation16 + $0x164] ss:$8 sps:$4 sm:$0xff]  }
 0xb00   :  { %5980 = vmatpush1.bf16.msra.mxu1 %v7953_v60  ;;  %v7977_v60 = vld [vmem:[#allocation16 + $0x160] ss:$8 sps:$4 sm:$0xff]  }
 0xb01   :  { %5981 = vmatprep.subr.bf16.mxu1 %v7958_v55  ;;  %v7982_v55 = vld [vmem:[#allocation16 + $0x174] ss:$8 sps:$4 sm:$0xff]  }
 0xb04   :  { %5982 = vmatpush1.bf16.msra.mxu1 %v7956_v3  ;;  %v7980_v3 = vld [vmem:[#allocation16 + $0x170] ss:$8 sps:$4 sm:$0xff]  }
 0xb05   :  { %5994 = vmatprep.subr.bf16.mxu1 %v7961_v45  ;;  %v7985_v45 = vld [vmem:[#allocation16 + $0x184] ss:$8 sps:$4 sm:$0xff]  }
 0xb9a   :  { %v5491_v29 = vpop.f32.mrb[124].mxu1  ;;  %v5534_v15 = vpop.f32.mrb[60].mxu0 }
 0xb9b   :  { %v5492_v48 = vadd.f32 %v5491_v29, %v5120_v10  ;;  %v5493_v0 = vpop.f32.mrb[125].mxu1  ;;  %v5535_v33 = vadd.f32 %v5534_v15, %v5128_v35  ;;  %v5536_v41 = vpop.f32.mrb[61].mxu0  ;;  %v8021_v29 = vld [vmem:[#allocation17 + $0x78] sm:$0xff]  }
 0xb9c   :  { %v5494_v1 = vadd.f32 %v5493_v0, %v5124_v46  ;;  %v5495_v30 = vpop.f32.mrb[126].mxu1  ;;  %v5537_v51 = vadd.f32 %v5536_v41, %v5132_v49  ;;  %v5538_v61 = vpop.f32.mrb[62].mxu0  ;;  %v8022_v15 = vld [vmem:[#allocation17 + $0x38] sm:$0xff]  }
 0xb9d   :  { %v5496_v7 = vadd.f32 %v5495_v30, %v5120_v10  ;;  %v5497_v47 = vpop.f32.mrb[127].mxu1  ;;  %v5539_v18 = vadd.f32 %v5538_v61, %v5128_v35  ;;  %v5540_v4 = vpop.f32.mrb[63].mxu0  ;;  %v5543_v53 = vmax.f32 %v5492_v48, 0.0  ;;  %v5545_v37 = vmax.f32 %v5535_v33, 0.0  ;;  %v8004_v10 = vld [vmem:[#allocation16 + $0x1f0] ss:$8 sps:$4 sm:$0xff]  }
 0xb9e   :  { %v5498_v23 = vadd.f32 %v5497_v47, %v5124_v46  ;;  %v5541_v43 = vadd.f32 %v5540_v4, %v5132_v49  ;;  %v5544_v52 = vmax.f32 %v5494_v1, 0.0  ;;  %v5546_v12 = vmax.f32 %v5537_v51, 0.0  ;;  %v8018_v35 = vld [vmem:[#allocation17 + $0x28] sm:$0xff]   ;;  %v8019_v46 = vld [vmem:[#allocation17 + $0x70] sm:$0xff]   ;;  %v5619_v48 = vld [vmem:[%s9984_s16] sm:$0x3] }
 0xb9f   :  { %v5547_v31 = vmax.f32 %v5496_v7, 0.0  ;;  %v5549_v8 = vmax.f32 %v5539_v18, 0.0  ;;  %6968 = vmatpush3.bf16.msra.mxu0 %v8018_v35  ;;  %v8020_v49 = vld [vmem:[#allocation17 + $0x30] sm:$0xff]   ;;  %v5624_v0 = vrot.slane %v5619_v48, %v9790_v6  ;;  %v5628_v33 = vrot.slane %v5619_v48, %v9793_v16  ;;  %v6669_v6 = vld [vmem:[%s9986_s18] ss:$0 sm:$0xff] }
 0xba0   :  { %v5548_v63 = vmax.f32 %v5498_v23, 0.0  ;;  %v5550_v36 = vmax.f32 %v5541_v43, 0.0  ;;  %6969 = vmatprep.subr.bf16.mxu0 %v8019_v46 }
 0xba1   :  { %v5551_v62 = vpack.c.bf16 %v5547_v31, %v5543_v53  ;;  %v9942_v58 = vpack.c.bf16 %v5549_v8, %v5545_v37 }
 0xba2   :  { %v5552_v22 = vpack.c.bf16 %v5548_v63, %v5544_v52  ;;  %v5554_v59 = vpack.c.bf16 %v5550_v36, %v5546_v12 }
 0xba3   :  { %6970 = vmatpush3.bf16.msra.mxu0 %v8020_v49 }
 0xba4   :  { %5983 = vmatprep.mubr.bf16.mxu1 %v5552_v22  ;;  %6971 = vmatprep.subr.bf16.mxu0 %v8021_v29 }
 0xba5   :  { %5984 = vmatmul.mubr.bf16.vlgmr.msra.gmra.mrb[128].mxu1 %v5551_v62 }
 0xba6   :  { %5995 = vmatpush1.bf16.msra.mxu1 %v7959_v57  ;;  %6026 = vmatprep.mubr.bf16.mxu1 %v5554_v59 }
 0xba7   :  { %5996 = vmatprep.subr.bf16.mxu1 %v7964_v56  ;;  %6972 = vmatpush3.bf16.msra.mxu0 %v8022_v15 }
 0xbaa   :  { %5997 = vmatpush1.bf16.msra.mxu1 %v7962_v54 }
 0xbab   :  { %5998 = vmatprep.subr.bf16.mxu1 %v7967_v24 }
 0xbae   :  { %5999 = vmatpush1.bf16.msra.mxu1 %v7965_v38 }
 0xbaf   :  { %6000 = vmatprep.subr.bf16.mxu1 %v7970_v26 }
 0xbb2   :  { %6001 = vmatpush1.bf16.msra.mxu1 %v7968_v42 }
 0xbb3   :  { %6002 = vmatprep.subr.bf16.mxu1 %v7973_v13 }
 0xbb6   :  { %6003 = vmatpush1.bf16.msra.mxu1 %v7971_v9 }
 0xbb7   :  { %6004 = vmatprep.subr.bf16.mxu1 %v7976_v27 }
 0xbba   :  { %6005 = vmatpush1.bf16.msra.mxu1 %v7974_v25 }
 0xbbb   :  { %6006 = vmatprep.subr.bf16.mxu1 %v7979_v20 }
 0xbbe   :  { %6007 = vmatpush1.bf16.msra.mxu1 %v7977_v60 }
 0xbbf   :  { %6008 = vmatprep.subr.bf16.mxu1 %v7982_v55 }
 0xbc2   :  { %6009 = vmatpush1.bf16.msra.mxu1 %v7980_v3 }
 0xbc3   :  { %6010 = vmatprep.subr.bf16.mxu1 %v7985_v45 }
 0xbc6   :  { %6011 = vmatpush1.bf16.msra.mxu1 %v7983_v50 }
 0xbc7   :  { %6012 = vmatprep.subr.bf16.mxu1 %v7988_v11 }
 0xbca   :  { %6013 = vmatpush1.bf16.msra.mxu1 %v7986_v44 }
 0xbcb   :  { %6014 = vmatprep.subr.bf16.mxu1 %v7991_v40 }
 0xbce   :  { %6015 = vmatpush1.bf16.msra.mxu1 %v7989_v34 }
 0xbcf   :  { %6016 = vmatprep.subr.bf16.mxu1 %v7994_v28 }
 0xbd2   :  { %6017 = vmatpush1.bf16.msra.mxu1 %v7992_v2 }
 0xbd3   :  { %6018 = vmatprep.subr.bf16.mxu1 %v7997_v39 }
 0xbd6   :  { %6019 = vmatpush1.bf16.msra.mxu1 %v7995_v14 }
 0xbd7   :  { %6020 = vmatprep.subr.bf16.mxu1 %v8000_v19 }
 0xbda   :  { %6021 = vmatpush1.bf16.msra.mxu1 %v7998_v21 }
 0xbdb   :  { %6022 = vmatprep.subr.bf16.mxu1 %v8003_v5 }
 0xbde   :  { %6023 = vmatpush1.bf16.msra.mxu1 %v8001_v17 }
 0xbdf   :  { %6024 = vmatprep.subr.bf16.mxu1 %v8006_v32 }
 0xbe2   :  { %6025 = vmatpush1.bf16.msra.mxu1 %v8004_v10 }
 0xbe5   :  { %6027 = vmatmul.mubr.bf16.vlgmr.msra.gmra.mrb[128].mxu1 %v9942_v58 }
 0xcb8   :  { %v6028_v41 = vpop.f32.mrb[128].mxu1 }
 0xcb9   :  { %v7385_v1 = vadd.f32 %v6028_v41, %v5624_v0  ;;  %v6030_v30 = vpop.f32.mrb[129].mxu1 }
 0xcba   :  { %v7386_v51 = vadd.f32 %v6030_v30, %v5628_v33  ;;  %v6032_v61 = vpop.f32.mrb[130].mxu1 }
 0xcbb   :  { %v7387_v7 = vadd.f32 %v6032_v61, %v5624_v0  ;;  %v6034_v47 = vpop.f32.mrb[131].mxu1  ;;  %v6037_v4 = vmax.f32 %v7385_v1, 0.0 }
 0xcbc   :  { %v7388_v18 = vadd.f32 %v6034_v47, %v5628_v33  ;;  %v6038_v43 = vmax.f32 %v7386_v51, 0.0 }
 0xcbd   :  { %v6039_v23 = vmax.f32 %v7387_v7, 0.0 }
 0xcbe   :  { %v6040_v53 = vmax.f32 %v7388_v18, 0.0 }
 0xcbf   :  { %v6041_v31 = vpack.c.bf16 %v6039_v23, %v6037_v4 }
 0xcc0   :  { %v6042_v37 = vpack.c.bf16 %v6040_v53, %v6038_v43 }
 0xcc2   :  { %6210 = vmatprep.mubr.bf16.mxu0 %v6042_v37 }
 0xcc3   :  { %6211 = vmatmul.mubr.bf16.vlgmr.msra.gmra.mrb[64].mxu0 %v6041_v31 }
 0xd96   :  { %v6973_v8 = vpop.f32.mrb[64].mxu0 }
 0xd97   :  { %v6974_v16 = vpop.f32.mrb[65].mxu0 }
 0xd98   :  { %v6975_v52 = vadd.f32 %v6974_v16, %v6973_v8  ;;  %v6976_v63 = vpop.f32.mrb[66].mxu0 }
 0xd99   :  { %v6977_v12 = vpop.f32.mrb[67].mxu0 }
 0xd9a   :  { %v6213_v36 = vadd.f32 %v6975_v52, %v6669_v6  ;;  %v6978_v62 = vadd.f32 %v6977_v12, %v6976_v63 }
 0xd9c   :  { %6219 = vst [vmem:[#allocation19] sm:$0xff] %v6213_v36  ;;  %v6216_v58 = vadd.f32 %v6978_v62, %v6669_v6 }
 0xd9e   :  { %6220 = vst [vmem:[#allocation19 + $0x8] sm:$0xff] %v6216_v58 }
 0xd9f   :  { %8254 = shalt.err (!%p8251_p0)
}
 0xda0   :  { %s8255_s2 = scalar_lea.hbm %s9987_s19, 256 }
 0xda1   :  { %p8256_p1 = scmp.ne.s32.totalorder %s9987_s19, %s8255_s2  ;;  %p8259_p2 = scmp.lt.u32.totalorder %s8255_s2, %s9987_s19 }
 0xda3   :  { %p8261_p3 = pnand %p8259_p2, %p8256_p1 }
 0xda5   :  { %8264 = shalt.err (!%p8261_p3)
}
 0xda6   :  { %6232 = dma.vmem_to_hbm [thread:$0]  %s6227_s28, 256, %s9987_s19, [#allocation4], %s8288_s5, %s8288_s5, %s8289_s1  }
 0xda7   :  { %8277 = dma.done.wait [#allocation4], 256  }
 0xda8   :  { %8278 = vsyncadd [#allocation4], 4294967040 }
 0xda9   :  { %6236 = vsyncpa [#allocation3], 1 }
 0xdaa   :  { %6237 = vsyncpa [#allocation6], 1 }
 0xdab   :  { %6238 = vsyncpa [#allocation9], 1 }
 0xdac   :  { %6239 = vsyncpa [#allocation12], 1 }
 0xdad   :  { %6240 = vsyncpa [#allocation15], 1 }
 0xdae   :  { %6241 = vsyncpa [#allocation18], 1 }
 0xdaf   :  { %6242 = vsyncpa [#allocation4], 1 }

</bundles_post_ra>
